<compile_context>
chip_gen: v5e
topology: v5e:2x2
jax: 0.10.0
libtpu: 0.0.40
codegen_flags: <defaults>
</compile_context>

<pallas_src>
import functools

import jax
import jax.numpy as jnp
from jax import lax
from jax.experimental import pallas as pl
from jax.experimental.pallas import tpu as pltpu

LANE = 128
SUBLANE = 8


def _round_up(v, m):
    return (v + m - 1) // m * m


def _vmem_budget_bytes():
    """Per-generation scoped VMEM limit + per-step tile working-set budget."""
    try:
        cap = int(pltpu.get_tpu_info().vmem_capacity_bytes)
    except Exception:  # query unavailable -> assume v7x-like 64 MiB (safe floor)
        cap = 64 * 1024 * 1024
    # v5e/v6e (128 MiB physical): ~100 MiB scoped; v7x (64 MiB): ~50 MiB scoped.
    vmem_limit = min(int(cap * 0.78), 100 * 1024 * 1024)
    # Headroom under the scoped limit for Mosaic-internal scratch / spills.
    tile_budget = int(vmem_limit * 0.80)
    return vmem_limit, tile_budget


def _estimate_step_bytes(th, w, wc1, wc2, cin_p, cd_p):
    """Rough per-grid-step VMEM working set (bytes) for a candidate row tile."""
    bf16, f32 = 2, 4
    slab_w = wc1 + 2
    ho = th + 2
    b = 0
    # Pipelined blocks (double-buffered): main rows + 4-row halo + bf16 output.
    b += 2 * (th * slab_w * cin_p + 4 * slab_w * cin_p) * bf16
    b += 2 * (th * w * cd_p) * bf16
    # Weights/biases, conservatively counted double-buffered (grid-invariant
    # index map skips the re-fetch DMA, but both buffers are still allocated).
    b += 2 * (3 * 3 * cin_p * cd_p + 3 * 3 * cd_p * cd_p) * bf16
    b += 2 * 2 * cd_p * f32
    # In-kernel temporaries: concatenated slab, one K=3*C patch per conv,
    # conv1 f32 accumulator + bf16 copy of y, conv2 f32 accumulator.
    b += (th + 4) * slab_w * cin_p * bf16
    b += ho * wc1 * 3 * cin_p * bf16
    b += ho * wc1 * cd_p * (f32 + bf16)
    b += th * wc2 * 3 * cd_p * bf16
    b += th * wc2 * cd_p * f32
    return b


def _pick_tile_h(h, w, wc1, wc2, cin_p, cd_p, budget):
    """Largest multiple-of-4 divisor of H whose working set fits the budget."""
    cands = [c for c in range(h, 3, -1) if h % c == 0 and c % 4 == 0]
    if not cands:
        return None
    for c in cands:
        if _estimate_step_bytes(c, w, wc1, wc2, cin_p, cd_p) <= budget:
            return c
    return cands[-1]  # smallest legal tile; Mosaic will warn if it still spills


def _fused_double_conv3x3_kernel(xa_ref, xb_ref, w1_ref, b1_ref, w2_ref,
                                 b2_ref, o_ref, *, img_h, img_w, wc1, wc2):
    # xa_ref: (1, TH, Wc1+2, Cin)  bf16  main rows of the zero-padded input
    # xb_ref: (1, 4,  Wc1+2, Cin)  bf16  bottom halo (next 4 padded rows)
    # w1_ref: (3, 3*Cin, Cmid)     bf16  conv1 weights, (dy, dx*cin) im2col
    # b1_ref: (1, Cmid)            f32
    # w2_ref: (3, 3*Cmid, Cout)    bf16
    # b2_ref: (1, Cout)            f32
    # o_ref : (1, TH, W, Cout)     bf16  lane-dense output tile
    TH = o_ref.shape[1]
    cin = xa_ref.shape[3]
    cmid = w1_ref.shape[2]
    cout = o_ref.shape[3]
    ho = TH + 2
    t = pl.program_id(1)

    # (TH+4, Wc1+2, Cin) slab: main rows + 4-row bottom halo.
    x = jnp.concatenate([xa_ref[0], xb_ref[0]], axis=0)

    def conv3x3(slab, w_ref, out_rows, out_cols, cin_ch):
        # K = 3*C accumulation over dy: three MXU matmuls into an f32
        # accumulator instead of a single K = 9*C im2col patch.
        acc = None
        for dy in range(3):
            rows = slab[dy:dy + out_rows]
            patch = jnp.concatenate(
                [rows[:, dx:dx + out_cols, :] for dx in range(3)], axis=-1)
            patch = patch.reshape(out_rows * out_cols, 3 * cin_ch)
            part = jnp.dot(patch, w_ref[dy], preferred_element_type=jnp.float32)
            acc = part if acc is None else acc + part
        return acc

    # ---- conv1 + bias + ReLU over the extended (TH+2, Wc1) domain ----------
    y = conv3x3(x, w1_ref, ho, wc1, cin)
    y = jnp.maximum(y + b1_ref[...], 0.0).reshape(ho, wc1, cmid)

    # Zero the ring corresponding to conv2's zero padding (and the width
    # alignment-pad columns).  The column bound is t-invariant; the row bound
    # only bites on the first/last tile, but the select is required for the
    # columns on every tile anyway, so both are fused into one where().
    row_g = lax.broadcasted_iota(jnp.int32, (ho, wc1, 1), 0) + (t * TH - 1)
    col_l = lax.broadcasted_iota(jnp.int32, (ho, wc1, 1), 1)
    valid = (row_g >= 0) & (row_g < img_h) & (col_l >= 1) & (col_l <= img_w)
    y = jnp.where(valid, y, 0.0).astype(jnp.bfloat16)

    # ---- conv2 + bias + ReLU over the (TH, Wc2) tile -------------------------
    z = conv3x3(y, w2_ref, TH, wc2, cmid)
    z = jnp.maximum(z + b2_ref[...], 0.0).reshape(TH, wc2, cout)
    o_ref[0] = z[:, :img_w, :].astype(o_ref.dtype)


def mlp_forward_nhwc(x, params, *, tile_h=None, keep_lane_padding=False):
    """Fused Conv3x3+ReLU+Conv3x3+ReLU (NHWC). x: (N, H, W, Cin) float32.

    Returns bf16 activations (downstream layers consume bf16 in this scheme).
    """
    N, H, W, Cin = x.shape
    w1, b1, w2, b2 = params["w1"], params["b1"], params["w2"], params["b2"]
    Cout = w1.shape[-1]
    assert w1.shape == (3, 3, Cin, Cout)
    assert w2.shape == (3, 3, Cout, Cout)

    # Lane-dense channel padding (no-op for GhostingNet's 128/256/512/1024).
    cin_p = _round_up(Cin, LANE)
    cd_p = _round_up(Cout, LANE)

    # Sublane-aligned compute widths: conv2 runs over Wc2 (multiple of 8)
    # columns, conv1 over Wc1 = Wc2 + 8, so both (rows*cols, K) reshapes are
    # layout-free.  Extra columns carry zero input and are discarded on store.
    wc2 = _round_up(W, SUBLANE)
    wc1 = wc2 + SUBLANE
    slab_w = wc1 + 2

    vmem_limit, tile_budget = _vmem_budget_bytes()
    th = tile_h if tile_h is not None else _pick_tile_h(
        H, W, wc1, wc2, cin_p, cd_p, tile_budget)
    assert th is not None and H % th == 0 and th % 4 == 0, (
        "H must have a multiple-of-4 divisor row tile")
    nt = H // th

    # Glue: spatial zero-pad (2 rows top/bottom, 2 cols left, wc1-W cols
    # right), channel pad, bf16 cast; weights reshaped to (dy, 3*Cin, Cout).
    x_p = jnp.pad(
        x, ((0, 0), (2, 2), (2, wc1 - W), (0, cin_p - Cin))).astype(jnp.bfloat16)
    w1_p = jnp.pad(w1, ((0, 0), (0, 0), (0, cin_p - Cin), (0, cd_p - Cout))) \
             .reshape(3, 3 * cin_p, cd_p).astype(jnp.bfloat16)
    w2_p = jnp.pad(w2, ((0, 0), (0, 0), (0, cd_p - Cout), (0, cd_p - Cout))) \
             .reshape(3, 3 * cd_p, cd_p).astype(jnp.bfloat16)
    b1_p = jnp.pad(b1, (0, cd_p - Cout)).reshape(1, cd_p).astype(jnp.float32)
    b2_p = jnp.pad(b2, (0, cd_p - Cout)).reshape(1, cd_p).astype(jnp.float32)

    kernel = functools.partial(
        _fused_double_conv3x3_kernel, img_h=H, img_w=W, wc1=wc1, wc2=wc2)

    cost = pl.CostEstimate(
        flops=2 * N * H * W * 9 * (cin_p * cd_p + cd_p * cd_p),
        transcendentals=0,
        bytes_accessed=(x_p.size * 2 + w1_p.size * 2 + w2_p.size * 2
                        + (b1_p.size + b2_p.size) * 4 + N * H * W * cd_p * 2))

    out = pl.pallas_call(
        kernel,
        out_shape=jax.ShapeDtypeStruct((N, H, W, cd_p), jnp.bfloat16),
        grid_spec=pltpu.PrefetchScalarGridSpec(
            num_scalar_prefetch=0,
            grid=(N, nt),
            in_specs=[
                # main TH rows of the padded image
                pl.BlockSpec((1, th, slab_w, cin_p), lambda n, t: (n, t, 0, 0)),
                # 4-row bottom halo: padded rows [(t+1)*TH, (t+1)*TH + 4)
                pl.BlockSpec((1, 4, slab_w, cin_p),
                             lambda n, t: (n, (t + 1) * (th // 4), 0, 0)),
                # grid-invariant weights / biases (pipeliner skips re-fetch)
                pl.BlockSpec((3, 3 * cin_p, cd_p), lambda n, t: (0, 0, 0)),
                pl.BlockSpec((1, cd_p), lambda n, t: (0, 0)),
                pl.BlockSpec((3, 3 * cd_p, cd_p), lambda n, t: (0, 0, 0)),
                pl.BlockSpec((1, cd_p), lambda n, t: (0, 0)),
            ],
            out_specs=pl.BlockSpec((1, th, W, cd_p), lambda n, t: (n, t, 0, 0)),
        ),
        compiler_params=pltpu.CompilerParams(
            dimension_semantics=("parallel", "parallel"),
            vmem_limit_bytes=vmem_limit,
        ),
        cost_estimate=cost,
    )(x_p, x_p, w1_p, b1_p, w2_p, b2_p)

    if cd_p != Cout and not keep_lane_padding:
        # NOTE: this is a full extra HBM pass; prefer keep_lane_padding=True
        # and slice inside the consumer kernel when Cout % 128 != 0.
        out = out[..., :Cout]
    return out


def mlp_forward_nchw(x_nchw, params, *, tile_h=None):
    """Compatibility adapter for PyTorch-style NCHW callers.

    Prefer mlp_forward_nhwc end-to-end: each transpose here is a full HBM
    round trip of the activation tensor.
    """
    x = jnp.transpose(x_nchw, (0, 2, 3, 1))
    y = mlp_forward_nhwc(x, params, tile_h=tile_h)
    return jnp.transpose(y, (0, 3, 1, 2))


def init_params(key, dim_in, dim_out):
    """Deterministic init (kaiming-uniform-like scale). Weight layout: HWIO."""
    k1, k2, k3, k4 = jax.random.split(key, 4)
    bound1 = 1.0 / jnp.sqrt(dim_in * 9)
    bound2 = 1.0 / jnp.sqrt(dim_out * 9)
    w1 = jax.random.uniform(k1, (3, 3, dim_in, dim_out),
                            minval=-bound1, maxval=bound1, dtype=jnp.float32)
    b1 = jax.random.uniform(k2, (dim_out,),
                            minval=-bound1, maxval=bound1, dtype=jnp.float32)
    w2 = jax.random.uniform(k3, (3, 3, dim_out, dim_out),
                            minval=-bound2, maxval=bound2, dtype=jnp.float32)
    b2 = jax.random.uniform(k4, (dim_out,),
                            minval=-bound2, maxval=bound2, dtype=jnp.float32)
    return {"w1": w1, "b1": b1, "w2": w2, "b2": b2}


def _reference_forward_nhwc(x, params):
    """Pure-JAX reference (lax.conv) mirroring the kernel's bf16-in / f32-acc numerics."""
    def q(a):
        return a.astype(jnp.bfloat16).astype(jnp.float32)

    def conv_relu(h, w, b):
        y = lax.conv_general_dilated(
            q(h), q(w), window_strides=(1, 1), padding=((1, 1), (1, 1)),
            dimension_numbers=("NHWC", "HWIO", "NHWC"),
            preferred_element_type=jnp.float32,
            precision=lax.Precision.HIGHEST)
        return jax.nn.relu(y + b.astype(jnp.float32))

    y = conv_relu(x, params["w1"], params["b1"])
    return conv_relu(y, params["w2"], params["b2"])


if __name__ == "__main__":
    key = jax.random.PRNGKey(0)
    k_x, k_p, k_x2, k_p2 = jax.random.split(key, 4)

    # Shapes consistent with GhostingNet's decoder MLP(256, 128) at a small
    # spatial size; channels are native multiples of 128 (lane-dense).
    N, H, W, C_IN, C_OUT = 2, 16, 16, 256, 128
    x = jax.random.normal(k_x, (N, H, W, C_IN), dtype=jnp.float32)
    params = init_params(k_p, C_IN, C_OUT)

    # tile_h=8 -> grid (2, 2): exercises the halo/masking path and megacore.
    fwd = jax.jit(functools.partial(mlp_forward_nhwc, params=params, tile_h=8))
    out = jax.block_until_ready(fwd(x))
    ref = jax.block_until_ready(_reference_forward_nhwc(x, params))
    assert out.shape == (N, H, W, C_OUT)
    assert out.dtype == jnp.bfloat16
    out_f32 = out.astype(jnp.float32)
    err = float(jnp.max(jnp.abs(out_f32 - ref)))
    assert jnp.allclose(out_f32, ref, atol=2e-2, rtol=2e-2), err

    # NCHW adapter preserves the original PyTorch module interface.
    x_nchw = jnp.transpose(x, (0, 3, 1, 2))
    out_nchw = jax.block_until_ready(
        jax.jit(functools.partial(mlp_forward_nchw, params=params, tile_h=8))(x_nchw))
    assert jnp.allclose(out_nchw.astype(jnp.float32),
                        jnp.transpose(ref, (0, 3, 1, 2)),
                        atol=2e-2, rtol=2e-2)

    # Non-128-multiple channel count exercises the lane-padding / width-padding
    # path and the automatic VMEM-aware tile selection.
    x2 = jax.random.normal(k_x2, (1, 8, 8, 8), dtype=jnp.float32)
    params2 = init_params(k_p2, 8, 8)
    out2 = jax.block_until_ready(
        jax.jit(functools.partial(mlp_forward_nhwc, params=params2))(x2))
    ref2 = _reference_forward_nhwc(x2, params2)
    assert out2.shape == (1, 8, 8, 8)
    assert jnp.allclose(out2.astype(jnp.float32), ref2, atol=2e-2, rtol=2e-2)

    print("KERNEL_OK")
</pallas_src>

<mosaic_0001>
module attributes {stable_mosaic.version = 11 : i64} {
  func.func @_fused_double_conv3x3_kernel(%arg0: i32, %arg1: i32, %arg2: memref<1x8x26x256xbf16, #tpu.memory_space<vmem>>, %arg3: memref<1x4x26x256xbf16, #tpu.memory_space<vmem>>, %arg4: memref<3x768x128xbf16, #tpu.memory_space<vmem>>, %arg5: memref<1x128xf32, #tpu.memory_space<vmem>>, %arg6: memref<3x384x128xbf16, #tpu.memory_space<vmem>>, %arg7: memref<1x128xf32, #tpu.memory_space<vmem>>, %arg8: memref<1x8x16x128xbf16, #tpu.memory_space<vmem>>) attributes {dimension_semantics = [#tpu.dimension_semantics<parallel>, #tpu.dimension_semantics<parallel>], iteration_bounds = array<i64: 2, 2>, scalar_prefetch = 0 : i64, scratch_operands = 0 : i64, tpu.core_type = #tpu.core_type<tc>, window_params = [{transform_indices = @transform_0, window_bounds = array<i64: 1, 8, 26, 256>}, {transform_indices = @transform_1, window_bounds = array<i64: 1, 4, 26, 256>}, {pipeline_mode = #tpu.pipeline_mode<synchronous>, transform_indices = @transform_2, window_bounds = array<i64: 3, 768, 128>}, {pipeline_mode = #tpu.pipeline_mode<synchronous>, transform_indices = @transform_3, window_bounds = array<i64: 1, 128>}, {pipeline_mode = #tpu.pipeline_mode<synchronous>, transform_indices = @transform_4, window_bounds = array<i64: 3, 384, 128>}, {pipeline_mode = #tpu.pipeline_mode<synchronous>, transform_indices = @transform_5, window_bounds = array<i64: 1, 128>}, {transform_indices = @transform_6, window_bounds = array<i64: 1, 8, 16, 128>}]} {
    %c0 = arith.constant 0 : index
    %c0_0 = arith.constant 0 : index
    %c0_1 = arith.constant 0 : index
    %c0_2 = arith.constant 0 : index
    %0 = vector.load %arg2[%c0, %c0_0, %c0_1, %c0_2] : memref<1x8x26x256xbf16, #tpu.memory_space<vmem>>, vector<1x8x26x256xbf16>
    %1 = vector.shape_cast %0 : vector<1x8x26x256xbf16> to vector<8x26x256xbf16>
    %c0_3 = arith.constant 0 : index
    %c0_4 = arith.constant 0 : index
    %c0_5 = arith.constant 0 : index
    %c0_6 = arith.constant 0 : index
    %2 = vector.load %arg3[%c0_3, %c0_4, %c0_5, %c0_6] : memref<1x4x26x256xbf16, #tpu.memory_space<vmem>>, vector<1x4x26x256xbf16>
    %3 = vector.shape_cast %2 : vector<1x4x26x256xbf16> to vector<4x26x256xbf16>
    %4 = tpu.concatenate %1, %3 in 0 : vector<8x26x256xbf16>, vector<4x26x256xbf16> -> vector<12x26x256xbf16>
    %5 = vector.extract_strided_slice %4 {offsets = [0, 0, 0], sizes = [10, 26, 256], strides = [1, 1, 1]} : vector<12x26x256xbf16> to vector<10x26x256xbf16>
    %6 = vector.extract_strided_slice %5 {offsets = [0, 0, 0], sizes = [10, 24, 256], strides = [1, 1, 1]} : vector<10x26x256xbf16> to vector<10x24x256xbf16>
    %7 = vector.extract_strided_slice %5 {offsets = [0, 1, 0], sizes = [10, 24, 256], strides = [1, 1, 1]} : vector<10x26x256xbf16> to vector<10x24x256xbf16>
    %8 = vector.extract_strided_slice %5 {offsets = [0, 2, 0], sizes = [10, 24, 256], strides = [1, 1, 1]} : vector<10x26x256xbf16> to vector<10x24x256xbf16>
    %9 = tpu.concatenate %6, %7, %8 in 2 : vector<10x24x256xbf16>, vector<10x24x256xbf16>, vector<10x24x256xbf16> -> vector<10x24x768xbf16>
    %10 = vector.shape_cast %9 : vector<10x24x768xbf16> to vector<240x768xbf16>
    %c0_7 = arith.constant 0 : index
    %c0_8 = arith.constant 0 : index
    %c0_9 = arith.constant 0 : index
    %11 = vector.load %arg4[%c0_7, %c0_8, %c0_9] : memref<3x768x128xbf16, #tpu.memory_space<vmem>>, vector<1x768x128xbf16>
    %12 = vector.shape_cast %11 : vector<1x768x128xbf16> to vector<768x128xbf16>
    %cst = arith.constant dense<0.000000e+00> : vector<240x128xf32>
    %13 = tpu.matmul %10, %12, %cst {dimension_numbers = #tpu.dot_dimension_numbers<[1], [0], [0], [1], [0, 0, 1, 1], [], []>} : vector<240x768xbf16>, vector<768x128xbf16>, vector<240x128xf32> -> vector<240x128xf32>
    %14 = vector.extract_strided_slice %4 {offsets = [1, 0, 0], sizes = [10, 26, 256], strides = [1, 1, 1]} : vector<12x26x256xbf16> to vector<10x26x256xbf16>
    %15 = vector.extract_strided_slice %14 {offsets = [0, 0, 0], sizes = [10, 24, 256], strides = [1, 1, 1]} : vector<10x26x256xbf16> to vector<10x24x256xbf16>
    %16 = vector.extract_strided_slice %14 {offsets = [0, 1, 0], sizes = [10, 24, 256], strides = [1, 1, 1]} : vector<10x26x256xbf16> to vector<10x24x256xbf16>
    %17 = vector.extract_strided_slice %14 {offsets = [0, 2, 0], sizes = [10, 24, 256], strides = [1, 1, 1]} : vector<10x26x256xbf16> to vector<10x24x256xbf16>
    %18 = tpu.concatenate %15, %16, %17 in 2 : vector<10x24x256xbf16>, vector<10x24x256xbf16>, vector<10x24x256xbf16> -> vector<10x24x768xbf16>
    %19 = vector.shape_cast %18 : vector<10x24x768xbf16> to vector<240x768xbf16>
    %c1 = arith.constant 1 : index
    %c0_10 = arith.constant 0 : index
    %c0_11 = arith.constant 0 : index
    %20 = vector.load %arg4[%c1, %c0_10, %c0_11] : memref<3x768x128xbf16, #tpu.memory_space<vmem>>, vector<1x768x128xbf16>
    %21 = vector.shape_cast %20 : vector<1x768x128xbf16> to vector<768x128xbf16>
    %cst_12 = arith.constant dense<0.000000e+00> : vector<240x128xf32>
    %22 = tpu.matmul %19, %21, %cst_12 {dimension_numbers = #tpu.dot_dimension_numbers<[1], [0], [0], [1], [0, 0, 1, 1], [], []>} : vector<240x768xbf16>, vector<768x128xbf16>, vector<240x128xf32> -> vector<240x128xf32>
    %23 = arith.addf %13, %22 : vector<240x128xf32>
    %24 = vector.extract_strided_slice %4 {offsets = [2, 0, 0], sizes = [10, 26, 256], strides = [1, 1, 1]} : vector<12x26x256xbf16> to vector<10x26x256xbf16>
    %25 = vector.extract_strided_slice %24 {offsets = [0, 0, 0], sizes = [10, 24, 256], strides = [1, 1, 1]} : vector<10x26x256xbf16> to vector<10x24x256xbf16>
    %26 = vector.extract_strided_slice %24 {offsets = [0, 1, 0], sizes = [10, 24, 256], strides = [1, 1, 1]} : vector<10x26x256xbf16> to vector<10x24x256xbf16>
    %27 = vector.extract_strided_slice %24 {offsets = [0, 2, 0], sizes = [10, 24, 256], strides = [1, 1, 1]} : vector<10x26x256xbf16> to vector<10x24x256xbf16>
    %28 = tpu.concatenate %25, %26, %27 in 2 : vector<10x24x256xbf16>, vector<10x24x256xbf16>, vector<10x24x256xbf16> -> vector<10x24x768xbf16>
    %29 = vector.shape_cast %28 : vector<10x24x768xbf16> to vector<240x768xbf16>
    %c2 = arith.constant 2 : index
    %c0_13 = arith.constant 0 : index
    %c0_14 = arith.constant 0 : index
    %30 = vector.load %arg4[%c2, %c0_13, %c0_14] : memref<3x768x128xbf16, #tpu.memory_space<vmem>>, vector<1x768x128xbf16>
    %31 = vector.shape_cast %30 : vector<1x768x128xbf16> to vector<768x128xbf16>
    %cst_15 = arith.constant dense<0.000000e+00> : vector<240x128xf32>
    %32 = tpu.matmul %29, %31, %cst_15 {dimension_numbers = #tpu.dot_dimension_numbers<[1], [0], [0], [1], [0, 0, 1, 1], [], []>} : vector<240x768xbf16>, vector<768x128xbf16>, vector<240x128xf32> -> vector<240x128xf32>
    %33 = arith.addf %23, %32 : vector<240x128xf32>
    %c0_16 = arith.constant 0 : index
    %c0_17 = arith.constant 0 : index
    %34 = vector.load %arg5[%c0_16, %c0_17] : memref<1x128xf32, #tpu.memory_space<vmem>>, vector<1x128xf32>
    %35 = vector.broadcast %34 : vector<1x128xf32> to vector<240x128xf32>
    %36 = arith.addf %33, %35 : vector<240x128xf32>
    %cst_18 = arith.constant 0.000000e+00 : f32
    %37 = vector.broadcast %cst_18 : f32 to vector<240x128xf32>
    %38 = arith.maximumf %36, %37 : vector<240x128xf32>
    %39 = vector.shape_cast %38 : vector<240x128xf32> to vector<10x24x128xf32>
    %40 = tpu.iota {dimensions = array<i32: 0>} : vector<10x24x1xi32>
    %c8_i32 = arith.constant 8 : i32
    %41 = arith.muli %arg1, %c8_i32 : i32
    %c1_i32 = arith.constant 1 : i32
    %42 = arith.subi %41, %c1_i32 : i32
    %43 = vector.broadcast %42 : i32 to vector<10x24x1xi32>
    %44 = arith.addi %40, %43 : vector<10x24x1xi32>
    %45 = tpu.iota {dimensions = array<i32: 1>} : vector<10x24x1xi32>
    %c0_i32 = arith.constant 0 : i32
    %46 = vector.broadcast %c0_i32 : i32 to vector<10x24x1xi32>
    %47 = arith.cmpi sge, %44, %46 : vector<10x24x1xi32>
    %c16_i32 = arith.constant 16 : i32
    %48 = vector.broadcast %c16_i32 : i32 to vector<10x24x1xi32>
    %49 = arith.cmpi slt, %44, %48 : vector<10x24x1xi32>
    %50 = arith.andi %47, %49 : vector<10x24x1xi1>
    %c1_i32_19 = arith.constant 1 : i32
    %51 = vector.broadcast %c1_i32_19 : i32 to vector<10x24x1xi32>
    %52 = arith.cmpi sge, %45, %51 : vector<10x24x1xi32>
    %53 = arith.andi %50, %52 : vector<10x24x1xi1>
    %c16_i32_20 = arith.constant 16 : i32
    %54 = vector.broadcast %c16_i32_20 : i32 to vector<10x24x1xi32>
    %55 = arith.cmpi sle, %45, %54 : vector<10x24x1xi32>
    %56 = arith.andi %53, %55 : vector<10x24x1xi1>
    %cst_21 = arith.constant 0.000000e+00 : f32
    %57 = vector.shape_cast %56 : vector<10x24x1xi1> to vector<10x24x1xi1>
    %58 = vector.broadcast %57 : vector<10x24x1xi1> to vector<10x24x128xi1>
    %59 = vector.broadcast %cst_21 : f32 to vector<10x24x128xf32>
    %60 = arith.select %58, %39, %59 : vector<10x24x128xi1>, vector<10x24x128xf32>
    %61 = arith.truncf %60 : vector<10x24x128xf32> to vector<10x24x128xbf16>
    %62 = vector.extract_strided_slice %61 {offsets = [0, 0, 0], sizes = [8, 24, 128], strides = [1, 1, 1]} : vector<10x24x128xbf16> to vector<8x24x128xbf16>
    %63 = vector.extract_strided_slice %62 {offsets = [0, 0, 0], sizes = [8, 16, 128], strides = [1, 1, 1]} : vector<8x24x128xbf16> to vector<8x16x128xbf16>
    %64 = vector.extract_strided_slice %62 {offsets = [0, 1, 0], sizes = [8, 16, 128], strides = [1, 1, 1]} : vector<8x24x128xbf16> to vector<8x16x128xbf16>
    %65 = vector.extract_strided_slice %62 {offsets = [0, 2, 0], sizes = [8, 16, 128], strides = [1, 1, 1]} : vector<8x24x128xbf16> to vector<8x16x128xbf16>
    %66 = tpu.concatenate %63, %64, %65 in 2 : vector<8x16x128xbf16>, vector<8x16x128xbf16>, vector<8x16x128xbf16> -> vector<8x16x384xbf16>
    %67 = vector.shape_cast %66 : vector<8x16x384xbf16> to vector<128x384xbf16>
    %c0_22 = arith.constant 0 : index
    %c0_23 = arith.constant 0 : index
    %c0_24 = arith.constant 0 : index
    %68 = vector.load %arg6[%c0_22, %c0_23, %c0_24] : memref<3x384x128xbf16, #tpu.memory_space<vmem>>, vector<1x384x128xbf16>
    %69 = vector.shape_cast %68 : vector<1x384x128xbf16> to vector<384x128xbf16>
    %cst_25 = arith.constant dense<0.000000e+00> : vector<128x128xf32>
    %70 = tpu.matmul %67, %69, %cst_25 {dimension_numbers = #tpu.dot_dimension_numbers<[1], [0], [0], [1], [0, 0, 1, 1], [], []>} : vector<128x384xbf16>, vector<384x128xbf16>, vector<128x128xf32> -> vector<128x128xf32>
    %71 = vector.extract_strided_slice %61 {offsets = [1, 0, 0], sizes = [8, 24, 128], strides = [1, 1, 1]} : vector<10x24x128xbf16> to vector<8x24x128xbf16>
    %72 = vector.extract_strided_slice %71 {offsets = [0, 0, 0], sizes = [8, 16, 128], strides = [1, 1, 1]} : vector<8x24x128xbf16> to vector<8x16x128xbf16>
    %73 = vector.extract_strided_slice %71 {offsets = [0, 1, 0], sizes = [8, 16, 128], strides = [1, 1, 1]} : vector<8x24x128xbf16> to vector<8x16x128xbf16>
    %74 = vector.extract_strided_slice %71 {offsets = [0, 2, 0], sizes = [8, 16, 128], strides = [1, 1, 1]} : vector<8x24x128xbf16> to vector<8x16x128xbf16>
    %75 = tpu.concatenate %72, %73, %74 in 2 : vector<8x16x128xbf16>, vector<8x16x128xbf16>, vector<8x16x128xbf16> -> vector<8x16x384xbf16>
    %76 = vector.shape_cast %75 : vector<8x16x384xbf16> to vector<128x384xbf16>
    %c1_26 = arith.constant 1 : index
    %c0_27 = arith.constant 0 : index
    %c0_28 = arith.constant 0 : index
    %77 = vector.load %arg6[%c1_26, %c0_27, %c0_28] : memref<3x384x128xbf16, #tpu.memory_space<vmem>>, vector<1x384x128xbf16>
    %78 = vector.shape_cast %77 : vector<1x384x128xbf16> to vector<384x128xbf16>
    %cst_29 = arith.constant dense<0.000000e+00> : vector<128x128xf32>
    %79 = tpu.matmul %76, %78, %cst_29 {dimension_numbers = #tpu.dot_dimension_numbers<[1], [0], [0], [1], [0, 0, 1, 1], [], []>} : vector<128x384xbf16>, vector<384x128xbf16>, vector<128x128xf32> -> vector<128x128xf32>
    %80 = arith.addf %70, %79 : vector<128x128xf32>
    %81 = vector.extract_strided_slice %61 {offsets = [2, 0, 0], sizes = [8, 24, 128], strides = [1, 1, 1]} : vector<10x24x128xbf16> to vector<8x24x128xbf16>
    %82 = vector.extract_strided_slice %81 {offsets = [0, 0, 0], sizes = [8, 16, 128], strides = [1, 1, 1]} : vector<8x24x128xbf16> to vector<8x16x128xbf16>
    %83 = vector.extract_strided_slice %81 {offsets = [0, 1, 0], sizes = [8, 16, 128], strides = [1, 1, 1]} : vector<8x24x128xbf16> to vector<8x16x128xbf16>
    %84 = vector.extract_strided_slice %81 {offsets = [0, 2, 0], sizes = [8, 16, 128], strides = [1, 1, 1]} : vector<8x24x128xbf16> to vector<8x16x128xbf16>
    %85 = tpu.concatenate %82, %83, %84 in 2 : vector<8x16x128xbf16>, vector<8x16x128xbf16>, vector<8x16x128xbf16> -> vector<8x16x384xbf16>
    %86 = vector.shape_cast %85 : vector<8x16x384xbf16> to vector<128x384xbf16>
    %c2_30 = arith.constant 2 : index
    %c0_31 = arith.constant 0 : index
    %c0_32 = arith.constant 0 : index
    %87 = vector.load %arg6[%c2_30, %c0_31, %c0_32] : memref<3x384x128xbf16, #tpu.memory_space<vmem>>, vector<1x384x128xbf16>
    %88 = vector.shape_cast %87 : vector<1x384x128xbf16> to vector<384x128xbf16>
    %cst_33 = arith.constant dense<0.000000e+00> : vector<128x128xf32>
    %89 = tpu.matmul %86, %88, %cst_33 {dimension_numbers = #tpu.dot_dimension_numbers<[1], [0], [0], [1], [0, 0, 1, 1], [], []>} : vector<128x384xbf16>, vector<384x128xbf16>, vector<128x128xf32> -> vector<128x128xf32>
    %90 = arith.addf %80, %89 : vector<128x128xf32>
    %c0_34 = arith.constant 0 : index
    %c0_35 = arith.constant 0 : index
    %91 = vector.load %arg7[%c0_34, %c0_35] : memref<1x128xf32, #tpu.memory_space<vmem>>, vector<1x128xf32>
    %92 = vector.broadcast %91 : vector<1x128xf32> to vector<128x128xf32>
    %93 = arith.addf %90, %92 : vector<128x128xf32>
    %cst_36 = arith.constant 0.000000e+00 : f32
    %94 = vector.broadcast %cst_36 : f32 to vector<128x128xf32>
    %95 = arith.maximumf %93, %94 : vector<128x128xf32>
    %96 = vector.shape_cast %95 : vector<128x128xf32> to vector<8x16x128xf32>
    %97 = arith.truncf %96 : vector<8x16x128xf32> to vector<8x16x128xbf16>
    %c0_37 = arith.constant 0 : index
    %c0_38 = arith.constant 0 : index
    %c0_39 = arith.constant 0 : index
    %c0_40 = arith.constant 0 : index
    %98 = vector.load %arg8[%c0_37, %c0_38, %c0_39, %c0_40] : memref<1x8x16x128xbf16, #tpu.memory_space<vmem>>, vector<1x8x16x128xbf16>
    %99 = vector.shape_cast %98 : vector<1x8x16x128xbf16> to vector<8x16x128xbf16>
    %100 = vector.shape_cast %97 : vector<8x16x128xbf16> to vector<1x8x16x128xbf16>
    tpu.vector_store %arg8[%c0_37, %c0_38, %c0_39, %c0_40], %100 {strides = array<i32>} : memref<1x8x16x128xbf16, #tpu.memory_space<vmem>>, vector<1x8x16x128xbf16>,
    return
  }
  func.func @transform_0(%arg0: i32, %arg1: i32) -> (i32, i32, i32, i32) {
    %c0_i32 = arith.constant 0 : i32
    %c0_i32_0 = arith.constant 0 : i32
    %c0_i32_1 = arith.constant 0 : i32
    return %arg0, %arg1, %c0_i32, %c0_i32_0 : i32, i32, i32, i32
  }
  func.func @transform_1(%arg0: i32, %arg1: i32) -> (i32, i32, i32, i32) {
    %c1_i32 = arith.constant 1 : i32
    %0 = arith.addi %arg1, %c1_i32 : i32
    %c2_i32 = arith.constant 2 : i32
    %1 = arith.muli %0, %c2_i32 : i32
    %c0_i32 = arith.constant 0 : i32
    %c0_i32_0 = arith.constant 0 : i32
    %c0_i32_1 = arith.constant 0 : i32
    return %arg0, %1, %c0_i32, %c0_i32_0 : i32, i32, i32, i32
  }
  func.func @transform_2(%arg0: i32, %arg1: i32) -> (i32, i32, i32) {
    %c0_i32 = arith.constant 0 : i32
    %c0_i32_0 = arith.constant 0 : i32
    %c0_i32_1 = arith.constant 0 : i32
    %c0_i32_2 = arith.constant 0 : i32
    return %c0_i32, %c0_i32_0, %c0_i32_1 : i32, i32, i32
  }
  func.func @transform_3(%arg0: i32, %arg1: i32) -> (i32, i32) {
    %c0_i32 = arith.constant 0 : i32
    %c0_i32_0 = arith.constant 0 : i32
    %c0_i32_1 = arith.constant 0 : i32
    return %c0_i32, %c0_i32_0 : i32, i32
  }
  func.func @transform_4(%arg0: i32, %arg1: i32) -> (i32, i32, i32) {
    %c0_i32 = arith.constant 0 : i32
    %c0_i32_0 = arith.constant 0 : i32
    %c0_i32_1 = arith.constant 0 : i32
    %c0_i32_2 = arith.constant 0 : i32
    return %c0_i32, %c0_i32_0, %c0_i32_1 : i32, i32, i32
  }
  func.func @transform_5(%arg0: i32, %arg1: i32) -> (i32, i32) {
    %c0_i32 = arith.constant 0 : i32
    %c0_i32_0 = arith.constant 0 : i32
    %c0_i32_1 = arith.constant 0 : i32
    return %c0_i32, %c0_i32_0 : i32, i32
  }
  func.func @transform_6(%arg0: i32, %arg1: i32) -> (i32, i32, i32, i32) {
    %c0_i32 = arith.constant 0 : i32
    %c0_i32_0 = arith.constant 0 : i32
    %c0_i32_1 = arith.constant 0 : i32
    return %arg0, %arg1, %c0_i32, %c0_i32_0 : i32, i32, i32, i32
  }
}

</mosaic_0001>

<bundles_post_ra>
// kernel: mlp_forward_nhwc.1
= control target key start
LH: loop header
LB: loop body
LE: loop exit
PB: predicated region body
PF: predicated region fallthrough
CT: control target
= control target key end

     0   :  { %11 = vsyncpa [#allocation3], 0  ;;  %s11509_s0 = inlined_call_operand.vmem [shape: bf16[2,20,26,256], index: 0, kind: input, shape index: {}, may-alias: {0,1}]   ;;  %s11510_s1 = inlined_call_operand.vmem [shape: bf16[2,20,26,256], index: 1, kind: input, shape index: {}, may-alias: {0,1}]   ;;  %s11511_s2 = inlined_call_operand.vmem [shape: bf16[3,768,128], index: 2, kind: input, shape index: {}]   ;;  %s11512_s3 = inlined_call_operand.vmem [shape: f32[1,128], index: 3, kind: input, shape index: {}]   ;;  %s11513_s4 = inlined_call_operand.vmem [shape: bf16[3,384,128], index: 4, kind: input, shape index: {}]   ;;  %s11514_s5 = inlined_call_operand.vmem [shape: f32[1,128], index: 5, kind: input, shape index: {}]   ;;  %s11515_s6 = inlined_call_operand.hbm [shape: bf16[2,16,16,128], index: 6, kind: output, shape index: {}]  }
   0x1   :  { %13 = vsyncpa [#allocation3 + $0x1], 0  ;;  %s7725_s21 = smov 0   ;;  %s7727_s22 = smov 0  }
   0x2   :  { %s7729_s23 = smov 0   ;;  %s7731_s24 = smov 0  }
   0x3   :  { %s7733_s25 = smov 0   ;;  %s7735_s26 = smov 0  }
   0x4   :  { %s7737_s27 = smov 0   ;;  %s7739_s28 = smov 0  }
   0x5 LB: > { %11788 = sst [smem:[#allocation5_spill]] %s7678_s26  ;;  %s6039_s29 = sadd.s32 4294967295, %s7686_s28   ;;  %s7686_s28 = sphi %s7739_s28, %s19_s28   ;;  %s7682_s27 = sphi %s7737_s27, %s12424_s27   ;;  %s7678_s26 = sphi %s7735_s26, %s12423_s26   ;;  %s7674_s25 = sphi %s7733_s25, %s12422_s25   ;;  %s7670_s24 = sphi %s7731_s24, %s12421_s24   ;;  %s7666_s23 = sphi %s7729_s23, %s12427_s23   ;;  %s7662_s22 = sphi %s7727_s22, %s12426_s22   ;;  %s7658_s21 = sphi %s7725_s21, %s12425_s21  }
   0x6   : > { %11789 = sst [smem:[#allocation6_spill]] %s7682_s27  ;;  %s6040_s30 = sadd.s32 4294967294, %s7686_s28  }
   0x7   : > { %s28_s7 = sadd.s32 1, %s7678_s26  ;;  %s31_s8 = sadd.s32 1, %s7682_s27 }
   0x8   : > { %p29_p0 = scmp.ge.s32.totalorder %s28_s7, 2  ;;  %p194_p1 = scmp.ne.s32.totalorder %s7666_s23, %s7662_s22 }
   0x9   : > { %p195_p2 = scmp.eq.s32.totalorder %s6039_s29, 3  ;;  %p200_p5 = scmp.ne.s32.totalorder %s7662_s22, %s7658_s21 }
   0xa   : > { %s12429_s7 = smov (%p29_p0, %s28_s7), 0  ;;  %s12431_s8 = smov (!%p29_p0, %s31_s8), %s7682_s27 }
   0xb   : > { %11790 = sst [smem:[#allocation7_spill]] %s12429_s7  ;;  %s180_s9 = ssub.s32 %s7678_s26, %s12429_s7 }
   0xc   : > { %p7776_p3 = por %p195_p2, %p194_p1  ;;  %p33_p4 = scmp.ge.s32.totalorder %s12431_s8, 2 }
   0xd   : > { %p201_p6 = scmp.eq.s32.totalorder %s6040_s30, 3  ;;  %p6045_p7 = scmp.ge.s32.totalorder %s7686_s28, 1 }
   0xe   : > { %s12433_s8 = smov (%p33_p4, %s12431_s8), 0  ;;  %p275_p9 = scmp.lt.s32.totalorder %s7686_s28, 5 }
   0xf   : > { %11792 = sst [smem:[#allocation8_spill]] %s12433_s8  ;;  %p7785_p8 = por %p201_p6, %p200_p5 }
  0x10   : > { %s179_s12 = ssub.s32 %s7682_s27, %s12433_s8  ;;  %s184_s13 = sadd.s32 1, %s7666_s23 }
  0x11   : > { %s181_s14 = sor.u32 %s180_s9, %s179_s12  ;;  %p276_p10 = pnand %p6045_p7, %p275_p9 }
  0x12   : > { %p182_p11 = scmp.eq.s32.totalorder %s181_s14, 0 }
  0x13   : > { %279 = sbr.rel (%p276_p10) target bundleno = 1830 (0x726), region = 44 }
  0x14   : > { %s7794_s15 = scalar_select %p182_p11, %s7666_s23, %s184_s13  }
  0x16   : > { %11794 = sst [smem:[#allocation9_spill]] %s7794_s15 }
  0x18   : > { %v7287_v0 = vld [vmem:[%s11511_s2 + $0x1b8] sm:$0xff]  ;;  %s7800_s18 = sshll.u32 %s7670_s24, 3  ;;  %p335_p12 = scmp.lt.s32.totalorder %s7674_s25, 1  ;;  %v7286_v1 = vld [vmem:[%s11511_s2 + $0x1b0] sm:$0xff]  ;;  %v7285_v2 = vld [vmem:[%s11511_s2 + $0x1a8] sm:$0xff]  ;;  %vm876_vm1 = vcmask 1046528  }
  0x19   : > { %1772 = vmatpush.bf16.msra.mxu0 %v7287_v0  ;;  %7498 = vmatpush.bf16.msra.mxu1 %v7287_v0  ;;  %p337_p13 = scmp.lt.s32.totalorder %s7800_s18, 19  ;;  %s7490_s29 = sadd.s32 8, %s7800_s18  ;;  %v7311_v3 = vld [vmem:[%s11511_s2 + $0x278] sm:$0xff]  ;;  %v7284_v4 = vld [vmem:[%s11511_s2 + $0x1a0] sm:$0xff]  ;;  %v7282_v9 = vld [vmem:[%s11511_s2 + $0x190] sm:$0xff] }
  0x1a   : > { %7499 = vmatpush.bf16.msra.mxu2 %v7287_v0  ;;  %s336_s30 = scalar_select %p335_p12, %s7674_s25, 1  ;;  %2024 = vmatpush.bf16.msra.mxu3 %v7311_v3  ;;  %v7283_v5 = vld [vmem:[%s11511_s2 + $0x198] sm:$0xff]  ;;  %v7310_v14 = vld [vmem:[%s11511_s2 + $0x270] sm:$0xff]  ;;  %v7309_v18 = vld [vmem:[%s11511_s2 + $0x268] sm:$0xff]  ;;  %vm575_vm0 = vsmask.f32 7424 }
  0x1b   : > { %p356_p0 = scmp.lt.s32.totalorder %s7490_s29, 19  ;;  %v7281_v20 = vld [vmem:[%s11511_s2 + $0x188] sm:$0xff]  ;;  %v7308_v30 = vld [vmem:[%s11511_s2 + $0x260] sm:$0xff]  ;;  %v7295_v38 = vld [vmem:[%s11511_s2 + $0x1f8] sm:$0xff]  ;;  %s6831_s14 = sadd.s32 4294967295, %s7800_s18 }
  0x1c   : > { %s338_s13 = scalar_select %p337_p13, %s7800_s18, 19  ;;  %v7280_v34 = vld [vmem:[%s11511_s2 + $0x180] sm:$0xff]  ;;  %v7303_v39 = vld [vmem:[%s11511_s2 + $0x238] sm:$0xff]  ;;  %v7294_v45 = vld [vmem:[%s11511_s2 + $0x1f0] sm:$0xff] }
  0x1d   : > { %1773 = vmatpush.bf16.msra.mxu0 %v7286_v1  ;;  %7500 = vmatpush.bf16.msra.mxu1 %v7286_v1  ;;  %s7514_s17 = smul.u32 160, %s336_s30  ;;  %s12435_s29 = smov (!%p356_p0, %s7490_s29), 19  ;;  %v7307_v40 = vld [vmem:[%s11511_s2 + $0x258] sm:$0xff]  ;;  %v7302_v48 = vld [vmem:[%s11511_s2 + $0x230] sm:$0xff]  ;;  %v7293_v52 = vld [vmem:[%s11511_s2 + $0x1e8] sm:$0xff] }
  0x1e   : > { %7501 = vmatpush.bf16.msra.mxu2 %v7286_v1  ;;  %s6048_s8 = sshll.u32 %s338_s13, 3  ;;  %s6052_s7 = sshll.u32 %s12435_s29, 3  ;;  %2025 = vmatpush.bf16.msra.mxu3 %v7310_v14  ;;  %v7306_v50 = vld [vmem:[%s11511_s2 + $0x250] sm:$0xff]  ;;  %v7301_v54 = vld [vmem:[%s11511_s2 + $0x228] sm:$0xff]  ;;  %v7292_v62 = vld [vmem:[%s11511_s2 + $0x1e0] sm:$0xff] }
  0x1f   : > { %s360_s9 = sadd.s32 %s7514_s17, %s6052_s7  ;;  %s341_s12 = sadd.s32 %s7514_s17, %s6048_s8  ;;  %v7305_v55 = vld [vmem:[%s11511_s2 + $0x248] sm:$0xff]  ;;  %v7300_v0 = vld [vmem:[%s11511_s2 + $0x220] sm:$0xff] }
  0x20   : > { %s6053_s27 = sshll.u32 %s360_s9, 2  ;;  %s6049_s7 = sshll.u32 %s341_s12, 2  ;;  %v7304_v1 = vld [vmem:[%s11511_s2 + $0x240] sm:$0xff] }
  0x21   : > { %1774 = vmatpush.bf16.msra.mxu0 %v7285_v2  ;;  %7502 = vmatpush.bf16.msra.mxu1 %v7285_v2  ;;  %s7825_s15 = scalar_lea.vmem %s11510_s1, %s6053_s27  ;;  %s7849_s19 = scalar_lea.vmem %s11509_s0, %s6049_s7 }
  0x22   : > { %7503 = vmatpush.bf16.msra.mxu2 %v7285_v2  ;;  %v7828_v6 = vld [vmem:[%s7825_s15] sm:$0xff]  ;;  %v7832_v8 = vld [vmem:[%s7825_s15 + $0x8] sm:$0xff]  ;;  %v7881_v26 = vld [vmem:[%s7849_s19 + $0xf0] sm:$0xff]  ;;  %2026 = vmatpush.bf16.msra.mxu3 %v7309_v18  ;;  %s325_s18 = sand.u32 1, %s7662_s22   ;;  %s7448_s29 = sshll.u32 %s7670_s24, 4 }
  0x23   : > { %v11536_v7 = vunpack.c.h.b16 %v7828_v6  ;;  %v493_v10 = vunpack.c.l.b16 %v7828_v6  ;;  %v7839_v11 = vld [vmem:[%s7825_s15 + $0x40] sm:$0xff]  ;;  %v495_v12 = vunpack.c.l.b16 %v7832_v8  ;;  %v11535_v13 = vunpack.c.h.b16 %v7832_v8  ;;  %v7866_v19 = vld [vmem:[%s7825_s15 + $0x48] sm:$0xff]  ;;  %v405_v27 = vld [vmem:[%s7825_s15 + $0x30] sm:$0xff]  ;;  %s6046_s8 = sshll.u32 %s325_s18, 6  ;;  %s7219_s13 = sshll.u32 %s7674_s25, 5 }
  0x24   : > { %v11534_v15 = vunpack.c.h.b16 %v7839_v11  ;;  %v1156_v21 = vunpack.c.l.b16 %v7839_v11  ;;  %v1158_v22 = vunpack.c.l.b16 %v7866_v19  ;;  %v11533_v23 = vunpack.c.h.b16 %v7866_v19  ;;  %v7875_v24 = vld [vmem:[%s7849_s19 + $0x20] sm:$0xff]  ;;  %v7878_v25 = vld [vmem:[%s7849_s19 + $0x28] sm:$0xff]  ;;  %v373_v46 = vld [vmem:[%s7849_s19 + $0x30] sm:$0xff]  ;;  %s11413_s27 = scalar_lea.vmem [#allocation2], %s6046_s8  ;;  %s5915_s12 = scalar_lea.sflag [#allocation3], %s325_s18 }
  0x25   : > { %1775 = vmatpush.bf16.msra.mxu0 %v7284_v4  ;;  %7504 = vmatpush.bf16.msra.mxu1 %v7284_v4  ;;  %v7854_v16 = vpack.c.b16 %v495_v12, %v493_v10  ;;  %v7860_v17 = vpack.c.b16 %v11535_v13, %v11536_v7  ;;  %11797 = vst [vmem:[#allocation12_spill] sm:$0xff] %v7878_v25  ;;  %v11525_v31 = vunpack.c.l.b16 %v7875_v24  ;;  %v11520_v32 = vunpack.c.l.b16 %v7878_v25  ;;  %v7943_v49 = vld [vmem:[%s7849_s19 + $0x38] sm:$0x11]  ;;  %v7964_v59 = vld [vmem:[%s7849_s19 + $0x40] sm:$0xff]  ;;  %v7967_v60 = vld [vmem:[%s7825_s15 + $0x10] sm:$0xff]  ;;  %s5930_s20 = sshll.u32 %s11413_s27, 4  ;;  %s5931_s20 = int_to_ptr.vmem [resolvable:$true] %s5930_s20 }
  0x26   : > { %7505 = vmatpush.bf16.msra.mxu2 %v7284_v4  ;;  %v7886_v28 = vpack.c.b16 %v1158_v22, %v1156_v21  ;;  %v7892_v29 = vpack.c.b16 %v11533_v23, %v11534_v15  ;;  %v7900_v33 = vunpack.c.l.b16 %v7881_v26  ;;  %v7905_v35 = vunpack.c.l.b16 %v405_v27  ;;  %2027 = vmatpush.bf16.msra.mxu3 %v7308_v30  ;;  %v7974_v63 = vld [vmem:[%s7825_s15 + $0x50] sm:$0xff]  ;;  %v7990_v14 = vld [vmem:[%s7849_s19 + $0x48] sm:$0xff]  ;;  %s7612_s26 = scalar_lea.hbm %s11515_s6, 256 }
  0x27   : > { %11795 = vst [vmem:[#allocation10_spill] sm:$0xff] %v7854_v16  ;;  %v11526_v36 = vunpack.c.h.b16 %v7875_v24  ;;  %v11524_v37 = vunpack.c.h.b16 %v7878_v25  ;;  %v7922_v41 = vpack.c.b16 %v11520_v32, %v11525_v31  ;;  %v7936_v47 = vunpack.c.h.b16 %v373_v46  ;;  %v377_v18 = vld [vmem:[%s7849_s19 + $0x50] sm:$0xff] }
  0x28   : > { %11796 = vst [vmem:[#allocation11_spill] sm:$0xff] %v7860_v17  ;;  %v1366_v42 = vpack.c.b16 %v493_v10, %v7900_v33  ;;  %v1382_v43 = vpack.c.b16 %v1156_v21, %v7905_v35  ;;  %v518_v51 = vunpack.c.h.b16 %v7943_v49  ;;  %v7982_v4 = vunpack.c.l.b16 %v373_v46  ;;  %v381_v31 = vld [vmem:[%s7849_s19 + $0x70] sm:$0xff] }
  0x29   : > { %1776 = vmatpush.bf16.msra.mxu0 %v7283_v5  ;;  %7506 = vmatpush.bf16.msra.mxu1 %v7283_v5  ;;  %11798 = vst [vmem:[#allocation13_spill] sm:$0xff] %v7886_v28  ;;  %v7930_v44 = vpack.c.b16 %v11524_v37, %v11526_v36  ;;  %v7987_v10 = vunpack.c.l.b16 %v7967_v60  ;;  %v7995_v21 = vunpack.c.l.b16 %v7974_v63  ;;  %v11537_v27 = vunpack.c.h.b16 %v7990_v14 }
  0x2a   : > { %7507 = vmatpush.bf16.msra.mxu2 %v7283_v5  ;;  %11799 = vst [vmem:[#allocation14_spill] sm:$0xff] %v7892_v29  ;;  %2028 = vmatpush.bf16.msra.mxu3 %v7307_v40  ;;  %v7960_v56 = vpack.c.b16 %v518_v51, %v7936_v47  ;;  %v457_v5 = vunpack.c.l.b16 %v7964_v59  ;;  %v7998_v30 = vunpack.c.h.b16 %v377_v18  ;;  %v8141_v36 = vunpack.c.h.b16 %v381_v31 }
  0x2b   : > { %11800 = vst [vmem:[#allocation15_spill] sm:$0xff] %v7900_v33  ;;  %v621_v53 = vshll.u32 %v7930_v44, 16  ;;  %v619_v57 = vshrl.u32 %v7930_v44, 16  ;;  %v8158_v13 = vunpack.c.l.b16 %v381_v31 }
  0x2c   : > { %11801 = vst [vmem:[#allocation16_spill] sm:$0xff] %v7905_v35  ;;  %v626_v61 = vshll.u32 %v7960_v56, 16  ;;  %v633_v51 = vshrl.u32 %v7960_v56, 16 }
  0x2d   : > { %1777 = vmatpush.bf16.msra.mxu0 %v7282_v9  ;;  %7508 = vmatpush.bf16.msra.mxu1 %v7282_v9  ;;  %11802 = vst [vmem:[#allocation17_spill] sm:$0xff] %v7930_v44  ;;  %v623_v58 = vrot.slane %v621_v53, 1 }
  0x2e   : > { %7509 = vmatpush.bf16.msra.mxu2 %v7282_v9  ;;  %11803 = vst [vmem:[#allocation18_spill] sm:$0xff] %v7936_v47  ;;  %2029 = vmatpush.bf16.msra.mxu3 %v7306_v50  ;;  %v628_v3 = vrot.slane %v626_v61, 1  ;;  %v11538_v9 = vunpack.c.h.b16 %v7964_v59  ;;  %v517_v50 = vunpack.c.l.b16 %v7943_v49  ;;  %v7297_v61 = vld [vmem:[%s11511_s2 + $0x208] sm:$0xff] }
  0x2f   : > { %11804 = vst [vmem:[#allocation19_spill] sm:$0xff] %v7960_v56  ;;  %v624_v2 = vor.u32 %v623_v58, %v619_v57  ;;  %v609_v57 = vshll.u32 %v7922_v41, 16  ;;  %v459_v58 = vunpack.c.l.b16 %v7990_v14 }
  0x30   : > { %11805 = vst [vmem:[#allocation20_spill] sm:$0xff] %v7982_v4  ;;  %v8020_v46 = vpack.c.b16 %v11537_v27, %v11538_v9  ;;  %v8164_v9 = vld [vmem:[%s7849_s19 + $0x88] sm:$0xff] }
  0x31   : > { %1778 = vmatpush.bf16.msra.mxu0 %v7281_v20  ;;  %7510 = vmatpush.bf16.msra.mxu1 %v7281_v20  ;;  %11806 = vst [vmem:[#allocation21_spill] sm:$0xff] %v7987_v10  ;;  %v8007_v40 = vsel %vm575_vm0, %v624_v2, %v628_v3 }
  0x32   : > { %7511 = vmatpush.bf16.msra.mxu2 %v7281_v20  ;;  %2030 = vmatpush.bf16.msra.mxu3 %v7305_v55  ;;  %v378_v20 = vld [vmem:[%s7849_s19 + $0x58] sm:$0x11]  ;;  %11807 = vst [vmem:[#allocation22_spill] sm:$0xff] %v7995_v21  ;;  %v649_v49 = vshrl.u32 %v8020_v46, 16  ;;  %v7289_v55 = vld [vmem:[%s11511_s2 + $0x1c8] sm:$0xff] }
  0x33   : > { %11808 = vst [vmem:[#allocation23_spill] sm:$0xff] %v7998_v30  ;;  %v519_v2 = vunpack.c.l.b16 %v378_v20 }
  0x34   : > { %11809 = vst [vmem:[#allocation24_spill] sm:$0xff] %v8007_v40 }
  0x35   : > { %1779 = vmatpush.bf16.msra.mxu0 %v7280_v34  ;;  %7512 = vmatpush.bf16.msra.mxu1 %v7280_v34  ;;  %11810 = vst [vmem:[#allocation25_spill] sm:$0xff] %v8020_v46 }
  0x36   : > { %7513 = vmatpush.bf16.msra.mxu2 %v7280_v34  ;;  %v520_v34 = vunpack.c.h.b16 %v378_v20  ;;  %2031 = vmatpush.bf16.msra.mxu3 %v7304_v1  ;;  %v8064_v20 = vunpack.c.l.b16 %v377_v18  ;;  %11825 = vst [vmem:[#allocation40_spill] sm:$0xff] %v8141_v36 }
  0x37   : > { %11828 = vst [vmem:[#allocation43_spill] sm:$0xff] %v8158_v13 }
  0x38   : > { %1780 = vmatmul.bf16.vlgmr.msra.gmra.mxu0 %v7922_v41  ;;  %1830 = vmatmul.bf16.vlgmr.msra.gmra.mxu1 %v1366_v42  ;;  %v1318_v42 = vpack.c.b16 %v457_v5, %v7982_v4  ;;  %11816 = vst [vmem:[#allocation31_spill] sm:$0xff] %v8064_v20  ;;  %v8079_v18 = vpack.c.b16 %v519_v2, %v8064_v20 }
  0x39   : > { %1856 = vmatpush.bf16.msrb.mxu1 %v7295_v38  ;;  %1845 = vmatmul.bf16.vlgmr.msra.gmra.mxu2 %v1382_v43  ;;  %v7291_v38 = vld [vmem:[%s11511_s2 + $0x1d8] sm:$0xff]  ;;  %v1372_v43 = vpack.c.b16 %v7987_v10, %v495_v12  ;;  %v7290_v12 = vld [vmem:[%s11511_s2 + $0x1d0] sm:$0xff] }
  0x3a   : > { %1940 = vmatpush.bf16.msrb.mxu2 %v7303_v39  ;;  %v7299_v39 = vld [vmem:[%s11511_s2 + $0x218] sm:$0xff]  ;;  %2032 = vmatmul.bf16.vlgmr.msra.gmra.mxu3 %v8007_v40 }
  0x3d   : > { %1857 = vmatpush.bf16.msrb.mxu1 %v7294_v45  ;;  %v1388_v45 = vpack.c.b16 %v7995_v21, %v1158_v22  ;;  %v7298_v22 = vld [vmem:[%s11511_s2 + $0x210] sm:$0xff] }
  0x3e   : > { %1941 = vmatpush.bf16.msrb.mxu2 %v7302_v48  ;;  %v8023_v48 = vpack.c.b16 %v520_v34, %v7998_v30  ;;  %v8050_v34 = vpack.c.b16 %v459_v58, %v457_v5  ;;  %v7296_v5 = vld [vmem:[%s11511_s2 + $0x200] sm:$0xff] }
  0x40   : > { %11811 = vst [vmem:[#allocation26_spill] sm:$0xff] %v8023_v48  ;;  %v656_v53 = vshll.u32 %v8023_v48, 16 }
  0x41   : > { %1858 = vmatpush.bf16.msrb.mxu1 %v7293_v52  ;;  %v651_v52 = vshll.u32 %v8020_v46, 16  ;;  %11813 = vst [vmem:[#allocation28_spill] sm:$0xff] %v8050_v34 }
  0x42   : > { %1942 = vmatpush.bf16.msrb.mxu2 %v7301_v54  ;;  %v8038_v54 = vpack.c.b16 %v517_v50, %v7982_v4  ;;  %v658_v1 = vrot.slane %v656_v53, 1  ;;  %v611_v50 = vrot.slane %v609_v57, 1 }
  0x45   : > { %1859 = vmatpush.bf16.msrb.mxu1 %v7292_v62  ;;  %v8048_v62 = vor.u32 %v633_v51, %v628_v3  ;;  %v614_v3 = vshll.u32 %v8038_v54, 16 }
  0x46   : > { %1943 = vmatpush.bf16.msrb.mxu2 %v7300_v0  ;;  %v653_v0 = vrot.slane %v651_v52, 1 }
  0x47   : > { %11812 = vst [vmem:[#allocation27_spill] sm:$0xff] %v8048_v62  ;;  %v616_v57 = vrot.slane %v614_v3, 1  ;;  %v663_v3 = vshrl.u32 %v8023_v48, 16 }
  0x48   : > { %1785 = vmatmul.bf16.gmra.mxu0 %v1318_v42  ;;  %1835 = vmatmul.bf16.gmra.mxu1 %v1372_v43  ;;  %v654_v42 = vor.u32 %v653_v0, %v649_v49  ;;  %v7288_v43 = vld [vmem:[%s11511_s2 + $0x1c0] sm:$0xff] }
  0x49   : > { %1860 = vmatpush.bf16.msrb.mxu1 %v7291_v38  ;;  %1850 = vmatmul.bf16.gmra.mxu2 %v1388_v45  ;;  %v8053_v38 = vld [vmem:[%s7825_s15 + $0x20] sm:$0xff]  ;;  %v607_v45 = vshrl.u32 %v7922_v41, 16 }
  0x4a   : > { %1944 = vmatpush.bf16.msrb.mxu2 %v7299_v39  ;;  %11814 = vst [vmem:[#allocation29_spill] sm:$0xff] %v8053_v38  ;;  %v8056_v39 = vld [vmem:[%s7825_s15 + $0x28] sm:$0xff]  ;;  %v8073_v51 = vsel %vm575_vm0, %v654_v42, %v658_v1  ;;  %v11523_v49 = vunpack.c.l.b16 %v8053_v38  ;;  %v1324_v42 = vpack.c.b16 %v8064_v20, %v459_v58  ;;  %v630_v58 = vshrl.u32 %v8038_v54, 16 }
  0x4b   : > { %11815 = vst [vmem:[#allocation30_spill] sm:$0xff] %v8056_v39  ;;  %v11522_v52 = vunpack.c.l.b16 %v8056_v39  ;;  %v962_v53 = vunpack.c.l.b16 %v8073_v51 }
  0x4c   : > { %11817 = vst [vmem:[#allocation32_spill] sm:$0xff] %v8073_v51 }
  0x4d   : > { %1861 = vmatpush.bf16.msrb.mxu1 %v7290_v12  ;;  %v11521_v12 = vunpack.c.l.b16 %v8048_v62  ;;  %v8089_v32 = vpack.c.b16 %v11522_v52, %v11523_v49  ;;  %v966_v52 = vunpack.c.h.b16 %v8073_v51 }
  0x4e   : > { %1945 = vmatpush.bf16.msrb.mxu2 %v7298_v22  ;;  %v7327_v22 = vld [vmem:[%s11511_s2 + $0x2f8] sm:$0xff] }
  0x4f   : > { %v1321_v0 = vpack.c.b16 %v962_v53, %v11521_v12 }
  0x51   : > { %1862 = vmatpush.bf16.msrb.mxu1 %v7289_v55  ;;  %v612_v55 = vor.u32 %v611_v50, %v607_v45  ;;  %v644_v50 = vshll.u32 %v8079_v18, 16  ;;  %2037 = vmatmul.bf16.gmra.mxu3 %v1321_v0  ;;  %v8109_v0 = vld [vmem:[%s7849_s19 + $0x68] sm:$0xff] }
  0x52   : > { %1946 = vmatpush.bf16.msrb.mxu2 %v7297_v61  ;;  %v639_v61 = vshll.u32 %v8050_v34, 16  ;;  %11821 = vst [vmem:[#allocation36_spill] sm:$0xff] %v8109_v0 }
  0x53   : > { %v8092_v2 = vsel %vm575_vm0, %v612_v55, %v616_v57  ;;  %v646_v53 = vrot.slane %v644_v50, 1  ;;  %v8103_v55 = vor.u32 %v663_v3, %v658_v1  ;;  %v11528_v1 = vunpack.c.l.b16 %v8109_v0 }
  0x54   : > { %11818 = vst [vmem:[#allocation33_spill] sm:$0xff] %v8092_v2  ;;  %v641_v45 = vrot.slane %v639_v61, 1  ;;  %v8106_v61 = vld [vmem:[%s7849_s19 + $0x60] sm:$0xff]  ;;  %v11529_v50 = vunpack.c.h.b16 %v8109_v0 }
  0x55   : > { %1863 = vmatpush.bf16.msrb.mxu1 %v7288_v43  ;;  %v637_v43 = vshrl.u32 %v8050_v34, 16  ;;  %11819 = vst [vmem:[#allocation34_spill] sm:$0xff] %v8103_v55  ;;  %v11527_v49 = vunpack.c.l.b16 %v8103_v55  ;;  %v385_v55 = vld [vmem:[%s7849_s19 + $0x90] sm:$0xff] }
  0x56   : > { %1947 = vmatpush.bf16.msrb.mxu2 %v7296_v5  ;;  %v7326_v5 = vld [vmem:[%s11511_s2 + $0x2f0] sm:$0xff]  ;;  %11820 = vst [vmem:[#allocation35_spill] sm:$0xff] %v8106_v61 }
  0x58   : > { %1790 = vmatmul.bf16.gmra.mxu0 %v1324_v42  ;;  %1840 = vmatmul.bf16.gmra.mxu1 %v8089_v32  ;;  %v8111_v42 = vor.u32 %v630_v58, %v616_v57  ;;  %v1327_v58 = vpack.c.b16 %v11527_v49, %v966_v52  ;;  %v382_v52 = vld [vmem:[%s7849_s19 + $0x78] sm:$0x11]  ;;  %v660_v49 = vshrl.u32 %v8079_v18, 16 }
  0x59   : > { %2192 = vmatpush.bf16.msra.mxu1 %v7327_v22  ;;  %1948 = vmatmul.bf16.vlgmr.msrb.gmra.mxu2 %v8092_v2  ;;  %v642_v22 = vor.u32 %v641_v45, %v637_v43  ;;  %v11531_v43 = vunpack.c.l.b16 %v8106_v61  ;;  %v11532_v45 = vunpack.c.h.b16 %v8106_v61 }
  0x5a   : > { %11822 = vst [vmem:[#allocation37_spill] sm:$0xff] %v8111_v42  ;;  %v11530_v3 = vunpack.c.l.b16 %v8111_v42 }
  0x5b   : > { %v8114_v12 = vsel %vm575_vm0, %v642_v22, %v646_v53  ;;  %v8136_v22 = vpack.c.b16 %v11529_v50, %v11532_v45  ;;  %v8155_v45 = vor.u32 %v660_v49, %v646_v53  ;;  %v11549_v49 = vunpack.c.h.b16 %v8164_v9 }
  0x5c   : > { %11823 = vst [vmem:[#allocation38_spill] sm:$0xff] %v8114_v12  ;;  %v961_v57 = vunpack.c.l.b16 %v8114_v12  ;;  %v8170_v53 = vunpack.c.h.b16 %v385_v55 }
  0x5d   : > { %2193 = vmatpush.bf16.msra.mxu1 %v7326_v5  ;;  %v8130_v5 = vpack.c.b16 %v11528_v1, %v11531_v43  ;;  %11824 = vst [vmem:[#allocation39_spill] sm:$0xff] %v8136_v22  ;;  %v522_v1 = vunpack.c.h.b16 %v382_v52  ;;  %v681_v50 = vshll.u32 %v8136_v22, 16  ;;  %v8153_v43 = vld [vmem:[%s7849_s19 + $0x80] sm:$0xff]  ;;  %v11548_v51 = vunpack.c.l.b16 %v8155_v45 }
  0x5e   : > { %v1320_v37 = vpack.c.b16 %v961_v57, %v11530_v3  ;;  %11827 = vst [vmem:[#allocation42_spill] sm:$0xff] %v8155_v45  ;;  %v469_v7 = vunpack.c.l.b16 %v8153_v43  ;;  %v11832_v40 = vunpack.c.h.b16 %v8153_v43 }
  0x5f   : > { %v8149_v57 = vpack.c.b16 %v522_v1, %v8141_v36  ;;  %v683_v3 = vrot.slane %v681_v50, 1  ;;  %v965_v1 = vunpack.c.h.b16 %v8114_v12  ;;  %v386_v50 = vld [vmem:[%s7849_s19 + $0x98] sm:$0x11]  ;;  %11829 = vst [vmem:[#allocation44_spill] sm:$0xff] %v8170_v53 }
  0x60   : > { %v8185_v12 = vpack.c.b16 %v11549_v49, %v11832_v40 }
  0x61   : > { %2042 = vmatmul.bf16.gmra.mxu3 %v1327_v58  ;;  %11826 = vst [vmem:[#allocation41_spill] sm:$0xff] %v8149_v57  ;;  %v679_v58 = vshrl.u32 %v8136_v22, 16  ;;  %v1326_v62 = vpack.c.b16 %v11548_v51, %v965_v1  ;;  %v693_v1 = vshrl.u32 %v8149_v57, 16 }
  0x62   : > { %11833 = vst [vmem:[#allocation46_spill] sm:$0xff] %v8185_v12  ;;  %v711_v40 = vshll.u32 %v8185_v12, 16 }
  0x63   : > { %v684_v23 = vor.u32 %v683_v3, %v679_v58  ;;  %v524_v3 = vunpack.c.h.b16 %v386_v50  ;;  %v1334_v58 = vpack.c.b16 %v469_v7, %v8158_v13 }
  0x65   : > { %v8188_v42 = vpack.c.b16 %v524_v3, %v8170_v53 }
  0x67   : > { %11834 = vst [vmem:[#allocation47_spill] sm:$0xff] %v8188_v42  ;;  %v716_v51 = vshll.u32 %v8188_v42, 16 }
  0x68   : > { %1795 = vmatmul.bf16.gmra.mxu0 %v8130_v5  ;;  %1864 = vmatmul.bf16.vlgmr.msrb.gmra.mxu1 %v7930_v44 }
  0x69   : > { %1953 = vmatmul.bf16.gmra.mxu2 %v1320_v37  ;;  %v686_v37 = vshll.u32 %v8149_v57, 16  ;;  %v718_v49 = vrot.slane %v716_v51, 1 }
  0x6b   : > { %v688_v15 = vrot.slane %v686_v37, 1  ;;  %v11831_v37 = vunpack.c.h.b16 %v7964_v59  ;;  %v7325_v59 = vld [vmem:[%s11511_s2 + $0x2e8] sm:$0xff] }
  0x6c   : > { %2194 = vmatpush.bf16.msra.mxu1 %v7325_v59 }
  0x6d   : > { %v8173_v31 = vsel %vm575_vm0, %v684_v23, %v688_v15  ;;  %v1319_v27 = vpack.c.b16 %v11831_v37, %v7936_v47  ;;  %v521_v23 = vunpack.c.l.b16 %v382_v52  ;;  %v709_v37 = vshrl.u32 %v8185_v12, 16 }
  0x6e   : > { %11830 = vst [vmem:[#allocation45_spill] sm:$0xff] %v8173_v31  ;;  %v669_v52 = vshll.u32 %v8130_v5, 16  ;;  %v667_v12 = vshrl.u32 %v8130_v5, 16 }
  0x6f   : > { %v8199_v3 = vpack.c.b16 %v521_v23, %v8158_v13  ;;  %v8210_v13 = vunpack.c.l.b16 %v385_v55 }
  0x70   : > { %v671_v0 = vrot.slane %v669_v52, 1 }
  0x71   : > { %2047 = vmatmul.bf16.gmra.mxu3 %v8173_v31  ;;  %v523_v31 = vunpack.c.l.b16 %v386_v50  ;;  %v674_v20 = vshll.u32 %v8199_v3, 16  ;;  %11837 = vst [vmem:[#allocation50_spill] sm:$0xff] %v8210_v13 }
  0x73   : > { %v8217_v51 = vpack.c.b16 %v523_v31, %v8210_v13  ;;  %v676_v50 = vrot.slane %v674_v20, 1 }
  0x75   : > { %v704_v20 = vshll.u32 %v8217_v51, 16 }
  0x78   : > { %1800 = vmatmul.bf16.gmra.mxu0 %v1334_v58  ;;  %1869 = vmatmul.bf16.gmra.mxu1 %v1319_v27  ;;  %v471_v27 = vunpack.c.l.b16 %v8164_v9  ;;  %v713_v58 = vrot.slane %v711_v40, 1 }
  0x79   : > { %1958 = vmatmul.bf16.gmra.mxu2 %v1326_v62  ;;  %v8203_v62 = vor.u32 %v693_v1, %v688_v15 }
  0x7a   : > { %v8205_v45 = vpack.c.b16 %v471_v27, %v469_v7  ;;  %v714_v2 = vor.u32 %v713_v58, %v709_v37  ;;  %v672_v7 = vor.u32 %v671_v0, %v667_v12  ;;  %v1340_v55 = vpack.c.b16 %v8210_v13, %v471_v27  ;;  %v8237_v58 = vld [vmem:[%s7849_s19 + $0xa8] sm:$0xff] }
  0x7b   : > { %11835 = vst [vmem:[#allocation48_spill] sm:$0xff] %v8203_v62  ;;  %v11562_v23 = vunpack.c.l.b16 %v8203_v62  ;;  %v11839_v37 = vunpack.c.h.b16 %v7990_v14  ;;  %v690_v0 = vshrl.u32 %v8199_v3, 16  ;;  %v706_v27 = vrot.slane %v704_v20, 1  ;;  %v8234_v14 = vld [vmem:[%s7849_s19 + $0xa0] sm:$0xff] }
  0x7c   : > { %11836 = vst [vmem:[#allocation49_spill] sm:$0xff] %v8205_v45  ;;  %v8213_v57 = vsel %vm575_vm0, %v714_v2, %v718_v49  ;;  %v699_v59 = vshll.u32 %v8205_v45, 16  ;;  %v8227_v40 = vsel %vm575_vm0, %v672_v7, %v676_v50  ;;  %v697_v31 = vshrl.u32 %v8205_v45, 16 }
  0x7d   : > { %11838 = vst [vmem:[#allocation51_spill] sm:$0xff] %v8213_v57  ;;  %v986_v15 = vunpack.c.l.b16 %v8213_v57  ;;  %v1325_v2 = vpack.c.b16 %v7998_v30, %v11839_v37  ;;  %v393_v30 = vld [vmem:[%s7849_s19 + $0xd0] sm:$0xff] }
  0x7e   : > { %11840 = vst [vmem:[#allocation52_spill] sm:$0xff] %v8227_v40  ;;  %v701_v12 = vrot.slane %v699_v59, 1  ;;  %v723_v59 = vshrl.u32 %v8188_v42, 16  ;;  %v8325_v4 = vunpack.c.h.b16 %v393_v30 }
  0x7f   : > { %v1337_v1 = vpack.c.b16 %v986_v15, %v11562_v23  ;;  %11841 = vst [vmem:[#allocation53_spill] sm:$0xff] %v8234_v14  ;;  %v8239_v15 = vor.u32 %v690_v0, %v676_v50  ;;  %v11567_v23 = vunpack.c.h.b16 %v8237_v58 }
  0x80   : > { %v702_v52 = vor.u32 %v701_v12, %v697_v31  ;;  %11842 = vst [vmem:[#allocation54_spill] sm:$0xff] %v8237_v58  ;;  %v8247_v37 = vor.u32 %v723_v59, %v718_v49  ;;  %v990_v12 = vunpack.c.h.b16 %v8213_v57  ;;  %v11568_v59 = vunpack.c.h.b16 %v8234_v14 }
  0x81   : > { %2052 = vmatmul.bf16.gmra.mxu3 %v1337_v1  ;;  %11843 = vst [vmem:[#allocation55_spill] sm:$0xff] %v8239_v15  ;;  %v11566_v1 = vunpack.c.l.b16 %v8234_v14 }
  0x82   : > { %v8242_v7 = vsel %vm575_vm0, %v702_v52, %v706_v27  ;;  %11845 = vst [vmem:[#allocation57_spill] sm:$0xff] %v8247_v37  ;;  %v11563_v50 = vunpack.c.l.b16 %v8247_v37  ;;  %v7319_v52 = vld [vmem:[%s11511_s2 + $0x2b8] sm:$0xff] }
  0x83   : > { %11844 = vst [vmem:[#allocation56_spill] sm:$0xff] %v8242_v7  ;;  %v985_v31 = vunpack.c.l.b16 %v8242_v7  ;;  %2108 = vmatpush.bf16.msrb.mxu0 %v7319_v52  ;;  %v7318_v52 = vld [vmem:[%s11511_s2 + $0x2b0] sm:$0xff] }
  0x84   : > { %v1343_v49 = vpack.c.b16 %v11563_v50, %v990_v12  ;;  %v720_v12 = vshrl.u32 %v8217_v51, 16  ;;  %v389_v50 = vld [vmem:[%s7849_s19 + $0xb0] sm:$0xff] }
  0x85   : > { %v8299_v62 = vunpack.c.l.b16 %v389_v50 }
  0x87   : > { %2109 = vmatpush.bf16.msrb.mxu0 %v7318_v52  ;;  %11850 = vst [vmem:[#allocation62_spill] sm:$0xff] %v8299_v62 }
  0x88   : > { %1805 = vmatmul.bf16.gmra.mxu0 %v1340_v55  ;;  %1874 = vmatmul.bf16.gmra.mxu1 %v1325_v2  ;;  %v11565_v55 = vunpack.c.l.b16 %v8237_v58  ;;  %v11564_v2 = vunpack.c.l.b16 %v8239_v15  ;;  %v394_v58 = vld [vmem:[%s7849_s19 + $0xd8] sm:$0x11] }
  0x89   : > { %1963 = vmatmul.bf16.gmra.mxu2 %v8227_v40 }
  0x8a   : > { %v8257_v20 = vpack.c.b16 %v11565_v55, %v11566_v1  ;;  %v1336_v0 = vpack.c.b16 %v985_v31, %v11564_v2  ;;  %v8276_v31 = vpack.c.b16 %v11567_v23, %v11568_v59  ;;  %v390_v2 = vld [vmem:[%s7849_s19 + $0xb8] sm:$0x11]  ;;  %v8285_v55 = vld [vmem:[%s7849_s19 + $0xc0] sm:$0xff]  ;;  %v8287_v1 = vor.u32 %v720_v12, %v706_v27 }
  0x8b   : > { %v7324_v23 = vld [vmem:[%s11511_s2 + $0x2e0] sm:$0xff]  ;;  %v526_v59 = vunpack.c.h.b16 %v390_v2  ;;  %v481_v27 = vunpack.c.l.b16 %v8285_v55  ;;  %v989_v12 = vunpack.c.h.b16 %v8242_v7  ;;  %v525_v42 = vunpack.c.l.b16 %v390_v2 }
  0x8c   : > { %11846 = vst [vmem:[#allocation58_spill] sm:$0xff] %v8276_v31  ;;  %2195 = vmatpush.bf16.msra.mxu1 %v7324_v23  ;;  %v741_v57 = vshll.u32 %v8276_v31, 16  ;;  %v739_v15 = vshrl.u32 %v8276_v31, 16  ;;  %v7316_v7 = vld [vmem:[%s11511_s2 + $0x2a0] sm:$0xff]  ;;  %v729_v2 = vshll.u32 %v8257_v20, 16 }
  0x8d   : > { %11848 = vst [vmem:[#allocation60_spill] sm:$0xff] %v8287_v1  ;;  %v1350_v52 = vpack.c.b16 %v481_v27, %v8299_v62 }
  0x8e   : > { %v743_v40 = vrot.slane %v741_v57, 1 }
  0x90   : > { %v744_v13 = vor.u32 %v743_v40, %v739_v15  ;;  %v528_v40 = vunpack.c.h.b16 %v394_v58  ;;  %v11854_v15 = vunpack.c.h.b16 %v8285_v55 }
  0x91   : > { %2057 = vmatmul.bf16.gmra.mxu3 %v1343_v49  ;;  %v8278_v49 = vunpack.c.h.b16 %v389_v50 }
  0x93   : > { %11847 = vst [vmem:[#allocation59_spill] sm:$0xff] %v8278_v49  ;;  %v8296_v37 = vpack.c.b16 %v526_v59, %v8278_v49  ;;  %v8307_v59 = vld [vmem:[%s7849_s19 + $0xc8] sm:$0xff] }
  0x95   : > { %11849 = vst [vmem:[#allocation61_spill] sm:$0xff] %v8296_v37  ;;  %v746_v23 = vshll.u32 %v8296_v37, 16 }
  0x97   : > { %v748_v14 = vrot.slane %v746_v23, 1 }
  0x98   : > { %1810 = vmatmul.bf16.gmra.mxu0 %v8257_v20  ;;  %1879 = vmatmul.bf16.gmra.mxu1 %v8136_v22  ;;  %v11852_v22 = vunpack.c.l.b16 %v8287_v1  ;;  %v753_v1 = vshrl.u32 %v8296_v37, 16 }
  0x99   : > { %1968 = vmatmul.bf16.gmra.mxu2 %v1336_v0  ;;  %v7317_v0 = vld [vmem:[%s11511_s2 + $0x2a8] sm:$0xff]  ;;  %v8323_v50 = vsel %vm575_vm0, %v744_v13, %v748_v14  ;;  %v8338_v13 = vpack.c.b16 %v525_v42, %v8299_v62 }
  0x9a   : > { %2110 = vmatpush.bf16.msrb.mxu0 %v7317_v0  ;;  %v11851_v0 = vunpack.c.h.b16 %v8153_v43  ;;  %v1342_v61 = vpack.c.b16 %v11852_v22, %v989_v12  ;;  %11853 = vst [vmem:[#allocation63_spill] sm:$0xff] %v8323_v50  ;;  %v11855_v43 = vunpack.c.h.b16 %v8307_v59  ;;  %v7315_v22 = vld [vmem:[%s11511_s2 + $0x298] sm:$0xff]  ;;  %v483_v12 = vunpack.c.l.b16 %v8307_v59 }
  0x9b   : > { %v734_v42 = vshll.u32 %v8338_v13, 16 }
  0x9c   : > { %v1335_v57 = vpack.c.b16 %v11851_v0, %v8141_v36  ;;  %v8332_v23 = vpack.c.b16 %v11855_v43, %v11854_v15  ;;  %v7314_v0 = vld [vmem:[%s11511_s2 + $0x290] sm:$0xff]  ;;  %v8361_v36 = vor.u32 %v753_v1, %v748_v14  ;;  %v11862_v1 = vunpack.c.h.b16 %v8164_v9 }
  0x9d   : > { %v736_v46 = vrot.slane %v734_v42, 1 }
  0x9e   : > { %2111 = vmatpush.bf16.msrb.mxu0 %v7316_v7  ;;  %11856 = vst [vmem:[#allocation64_spill] sm:$0xff] %v8332_v23  ;;  %v8341_v7 = vpack.c.b16 %v528_v40, %v8325_v4  ;;  %v771_v15 = vshll.u32 %v8332_v23, 16  ;;  %v769_v40 = vshrl.u32 %v8332_v23, 16  ;;  %v11600_v37 = vunpack.c.l.b16 %v8361_v36 }
  0x9f   : > { %11860 = vst [vmem:[#allocation68_spill] sm:$0xff] %v8361_v36 }
  0xa0   : > { %11857 = vst [vmem:[#allocation65_spill] sm:$0xff] %v8341_v7  ;;  %v773_v43 = vrot.slane %v771_v15, 1  ;;  %v776_v62 = vshll.u32 %v8341_v7, 16 }
  0xa1   : > { %2062 = vmatmul.bf16.gmra.mxu3 %v8323_v50  ;;  %v731_v50 = vrot.slane %v729_v2, 1 }
  0xa2   : > { %2112 = vmatpush.bf16.msrb.mxu0 %v7315_v22  ;;  %v727_v22 = vshrl.u32 %v8257_v20, 16 }
  0xa4   : > { %v732_v23 = vor.u32 %v731_v50, %v727_v22  ;;  %v750_v22 = vshrl.u32 %v8338_v13, 16 }
  0xa6   : > { %2113 = vmatpush.bf16.msrb.mxu0 %v7314_v0  ;;  %v778_v0 = vrot.slane %v776_v62, 1  ;;  %v8404_v36 = vor.u32 %v750_v22, %v736_v46 }
  0xa8   : > { %1815 = vmatmul.bf16.gmra.mxu0 %v1350_v52  ;;  %1884 = vmatmul.bf16.gmra.mxu1 %v1335_v57  ;;  %v527_v52 = vunpack.c.l.b16 %v394_v58  ;;  %v8349_v57 = vpack.c.b16 %v483_v12, %v481_v27  ;;  %v8359_v58 = vunpack.c.l.b16 %v393_v30  ;;  %v774_v27 = vor.u32 %v773_v43, %v769_v40  ;;  %v7312_v30 = vld [vmem:[%s11511_s2 + $0x280] sm:$0xff]  ;;  %11869 = vst [vmem:[#allocation76_spill] sm:$0xff] %v8404_v36 }
  0xa9   : > { %1973 = vmatmul.bf16.gmra.mxu2 %v1342_v61  ;;  %v7313_v61 = vld [vmem:[%s11511_s2 + $0x288] sm:$0xff]  ;;  %v8386_v40 = vsel %vm575_vm0, %v732_v23, %v736_v46 }
  0xaa   : > { %11858 = vst [vmem:[#allocation66_spill] sm:$0xff] %v8349_v57  ;;  %v8364_v48 = vpack.c.b16 %v527_v52, %v8359_v58  ;;  %2114 = vmatpush.bf16.msrb.mxu0 %v7313_v61  ;;  %v759_v15 = vshll.u32 %v8349_v57, 16  ;;  %v8368_v2 = vsel %vm575_vm0, %v774_v27, %v778_v0  ;;  %v1356_v62 = vpack.c.b16 %v8359_v58, %v483_v12 }
  0xab   : > { %11859 = vst [vmem:[#allocation67_spill] sm:$0xff] %v8359_v58  ;;  %v1010_v14 = vunpack.c.l.b16 %v8368_v2  ;;  %v1341_v52 = vpack.c.b16 %v8170_v53, %v11862_v1  ;;  %v757_v43 = vshrl.u32 %v8349_v57, 16  ;;  %v1014_v22 = vunpack.c.h.b16 %v8368_v2 }
  0xac   : > { %11861 = vst [vmem:[#allocation69_spill] sm:$0xff] %v8368_v2  ;;  %v761_v12 = vrot.slane %v759_v15, 1  ;;  %v764_v9 = vshll.u32 %v8364_v48, 16  ;;  %v8402_v15 = vld [vmem:[%s7849_s19 + $0xe8] sm:$0xff]  ;;  %v11875_v2 = vunpack.c.l.b16 %v8404_v36 }
  0xad   : > { %v1353_v61 = vpack.c.b16 %v1010_v14, %v11600_v37  ;;  %11864 = vst [vmem:[#allocation71_spill] sm:$0xff] %v8386_v40  ;;  %v8399_v37 = vld [vmem:[%s7849_s19 + $0xe0] sm:$0xff]  ;;  %v11616_v53 = vunpack.c.h.b16 %v8402_v15 }
  0xae   : > { %2115 = vmatpush.bf16.msrb.mxu0 %v7312_v30  ;;  %v762_v27 = vor.u32 %v761_v12, %v757_v43  ;;  %v766_v30 = vrot.slane %v764_v9, 1  ;;  %11867 = vst [vmem:[#allocation74_spill] sm:$0xff] %v8399_v37  ;;  %v11611_v43 = vunpack.c.l.b16 %v8399_v37  ;;  %v11609_v12 = vunpack.c.l.b16 %v8402_v15 }
  0xaf   : > { %11868 = vst [vmem:[#allocation75_spill] sm:$0xff] %v8402_v15 }
  0xb1   : > { %2067 = vmatmul.bf16.gmra.mxu3 %v1353_v61  ;;  %v783_v61 = vshrl.u32 %v8341_v7, 16 }
  0xb3   : > { %v8415_v9 = vor.u32 %v783_v61, %v778_v0 }
  0xb5   : > { %v8379_v50 = vpop.f32.mrf.mxu0  ;;  %v8381_v42 = vpop.f32.mrf.mxu1  ;;  %11871 = vst [vmem:[#allocation78_spill] sm:$0xff] %v8415_v9  ;;  %v11610_v58 = vunpack.c.l.b16 %v8415_v9 }
  0xb6   : > { %11863 = vst [vmem:[#allocation70_spill] sm:$0xff] %v8381_v42 }
  0xb7   : > { %v1359_v0 = vpack.c.b16 %v11610_v58, %v1014_v22  ;;  %v8445_v58 = vunpack.c.h.b16 %v7881_v26  ;;  %v883_v26 = vrot.slane %v7922_v41, 1  ;;  %v11881_v41 = vunpack.c.h.b16 %v8285_v55 }
  0xb8   : > { %1820 = vmatmul.bf16.gmra.mxu0 %v1356_v62  ;;  %1889 = vmatmul.bf16.gmra.mxu1 %v1341_v52  ;;  %v7323_v62 = vld [vmem:[%s11511_s2 + $0x2d8] sm:$0xff]  ;;  %v8410_v52 = vsel %vm575_vm0, %v762_v27, %v766_v30  ;;  %v8425_v27 = vpack.c.b16 %v11609_v12, %v11611_v43  ;;  %v780_v12 = vshrl.u32 %v8364_v48, 16 }
  0xb9   : > { %1978 = vmatmul.bf16.gmra.mxu2 %v8386_v40  ;;  %11870 = vst [vmem:[#allocation77_spill] sm:$0xff] %v8410_v52  ;;  %2196 = vmatpush.bf16.msra.mxu1 %v7323_v62  ;;  %v1009_v46 = vunpack.c.l.b16 %v8410_v52  ;;  %v398_v43 = vld [vmem:[%s7849_s19 + $0xf8] sm:$0x11] }
  0xba   : > { %11872 = vst [vmem:[#allocation79_spill] sm:$0xff] %v8425_v27  ;;  %v530_v36 = vunpack.c.h.b16 %v398_v43 }
  0xbb   : > { %v1352_v7 = vpack.c.b16 %v1009_v46, %v11875_v2  ;;  %11876 = vst [vmem:[#allocation82_spill] sm:$0xff] %v8445_v58 }
  0xbc   : > { %v8392_v1 = vpop.f32.mrf.mxu2 }
  0xbd   : > { %11865 = vst [vmem:[#allocation72_spill] sm:$0xff] %v8392_v1  ;;  %v8394_v14 = vpop.f32.mrf.mxu0  ;;  %v8396_v23 = vpop.f32.mrf.mxu1  ;;  %v11617_v1 = vunpack.c.h.b16 %v8399_v37  ;;  %v884_v37 = vrot.slane %v8038_v54, 1 }
  0xbe   : > { %11866 = vst [vmem:[#allocation73_spill] sm:$0xff] %v8396_v23  ;;  %v8442_v22 = vpop.f32.mrf.mxu3  ;;  %v529_v23 = vunpack.c.l.b16 %v398_v43  ;;  %v889_v43 = vrot.slane %v8050_v34, 1 }
  0xbf   : > { %v8452_v2 = vpack.c.b16 %v11616_v53, %v11617_v1  ;;  %v1013_v1 = vunpack.c.h.b16 %v8410_v52  ;;  %v402_v52 = vld [vmem:[%s7825_s15 + $0x18] sm:$0x11]  ;;  %v8485_v47 = vsel %vm876_vm1, %v883_v26, %v884_v37  ;;  %v11633_v26 = vrot.slane %v8079_v18, 1 }
  0xc0   : > { %11884 = vst [vmem:[#allocation89_spill] sm:$0xff] %v8485_v47  ;;  %v532_v55 = vunpack.c.h.b16 %v402_v52  ;;  %v8526_v34 = vunpack.c.l.b16 %v884_v37 }
  0xc1   : > { %2072 = vmatmul.bf16.gmra.mxu3 %v1359_v0  ;;  %v801_v53 = vshll.u32 %v8452_v2, 16 }
  0xc2   : > { %11890 = vst [vmem:[#allocation94_spill] sm:$0xff] %v8526_v34 }
  0xc4   : > { %v8427_v62 = vpop.f32.mrf.mxu2 }
  0xc5   : > { %11873 = vst [vmem:[#allocation80_spill] sm:$0xff] %v8427_v62  ;;  %v8431_v61 = vpop.f32.mrf.mxu0  ;;  %v8433_v40 = vpop.f32.mrf.mxu1  ;;  %v8463_v62 = vpack.c.b16 %v530_v36, %v8445_v58  ;;  %v803_v36 = vrot.slane %v801_v53, 1 }
  0xc6   : > { %11874 = vst [vmem:[#allocation81_spill] sm:$0xff] %v8433_v40 }
  0xc7   : > { %11880 = vst [vmem:[#allocation86_spill] sm:$0xff] %v8463_v62 }
  0xc8   : > { %1825 = vmatmul.bf16.gmra.mxu0 %v8425_v27  ;;  %1894 = vmatmul.bf16.gmra.mxu1 %v8276_v31 }
  0xc9   : > { %1983 = vmatmul.bf16.gmra.mxu2 %v1352_v7  ;;  %v8460_v7 = vor.u32 %v780_v12, %v766_v30  ;;  %v799_v30 = vshrl.u32 %v8452_v2, 16  ;;  %v806_v12 = vshll.u32 %v8463_v62, 16 }
  0xcb   : > { %11879 = vst [vmem:[#allocation85_spill] sm:$0xff] %v8460_v7  ;;  %v808_v31 = vrot.slane %v806_v12, 1  ;;  %v804_v40 = vor.u32 %v803_v36, %v799_v30  ;;  %v11885_v25 = vunpack.c.l.b16 %v8460_v7  ;;  %v8490_v12 = vunpack.c.h.b16 %v7967_v60 }
  0xcc   : > { %v8454_v46 = vpop.f32.mrf.mxu2  ;;  %v8500_v30 = vpack.c.b16 %v529_v23, %v7900_v33  ;;  %v8512_v36 = vsel %vm876_vm1, %v889_v43, %v11633_v26  ;;  %v813_v43 = vshrl.u32 %v8463_v62, 16  ;;  %v819_v62 = vshll.u32 %v7854_v16, 16 }
  0xcd   : > { %11877 = vst [vmem:[#allocation83_spill] sm:$0xff] %v8454_v46  ;;  %v8456_v0 = vpop.f32.mrf.mxu0  ;;  %v8458_v9 = vpop.f32.mrf.mxu1  ;;  %v1358_v53 = vpack.c.b16 %v11885_v25, %v1013_v1  ;;  %v789_v25 = vshll.u32 %v8425_v27, 16  ;;  %v831_v1 = vshll.u32 %v7860_v17, 16 }
  0xce   : > { %11878 = vst [vmem:[#allocation84_spill] sm:$0xff] %v8458_v9  ;;  %v8470_v46 = vpop.f32.mrf.mxu3  ;;  %v1351_v9 = vpack.c.b16 %v11881_v41, %v8278_v49  ;;  %v8493_v41 = vsel %vm575_vm0, %v804_v40, %v808_v31  ;;  %v8506_v40 = vpack.c.b16 %v532_v55, %v8490_v12  ;;  %v829_v55 = vshrl.u32 %v7860_v17, 16  ;;  %v7322_v49 = vld [vmem:[%s11511_s2 + $0x2d0] sm:$0xff] }
  0xcf   : > { %11886 = vst [vmem:[#allocation90_spill] sm:$0xff] %v8493_v41  ;;  %v791_v7 = vrot.slane %v789_v25, 1  ;;  %v833_v33 = vrot.slane %v831_v1, 1  ;;  %2197 = vmatpush.bf16.msra.mxu1 %v7322_v49  ;;  %v8529_v25 = vor.u32 %v813_v43, %v808_v31  ;;  %v11893_v31 = vunpack.c.h.b16 %v8307_v59 }
  0xd0   : > { %11887 = vst [vmem:[#allocation91_spill] sm:$0xff] %v8506_v40  ;;  %v836_v26 = vshll.u32 %v8506_v40, 16  ;;  %v817_v43 = vshrl.u32 %v7854_v16, 16 }
  0xd1   : > { %2077 = vmatmul.bf16.gmra.mxu3 %v8493_v41  ;;  %11888 = vst [vmem:[#allocation92_spill] sm:$0xff] %v8512_v36  ;;  %v787_v41 = vshrl.u32 %v8425_v27, 16  ;;  %v1357_v49 = vpack.c.b16 %v8325_v4, %v11893_v31 }
  0xd2   : > { %11891 = vst [vmem:[#allocation95_spill] sm:$0xff] %v8529_v25  ;;  %v838_v27 = vrot.slane %v836_v26, 1 }
  0xd3   : > { %v792_v17 = vor.u32 %v791_v7, %v787_v41 }
  0xd4   : > { %v8477_v54 = vpop.f32.mrf.mxu2 }
  0xd5   : > { %11882 = vst [vmem:[#allocation87_spill] sm:$0xff] %v8477_v54  ;;  %v8480_v42 = vpop.f32.mrf.mxu0  ;;  %v8482_v15 = vpop.f32.mrf.mxu1  ;;  %v531_v54 = vunpack.c.l.b16 %v402_v52 }
  0xd6   : > { %11883 = vst [vmem:[#allocation88_spill] sm:$0xff] %v8482_v15  ;;  %v8503_v60 = vpop.f32.mrf.mxu3  ;;  %v834_v15 = vor.u32 %v833_v33, %v829_v55  ;;  %v11644_v33 = vunpack.c.l.b16 %v8529_v25 }
  0xd7   : > { %v8534_v56 = vpack.c.b16 %v531_v54, %v7987_v10  ;;  %v821_v10 = vrot.slane %v819_v62, 1 }
  0xd8   : > { %1899 = vmatmul.bf16.gmra.mxu1 %v1351_v9  ;;  %2116 = vmatmul.bf16.vlgmr.msrb.gmra.mxu0 %v8485_v47  ;;  %v794_v47 = vshll.u32 %v8500_v30, 16  ;;  %v8538_v44 = vsel %vm575_vm0, %v834_v15, %v838_v27 }
  0xd9   : > { %1988 = vmatmul.bf16.gmra.mxu2 %v1358_v53  ;;  %11892 = vst [vmem:[#allocation96_spill] sm:$0xff] %v8538_v44  ;;  %v1034_v37 = vunpack.c.l.b16 %v8538_v44  ;;  %v824_v59 = vshll.u32 %v8534_v56, 16 }
  0xda   : > { %v796_v1 = vrot.slane %v794_v47, 1 }
  0xdb   : > { %v1369_v15 = vpack.c.b16 %v1034_v37, %v11644_v33  ;;  %v822_v37 = vor.u32 %v821_v10, %v817_v43 }
  0xdc   : > { %v1949_v9 = vpop.f32.mrf.mxu2  ;;  %v8549_v26 = vsel %vm575_vm0, %v792_v17, %v796_v1 }
  0xdd   : > { %v8515_v23 = vpop.f32.mrf.mxu0  ;;  %v8517_v53 = vpop.f32.mrf.mxu1  ;;  %11894 = vst [vmem:[#allocation97_spill] sm:$0xff] %v8549_v26 }
  0xde   : > { %11889 = vst [vmem:[#allocation93_spill] sm:$0xff] %v8517_v53  ;;  %v963_v53 = vunpack.c.l.b16 %v8512_v36  ;;  %v8531_v52 = vpop.f32.mrf.mxu3 }
  0xe0   : > { %v1322_v47 = vpack.c.b16 %v963_v53, %v8526_v34  ;;  %v810_v53 = vshrl.u32 %v8500_v30, 16 }
  0xe1   : > { %2082 = vmatmul.bf16.gmra.mxu3 %v1369_v15 }
  0xe2   : > { %v8565_v34 = vor.u32 %v810_v53, %v796_v1  ;;  %v1038_v53 = vunpack.c.h.b16 %v8538_v44 }
  0xe4   : > { %v1951_v7 = vpop.f32.mrf.mxu2  ;;  %11895 = vst [vmem:[#allocation98_spill] sm:$0xff] %v8565_v34 }
  0xe5   : > { %v8546_v41 = vpop.f32.mrf.mxu0  ;;  %v1865_v54 = vpop.f32.mrf.mxu1 }
  0xe6   : > { %v1866_v55 = vadd.f32 %v1865_v54, %v8379_v50  ;;  %v8558_v17 = vpop.f32.mrf.mxu3  ;;  %v826_v50 = vrot.slane %v824_v59, 1  ;;  %v11648_v59 = vunpack.c.l.b16 %v8565_v34 }
  0xe8   : > { %v1950_v31 = vadd.f32 %v1949_v9, %v1866_v55  ;;  %1904 = vmatmul.bf16.gmra.mxu1 %v1357_v49  ;;  %2121 = vmatmul.bf16.gmra.mxu0 %v1322_v47  ;;  %v8569_v49 = vsel %vm575_vm0, %v822_v37, %v826_v50  ;;  %v843_v47 = vshrl.u32 %v8506_v40, 16  ;;  %v967_v55 = vunpack.c.h.b16 %v8512_v36 }
  0xe9   : > { %1993 = vmatmul.bf16.gmra.mxu2 %v8549_v26  ;;  %11896 = vst [vmem:[#allocation99_spill] sm:$0xff] %v8569_v49  ;;  %v1033_v1 = vunpack.c.l.b16 %v8569_v49  ;;  %v410_v26 = vld [vmem:[%s7825_s15 + $0x58] sm:$0x11] }
  0xea   : > { %v8561_v25 = vadd.f32 %v8442_v22, %v1950_v31  ;;  %v11897_v22 = vrot.slane %v8079_v18, 1  ;;  %v8577_v43 = vor.u32 %v843_v47, %v838_v27 }
  0xeb   : > { %v1368_v47 = vpack.c.b16 %v1033_v1, %v11648_v59  ;;  %v7590_v1 = vld [vmem:[%s7825_s15 + $0x30] sm:$0xff] }
  0xec   : > { %v1954_v54 = vpop.f32.mrf.mxu2  ;;  %v8575_v10 = vunpack.c.l.b16 %v11897_v22  ;;  %11899 = vst [vmem:[#allocation101_spill] sm:$0xff] %v8577_v43  ;;  %v11652_v22 = vunpack.c.h.b16 %v8056_v39 }
  0xed   : > { %v8563_v33 = vpop.f32.mrf.mxu0  ;;  %v1867_v62 = vpop.f32.mrf.mxu1 }
  0xee   : > { %v1868_v9 = vadd.f32 %v1867_v62, %v8394_v14  ;;  %11898 = vst [vmem:[#allocation100_spill] sm:$0xff] %v8575_v10  ;;  %v8581_v31 = vpop.f32.mrf.mxu3  ;;  %v1328_v37 = vpack.c.b16 %v8575_v10, %v967_v55  ;;  %v895_v10 = vrot.slane %v8130_v5, 1  ;;  %v11902_v5 = vunpack.c.h.b16 %v7828_v6 }
  0xf0   : > { %v1952_v15 = vadd.f32 %v1951_v7, %v1868_v9  ;;  %v11646_v7 = vunpack.c.l.b16 %v8577_v43 }
  0xf2   : > { %v8584_v14 = vadd.f32 %v8470_v46, %v1952_v15  ;;  %v1375_v27 = vpack.c.b16 %v11646_v7, %v1038_v53  ;;  %v11653_v15 = vunpack.c.h.b16 %v8053_v38  ;;  %v840_v53 = vshrl.u32 %v8534_v56, 16 }
  0xf4   : > { %v1956_v18 = vpop.f32.mrf.mxu2  ;;  %2087 = vmatmul.bf16.gmra.mxu3 %v1375_v27  ;;  %v8609_v27 = vunpack.c.h.b16 %v7590_v1 }
  0xf5   : > { %v8591_v62 = vpop.f32.mrf.mxu0  ;;  %v1870_v9 = vpop.f32.mrf.mxu1 }
  0xf6   : > { %v1871_v46 = vadd.f32 %v1870_v9, %v8431_v61  ;;  %v8600_v7 = vpop.f32.mrf.mxu3  ;;  %v7321_v61 = vld [vmem:[%s11511_s2 + $0x2c8] sm:$0xff]  ;;  %v406_v9 = vld [vmem:[%s7825_s15 + $0x38] sm:$0x11] }
  0xf7   : > { %2198 = vmatpush.bf16.msra.mxu1 %v7321_v61  ;;  %v1037_v61 = vunpack.c.h.b16 %v8569_v49  ;;  %v533_v49 = vunpack.c.l.b16 %v406_v9 }
  0xf8   : > { %v1955_v55 = vadd.f32 %v1954_v54, %v1871_v46  ;;  %1909 = vmatmul.bf16.gmra.mxu1 %v8452_v2  ;;  %2126 = vmatmul.bf16.gmra.mxu0 %v1328_v37  ;;  %v8616_v54 = vpack.c.b16 %v11652_v22, %v11653_v15  ;;  %v8620_v46 = vor.u32 %v840_v53, %v826_v50  ;;  %v896_v22 = vrot.slane %v8199_v3, 1 }
  0xf9   : > { %1998 = vmatmul.bf16.gmra.mxu2 %v1368_v47  ;;  %v1367_v3 = vpack.c.b16 %v11902_v5, %v8445_v58 }
  0xfa   : > { %v8603_v43 = vadd.f32 %v8503_v60, %v1955_v55  ;;  %11900 = vst [vmem:[#allocation102_spill] sm:$0xff] %v8620_v46  ;;  %v534_v55 = vunpack.c.h.b16 %v406_v9  ;;  %v861_v15 = vshll.u32 %v8616_v54, 16  ;;  %v859_v53 = vshrl.u32 %v8616_v54, 16 }
  0xfb   : > { %v8645_v38 = vsel %vm876_vm1, %v895_v10, %v896_v22  ;;  %v11904_v40 = vunpack.c.l.b16 %v8620_v46  ;;  %v901_v10 = vrot.slane %v8205_v45, 1 }
  0xfc   : > { %v1959_v37 = vpop.f32.mrf.mxu2  ;;  %v8624_v1 = vpack.c.b16 %v534_v55, %v8609_v27  ;;  %11903 = vst [vmem:[#allocation104_spill] sm:$0xff] %v8645_v38 }
  0xfd   : > { %v8618_v47 = vpop.f32.mrf.mxu0  ;;  %v1872_v60 = vpop.f32.mrf.mxu1 }
  0xfe   : > { %v1873_v59 = vadd.f32 %v1872_v60, %v8456_v0  ;;  %11901 = vst [vmem:[#allocation103_spill] sm:$0xff] %v8624_v1  ;;  %v8631_v50 = vpop.f32.mrf.mxu3  ;;  %v866_v0 = vshll.u32 %v8624_v1, 16 }
 0x100   : > { %v1957_v44 = vadd.f32 %v1956_v18, %v1873_v59  ;;  %v863_v59 = vrot.slane %v861_v15, 1  ;;  %v868_v18 = vrot.slane %v866_v0, 1  ;;  %v1164_v15 = vunpack.c.h.b16 %v410_v26 }
 0x102   : > { %v8636_v60 = vadd.f32 %v8531_v52, %v1957_v44  ;;  %v864_v36 = vor.u32 %v863_v59, %v859_v53  ;;  %v1374_v44 = vpack.c.b16 %v11904_v40, %v1037_v61  ;;  %v8650_v52 = vunpack.c.h.b16 %v7974_v63 }
 0x103   : > { %v11671_v53 = vrot.slane %v8217_v51, 1  ;;  %v849_v63 = vshll.u32 %v8089_v32, 16  ;;  %v1163_v61 = vunpack.c.l.b16 %v410_v26  ;;  %v873_v26 = vshrl.u32 %v8624_v1, 16 }
 0x104   : > { %v1961_v55 = vpop.f32.mrf.mxu2  ;;  %11905 = vst [vmem:[#allocation105_spill] sm:$0xff] %v8650_v52  ;;  %v8654_v0 = vsel %vm575_vm0, %v864_v36, %v868_v18 }
 0x105   : > { %v8642_v34 = vpop.f32.mrf.mxu0  ;;  %v1875_v39 = vpop.f32.mrf.mxu1  ;;  %11906 = vst [vmem:[#allocation106_spill] sm:$0xff] %v8654_v0  ;;  %2092 = vmatmul.bf16.gmra.mxu3 %v8654_v0  ;;  %v8676_v5 = vsel %vm876_vm1, %v901_v10, %v11671_v53  ;;  %v8686_v53 = vunpack.c.l.b16 %v896_v22  ;;  %v8689_v58 = vor.u32 %v873_v26, %v868_v18  ;;  %v7239_v18 = vld [vmem:[%s11511_s2 + $0x38] sm:$0xff] }
 0x106   : > { %v1876_v6 = vadd.f32 %v1875_v39, %v8480_v42  ;;  %v8661_v40 = vpop.f32.mrf.mxu3  ;;  %v8664_v39 = vpack.c.b16 %v533_v49, %v7905_v35  ;;  %v8667_v42 = vpack.c.b16 %v1164_v15, %v8650_v52  ;;  %11907 = vst [vmem:[#allocation107_spill] sm:$0xff] %v8676_v5  ;;  %v847_v49 = vshrl.u32 %v8089_v32, 16  ;;  %2734 = vmatpush.bf16.msra.mxu2 %v7239_v18 }
 0x107   : > { %v1182_v15 = vshrl.u32 %v7892_v29, 16  ;;  %11908 = vst [vmem:[#allocation108_spill] sm:$0xff] %v8686_v53  ;;  %v987_v35 = vunpack.c.l.b16 %v8676_v5  ;;  %v11677_v22 = vunpack.c.l.b16 %v8689_v58 }
 0x108   : > { %v1960_v9 = vadd.f32 %v1959_v37, %v1876_v6  ;;  %1914 = vmatmul.bf16.gmra.mxu1 %v1367_v3  ;;  %2131 = vmatmul.bf16.gmra.mxu0 %v8645_v38  ;;  %v1184_v37 = vshll.u32 %v7892_v29, 16  ;;  %v851_v6 = vrot.slane %v849_v63, 1  ;;  %v1189_v46 = vshll.u32 %v8667_v42, 16  ;;  %11909 = vst [vmem:[#allocation109_spill] sm:$0xff] %v8689_v58 }
 0x109   : > { %2003 = vmatmul.bf16.gmra.mxu2 %v1374_v44  ;;  %v8692_v63 = vpack.c.b16 %v1163_v61, %v7995_v21  ;;  %v11911_v61 = vunpack.c.h.b16 %v7832_v8 }
 0x10a   : > { %v8670_v36 = vadd.f32 %v8558_v17, %v1960_v9  ;;  %v1186_v0 = vrot.slane %v1184_v37, 1  ;;  %v854_v9 = vshll.u32 %v8664_v39, 16  ;;  %v1172_v37 = vshll.u32 %v7886_v28, 16 }
 0x10b   : > { %v852_v1 = vor.u32 %v851_v6, %v847_v49  ;;  %v1170_v49 = vshrl.u32 %v7886_v28, 16 }
 0x10c   : > { %v1964_v59 = vpop.f32.mrf.mxu2  ;;  %v1187_v38 = vor.u32 %v1186_v0, %v1182_v15  ;;  %v856_v0 = vrot.slane %v854_v9, 1  ;;  %v1373_v15 = vpack.c.b16 %v8490_v12, %v11911_v61  ;;  %v1174_v6 = vrot.slane %v1172_v37, 1  ;;  %v7238_v37 = vld [vmem:[%s11511_s2 + $0x30] sm:$0xff] }
 0x10d   : > { %v8678_v3 = vpop.f32.mrf.mxu0  ;;  %v1877_v44 = vpop.f32.mrf.mxu1  ;;  %2735 = vmatpush.bf16.msra.mxu2 %v7238_v37  ;;  %v7236_v37 = vld [vmem:[%s11511_s2 + $0x20] sm:$0xff] }
 0x10e   : > { %v1878_v17 = vadd.f32 %v1877_v44, %v8515_v23  ;;  %v8695_v23 = vpop.f32.mrf.mxu3  ;;  %v1191_v44 = vrot.slane %v1189_v46, 1  ;;  %v1338_v46 = vpack.c.b16 %v987_v35, %v8686_v53  ;;  %v1177_v35 = vshll.u32 %v8692_v63, 16 }
 0x110   : > { %v1962_v10 = vadd.f32 %v1961_v55, %v1878_v17  ;;  %v8705_v55 = vsel %vm575_vm0, %v1187_v38, %v1191_v44  ;;  %v7247_v38 = vld [vmem:[%s11511_s2 + $0x78] sm:$0xff] }
 0x111   : > { %11910 = vst [vmem:[#allocation110_spill] sm:$0xff] %v8705_v55  ;;  %2818 = vmatpush.bf16.msrb.mxu3 %v7247_v38  ;;  %v1175_v38 = vor.u32 %v1174_v6, %v1170_v49 }
 0x112   : > { %v8698_v29 = vadd.f32 %v8581_v31, %v1962_v10  ;;  %v1206_v31 = vunpack.c.l.b16 %v8705_v55  ;;  %v8720_v10 = vsel %vm575_vm0, %v852_v1, %v856_v0 }
 0x113   : > { %11912 = vst [vmem:[#allocation111_spill] sm:$0xff] %v8720_v10 }
 0x114   : > { %v1966_v17 = vpop.f32.mrf.mxu2  ;;  %v1385_v61 = vpack.c.b16 %v1206_v31, %v11677_v22  ;;  %v1179_v22 = vrot.slane %v1177_v35, 1  ;;  %v1196_v35 = vshrl.u32 %v8667_v42, 16 }
 0x115   : > { %v8713_v9 = vpop.f32.mrf.mxu0  ;;  %v1880_v26 = vpop.f32.mrf.mxu1 }
 0x116   : > { %v1881_v8 = vadd.f32 %v1880_v26, %v8546_v41  ;;  %v870_v41 = vshrl.u32 %v8664_v39, 16  ;;  %2097 = vmatmul.bf16.gmra.mxu3 %v1385_v61  ;;  %v8730_v1 = vpop.f32.mrf.mxu3  ;;  %v7246_v26 = vld [vmem:[%s11511_s2 + $0x70] sm:$0xff]  ;;  %v8753_v6 = vsel %vm575_vm0, %v1175_v38, %v1179_v22 }
 0x117   : > { %2819 = vmatpush.bf16.msrb.mxu3 %v7246_v26  ;;  %11914 = vst [vmem:[#allocation113_spill] sm:$0xff] %v8753_v6  ;;  %v1205_v38 = vunpack.c.l.b16 %v8753_v6 }
 0x118   : > { %v1965_v18 = vadd.f32 %v1964_v59, %v1881_v8  ;;  %1919 = vmatmul.bf16.gmra.mxu1 %v1373_v15  ;;  %2136 = vmatmul.bf16.gmra.mxu0 %v1338_v46  ;;  %v7320_v59 = vld [vmem:[%s11511_s2 + $0x2c0] sm:$0xff]  ;;  %v7237_v15 = vld [vmem:[%s11511_s2 + $0x28] sm:$0xff]  ;;  %v8746_v21 = vor.u32 %v870_v41, %v856_v0  ;;  %v991_v0 = vunpack.c.h.b16 %v8676_v5  ;;  %v11915_v41 = vrot.slane %v8217_v51, 1 }
 0x119   : > { %2008 = vmatmul.bf16.gmra.mxu2 %v8720_v10  ;;  %2199 = vmatpush.bf16.msra.mxu1 %v7320_v59  ;;  %v8764_v59 = vor.u32 %v1196_v35, %v1191_v44  ;;  %v1210_v51 = vunpack.c.h.b16 %v8705_v55  ;;  %v7235_v44 = vld [vmem:[%s11511_s2 + $0x18] sm:$0xff] }
 0x11a   : > { %v8736_v31 = vadd.f32 %v8600_v7, %v1965_v18  ;;  %11913 = vst [vmem:[#allocation112_spill] sm:$0xff] %v8746_v21  ;;  %v7245_v7 = vld [vmem:[%s11511_s2 + $0x68] sm:$0xff]  ;;  %2736 = vmatpush.bf16.msra.mxu2 %v7237_v15  ;;  %v8762_v26 = vunpack.c.l.b16 %v11915_v41  ;;  %v11918_v58 = vunpack.c.l.b16 %v8746_v21 }
 0x11b   : > { %2820 = vmatpush.bf16.msrb.mxu3 %v7245_v7  ;;  %11917 = vst [vmem:[#allocation115_spill] sm:$0xff] %v8764_v59  ;;  %v11681_v7 = vunpack.c.l.b16 %v8764_v59 }
 0x11c   : > { %v1969_v46 = vpop.f32.mrf.mxu2  ;;  %11916 = vst [vmem:[#allocation114_spill] sm:$0xff] %v8762_v26 }
 0x11d   : > { %v8744_v8 = vpop.f32.mrf.mxu0  ;;  %v1882_v61 = vpop.f32.mrf.mxu1 }
 0x11e   : > { %v1883_v49 = vadd.f32 %v1882_v61, %v8563_v33  ;;  %v8768_v15 = vpop.f32.mrf.mxu3  ;;  %v7244_v61 = vld [vmem:[%s11511_s2 + $0x60] sm:$0xff]  ;;  %2737 = vmatpush.bf16.msra.mxu2 %v7236_v37  ;;  %v1391_v37 = vpack.c.b16 %v11681_v7, %v1210_v51 }
 0x11f   : > { %2821 = vmatpush.bf16.msrb.mxu3 %v7244_v61 }
 0x120   : > { %v1967_v18 = vadd.f32 %v1966_v17, %v1883_v49  ;;  %v1344_v49 = vpack.c.b16 %v8762_v26, %v991_v0  ;;  %v7234_v0 = vld [vmem:[%s11511_s2 + $0x10] sm:$0xff] }
 0x122   : > { %v8774_v17 = vadd.f32 %v8631_v50, %v1967_v18  ;;  %v1384_v50 = vpack.c.b16 %v1205_v38, %v11918_v58  ;;  %v7243_v18 = vld [vmem:[%s11511_s2 + $0x58] sm:$0xff]  ;;  %2738 = vmatpush.bf16.msra.mxu2 %v7235_v44  ;;  %v1193_v58 = vshrl.u32 %v8692_v63, 16 }
 0x123   : > { %2822 = vmatpush.bf16.msrb.mxu3 %v7243_v18 }
 0x124   : > { %v1971_v35 = vpop.f32.mrf.mxu2 }
 0x125   : > { %v8782_v41 = vpop.f32.mrf.mxu0  ;;  %v1885_v33 = vpop.f32.mrf.mxu1 }
 0x126   : > { %v1886_v61 = vadd.f32 %v1885_v33, %v8591_v62  ;;  %2102 = vmatmul.bf16.gmra.mxu3 %v1391_v37  ;;  %v8797_v38 = vpop.f32.mrf.mxu3  ;;  %v7242_v62 = vld [vmem:[%s11511_s2 + $0x50] sm:$0xff]  ;;  %2739 = vmatpush.bf16.msra.mxu2 %v7234_v0  ;;  %v7241_v37 = vld [vmem:[%s11511_s2 + $0x48] sm:$0xff]  ;;  %v1209_v0 = vunpack.c.h.b16 %v8753_v6 }
 0x127   : > { %2823 = vmatpush.bf16.msrb.mxu3 %v7242_v62 }
 0x128   : > { %v1970_v55 = vadd.f32 %v1969_v46, %v1886_v61  ;;  %1924 = vmatmul.bf16.gmra.mxu1 %v8616_v54  ;;  %2141 = vmatmul.bf16.gmra.mxu0 %v1344_v49  ;;  %v7233_v46 = vld [vmem:[%s11511_s2 + $0x8] sm:$0xff]  ;;  %v907_v61 = vrot.slane %v8257_v20, 1  ;;  %v11920_v20 = vunpack.c.h.b16 %v7839_v11 }
 0x129   : > { %2013 = vmatmul.bf16.gmra.mxu2 %v1384_v50  ;;  %v8810_v50 = vor.u32 %v1193_v58, %v1179_v22  ;;  %v908_v22 = vrot.slane %v8338_v13, 1 }
 0x12a   : > { %v8803_v33 = vadd.f32 %v8661_v40, %v1970_v55  ;;  %2740 = vmatpush.bf16.msra.mxu2 %v7233_v46  ;;  %v7232_v55 = vld [vmem:[%s11511_s2] sm:$0xff]  ;;  %v1383_v13 = vpack.c.b16 %v11920_v20, %v8609_v27 }
 0x12b   : > { %11919 = vst [vmem:[#allocation116_spill] sm:$0xff] %v8810_v50  ;;  %2824 = vmatpush.bf16.msrb.mxu3 %v7241_v37  ;;  %v8839_v58 = vsel %vm876_vm1, %v907_v61, %v908_v22  ;;  %v11922_v6 = vunpack.c.l.b16 %v8810_v50  ;;  %v7263_v61 = vld [vmem:[%s11511_s2 + $0xf8] sm:$0xff]  ;;  %v8867_v20 = vunpack.c.l.b16 %v908_v22  ;;  %v11925_v50 = vunpack.c.h.b16 %v7866_v19 }
 0x12c   : > { %v1974_v51 = vpop.f32.mrf.mxu2  ;;  %11921 = vst [vmem:[#allocation117_spill] sm:$0xff] %v8839_v58  ;;  %2986 = vmatpush.bf16.msrb.mxu1 %v7263_v61 }
 0x12d   : > { %v8808_v44 = vpop.f32.mrf.mxu0  ;;  %v1887_v49 = vpop.f32.mrf.mxu1  ;;  %v1390_v59 = vpack.c.b16 %v11922_v6, %v1209_v0  ;;  %v913_v6 = vrot.slane %v8349_v57, 1  ;;  %v914_v0 = vrot.slane %v8364_v48, 1  ;;  %11924 = vst [vmem:[#allocation119_spill] sm:$0xff] %v8867_v20 }
 0x12e   : > { %v1888_v40 = vadd.f32 %v1887_v49, %v8618_v47  ;;  %v8823_v62 = vpop.f32.mrf.mxu3  ;;  %v7240_v47 = vld [vmem:[%s11511_s2 + $0x40] sm:$0xff]  ;;  %2741 = vmatpush.bf16.msra.mxu2 %v7232_v55  ;;  %v6058_v49 = vld [vmem:[%s7849_s19 + $0x8] sm:$0xf0] }
 0x12f   : > { %2825 = vmatpush.bf16.msrb.mxu3 %v7240_v47 }
 0x130   : > { %v1972_v18 = vadd.f32 %v1971_v35, %v1888_v40  ;;  %v7230_v35 = vld [vmem:[%s7849_s19 + $0x4] sm:$0xf] }
 0x132   : > { %v8829_v46 = vadd.f32 %v8695_v23, %v1972_v18  ;;  %v8843_v23 = vor.u32 %v7230_v35, %v6058_v49  ;;  %v7255_v18 = vld [vmem:[%s11511_s2 + $0xb8] sm:$0xff]  ;;  %v8864_v35 = vsel %vm876_vm1, %v913_v6, %v914_v0 }
 0x133   : > { %2902 = vmatpush.bf16.msra.mxu0 %v7255_v18  ;;  %11923 = vst [vmem:[#allocation118_spill] sm:$0xff] %v8864_v35  ;;  %v6056_v18 = vld [vmem:[%s7849_s19] sm:$0xf] }
 0x134   : > { %v1976_v37 = vpop.f32.mrf.mxu2 }
 0x135   : > { %v8836_v40 = vpop.f32.mrf.mxu0  ;;  %v1890_v7 = vpop.f32.mrf.mxu1 }
 0x136   : > { %v1891_v55 = vadd.f32 %v1890_v7, %v8642_v34  ;;  %2826 = vmatmul.bf16.vlgmr.msrb.gmra.mxu3 %v8843_v23  ;;  %v8859_v7 = vpop.f32.mrf.mxu3 }
 0x138   : > { %v1975_v11 = vadd.f32 %v1974_v51, %v1891_v55  ;;  %1929 = vmatmul.bf16.gmra.mxu1 %v1383_v13  ;;  %2146 = vmatmul.bf16.gmra.mxu0 %v8839_v58  ;;  %v8871_v13 = vld [vmem:[%s7849_s19 + $0x10] sm:$0xff] }
 0x139   : > { %2018 = vmatmul.bf16.gmra.mxu2 %v1390_v59  ;;  %v450_v6 = vunpack.c.h.b16 %v8871_v13 }
 0x13a   : > { %v8857_v34 = vadd.f32 %v8730_v1, %v1975_v11  ;;  %v1011_v1 = vunpack.c.l.b16 %v8864_v35  ;;  %v7231_v11 = vld [vmem:[%s7849_s19 + $0x4] sm:$0xf0] }
 0x13b   : > { %v8887_v26 = vor.u32 %v7231_v11, %v6056_v18 }
 0x13c   : > { %v1979_v51 = vpop.f32.mrf.mxu2  ;;  %v1354_v22 = vpack.c.b16 %v1011_v1, %v8867_v20  ;;  %v11936_v20 = vld [vmem:[#allocation18_spill] sm:$0xff] }
 0x13d   : > { %v8861_v47 = vpop.f32.mrf.mxu0  ;;  %v1892_v59 = vpop.f32.mrf.mxu1  ;;  %11926 = vst [vmem:[#allocation120_spill] sm:$0xff] %v8887_v26 }
 0x13e   : > { %v1893_v48 = vadd.f32 %v1892_v59, %v8678_v3  ;;  %v8878_v61 = vpop.f32.mrf.mxu3  ;;  %v1389_v3 = vpack.c.b16 %v8650_v52, %v11925_v50 }
 0x140   : > { %v1977_v49 = vadd.f32 %v1976_v37, %v1893_v48 }
 0x142   : > { %v8874_v55 = vadd.f32 %v8768_v15, %v1977_v49  ;;  %v8890_v15 = vld [vmem:[%s7849_s19 + $0x18] sm:$0x11]  ;;  %v11927_v49 = vunpack.c.h.b16 %v7875_v24 }
 0x143   : > { %v516_v5 = vunpack.c.h.b16 %v8890_v15 }
 0x144   : > { %v1981_v37 = vpop.f32.mrf.mxu2  ;;  %v2281_v21 = vpack.c.b16 %v11927_v49, %v450_v6 }
 0x145   : > { %v8885_v59 = vpop.f32.mrf.mxu0  ;;  %v1895_v48 = vpop.f32.mrf.mxu1  ;;  %v8896_v50 = vpack.c.b16 %v516_v5, %v450_v6  ;;  %v11930_v5 = vld [vmem:[#allocation17_spill] sm:$0xff] }
 0x146   : > { %v1896_v58 = vadd.f32 %v1895_v48, %v8713_v9  ;;  %2831 = vmatmul.bf16.gmra.mxu3 %v2281_v21  ;;  %v8902_v18 = vpop.f32.mrf.mxu3  ;;  %v886_v6 = vrot.slane %v11930_v5, 1 }
 0x147   : > { %11928 = vst [vmem:[#allocation121_spill] sm:$0xff] %v8896_v50 }
 0x148   : > { %v1980_v19 = vadd.f32 %v1979_v51, %v1896_v58  ;;  %1934 = vmatmul.bf16.gmra.mxu1 %v1389_v3  ;;  %2151 = vmatmul.bf16.gmra.mxu0 %v1354_v22  ;;  %v1015_v58 = vunpack.c.h.b16 %v8864_v35  ;;  %v8908_v51 = vunpack.c.l.b16 %v914_v0  ;;  %v11931_v3 = vld [vmem:[#allocation19_spill] sm:$0xff] }
 0x149   : > { %2742 = vmatmul.bf16.vlgmr.msra.gmra.mxu2 %v8887_v26  ;;  %v887_v21 = vrot.slane %v11931_v3, 1  ;;  %v11934_v3 = vld [vmem:[#allocation12_spill] sm:$0xff] }
 0x14a   : > { %v8900_v1 = vadd.f32 %v8797_v38, %v1980_v19  ;;  %11929 = vst [vmem:[#allocation122_spill] sm:$0xff] %v8908_v51  ;;  %v11698_v38 = vunpack.c.l.b16 %v8871_v13  ;;  %v11935_v35 = vunpack.c.h.b16 %v11934_v3 }
 0x14b   : > { %v8923_v5 = vsel %vm876_vm1, %v886_v6, %v887_v21 }
 0x14c   : > { %v1984_v11 = vpop.f32.mrf.mxu2  ;;  %11932 = vst [vmem:[#allocation17_spill] sm:$0xff] %v8923_v5  ;;  %v2287_v10 = vpack.c.b16 %v11936_v20, %v11935_v35 }
 0x14d   : > { %v8904_v52 = vpop.f32.mrf.mxu0  ;;  %v1897_v49 = vpop.f32.mrf.mxu1 }
 0x14e   : > { %v1898_v9 = vadd.f32 %v1897_v49, %v8744_v8  ;;  %v8916_v19 = vpop.f32.mrf.mxu3  ;;  %v7254_v8 = vld [vmem:[%s11511_s2 + $0xb0] sm:$0xff] }
 0x14f   : > { %2903 = vmatpush.bf16.msra.mxu0 %v7254_v8  ;;  %v7262_v8 = vld [vmem:[%s11511_s2 + $0xf0] sm:$0xff] }
 0x150   : > { %v1982_v48 = vadd.f32 %v1981_v37, %v1898_v9  ;;  %v1360_v37 = vpack.c.b16 %v8908_v51, %v1015_v58  ;;  %2987 = vmatpush.bf16.msrb.mxu1 %v7262_v8  ;;  %v920_v8 = vrot.slane %v8500_v30, 1 }
 0x152   : > { %v8914_v22 = vadd.f32 %v8823_v62, %v1982_v48  ;;  %v11933_v62 = vunpack.c.l.b16 %v7875_v24  ;;  %v11937_v24 = vld [vmem:[#allocation25_spill] sm:$0xff] }
 0x154   : > { %v1986_v49 = vpop.f32.mrf.mxu2  ;;  %v2280_v48 = vpack.c.b16 %v11933_v62, %v11698_v38  ;;  %v892_v62 = vrot.slane %v11937_v24, 1  ;;  %v11938_v38 = vld [vmem:[#allocation26_spill] sm:$0xff] }
 0x155   : > { %v1900_v0 = vpop.f32.mrf.mxu1  ;;  %v2117_v9 = vpop.f32.mrf.mxu0  ;;  %v893_v51 = vrot.slane %v11938_v38, 1 }
 0x156   : > { %v1901_v53 = vadd.f32 %v1900_v0, %v8782_v41  ;;  %v8934_v58 = vadd.f32 %v2117_v9, %v8561_v25  ;;  %2836 = vmatmul.bf16.gmra.mxu3 %v2287_v10  ;;  %v2078_v25 = vpop.f32.mrf.mxu3 }
 0x157   : > { %v8946_v9 = vsel %vm876_vm1, %v892_v62, %v893_v51 }
 0x158   : > { %v1985_v6 = vadd.f32 %v1984_v11, %v1901_v53  ;;  %2156 = vmatmul.bf16.gmra.mxu0 %v1360_v37  ;;  %2200 = vmatmul.bf16.vlgmr.msra.gmra.mxu1 %v8923_v5  ;;  %11939 = vst [vmem:[#allocation19_spill] sm:$0xff] %v8946_v9  ;;  %v964_v10 = vunpack.c.l.b16 %v8946_v9 }
 0x159   : > { %2747 = vmatmul.bf16.gmra.mxu2 %v2280_v48  ;;  %v8952_v48 = vunpack.c.l.b16 %v887_v21  ;;  %v11943_v21 = vunpack.c.l.b16 %v11934_v3 }
 0x15a   : > { %v8943_v35 = vadd.f32 %v8859_v7, %v1985_v6  ;;  %v11941_v7 = vld [vmem:[#allocation79_spill] sm:$0xff] }
 0x15b   : > { %11940 = vst [vmem:[#allocation12_spill] sm:$0xff] %v8952_v48  ;;  %v919_v38 = vrot.slane %v11941_v7, 1  ;;  %v1323_v62 = vpack.c.b16 %v964_v10, %v8952_v48  ;;  %v926_v10 = vrot.slane %v8534_v56, 1 }
 0x15c   : > { %v1989_v41 = vpop.f32.mrf.mxu2 }
 0x15d   : > { %v1902_v20 = vpop.f32.mrf.mxu1  ;;  %v2119_v0 = vpop.f32.mrf.mxu0 }
 0x15e   : > { %v1903_v53 = vadd.f32 %v1902_v20, %v8808_v44  ;;  %v8950_v11 = vadd.f32 %v2119_v0, %v8584_v14  ;;  %v2080_v5 = vpop.f32.mrf.mxu3  ;;  %v8962_v14 = vsel %vm876_vm1, %v919_v38, %v920_v8 }
 0x15f   : > { %11942 = vst [vmem:[#allocation18_spill] sm:$0xff] %v8962_v14 }
 0x160   : > { %v1987_v37 = vadd.f32 %v1986_v49, %v1903_v53  ;;  %v11944_v49 = vld [vmem:[#allocation20_spill] sm:$0xff] }
 0x161   : > { %v2286_v0 = vpack.c.b16 %v11944_v49, %v11943_v21  ;;  %v8989_v49 = vunpack.c.l.b16 %v893_v51 }
 0x162   : > { %v8958_v6 = vadd.f32 %v8878_v61, %v1987_v37  ;;  %v925_v37 = vrot.slane %v7854_v16, 1 }
 0x163   : > { %11947 = vst [vmem:[#allocation20_spill] sm:$0xff] %v8989_v49 }
 0x164   : > { %v1991_v50 = vpop.f32.mrf.mxu2 }
 0x165   : > { %v1905_v44 = vpop.f32.mrf.mxu1  ;;  %v2122_v20 = vpop.f32.mrf.mxu0 }
 0x166   : > { %v1906_v53 = vadd.f32 %v1905_v44, %v8836_v40  ;;  %v8969_v30 = vadd.f32 %v2122_v20, %v8603_v43  ;;  %2841 = vmatmul.bf16.gmra.mxu3 %v11937_v24  ;;  %v2083_v7 = vpop.f32.mrf.mxu3  ;;  %v8979_v43 = vsel %vm876_vm1, %v925_v37, %v926_v10  ;;  %v8985_v20 = vunpack.c.l.b16 %v920_v8 }
 0x167   : > { %11945 = vst [vmem:[#allocation26_spill] sm:$0xff] %v8979_v43  ;;  %v1035_v21 = vunpack.c.l.b16 %v8979_v43 }
 0x168   : > { %v1990_v61 = vadd.f32 %v1989_v41, %v1906_v53  ;;  %2161 = vmatmul.bf16.gmra.mxu0 %v8962_v14  ;;  %2205 = vmatmul.bf16.gmra.mxu1 %v1323_v62  ;;  %11946 = vst [vmem:[#allocation79_spill] sm:$0xff] %v8985_v20 }
 0x169   : > { %2752 = vmatmul.bf16.gmra.mxu2 %v2286_v0 }
 0x16a   : > { %v8976_v3 = vadd.f32 %v8902_v18, %v1990_v61  ;;  %v968_v18 = vunpack.c.h.b16 %v8946_v9 }
 0x16c   : > { %v1994_v38 = vpop.f32.mrf.mxu2  ;;  %v1329_v8 = vpack.c.b16 %v8989_v49, %v968_v18 }
 0x16d   : > { %v1907_v40 = vpop.f32.mrf.mxu1  ;;  %v2124_v44 = vpop.f32.mrf.mxu0 }
 0x16e   : > { %v1908_v41 = vadd.f32 %v1907_v40, %v8861_v47  ;;  %v8983_v62 = vadd.f32 %v2124_v44, %v8636_v60  ;;  %v2085_v53 = vpop.f32.mrf.mxu3  ;;  %v7253_v47 = vld [vmem:[%s11511_s2 + $0xa8] sm:$0xff] }
 0x16f   : > { %v7261_v60 = vld [vmem:[%s11511_s2 + $0xe8] sm:$0xff]  ;;  %2904 = vmatpush.bf16.msra.mxu0 %v7253_v47 }
 0x170   : > { %v1992_v56 = vadd.f32 %v1991_v50, %v1908_v41  ;;  %v1370_v50 = vpack.c.b16 %v1035_v21, %v8985_v20  ;;  %2988 = vmatpush.bf16.msrb.mxu1 %v7261_v60  ;;  %v11949_v40 = vld [vmem:[#allocation35_spill] sm:$0xff]  ;;  %v11952_v21 = vld [vmem:[#allocation28_spill] sm:$0xff] }
 0x171   : > { %v11950_v44 = vunpack.c.h.b16 %v11949_v40 }
 0x172   : > { %v8992_v0 = vadd.f32 %v8916_v19, %v1992_v56  ;;  %v11948_v19 = vld [vmem:[#allocation23_spill] sm:$0xff] }
 0x173   : > { %v9005_v41 = vpack.c.b16 %v11950_v44, %v11948_v19 }
 0x174   : > { %v1996_v61 = vpop.f32.mrf.mxu2 }
 0x175   : > { %v1910_v51 = vpop.f32.mrf.mxu1  ;;  %v2127_v37 = vpop.f32.mrf.mxu0  ;;  %11951 = vst [vmem:[#allocation23_spill] sm:$0xff] %v9005_v41 }
 0x176   : > { %v1911_v56 = vadd.f32 %v1910_v51, %v8885_v59  ;;  %v9009_v24 = vadd.f32 %v2127_v37, %v8670_v36  ;;  %2846 = vmatmul.bf16.gmra.mxu3 %v9005_v41  ;;  %v11955_v37 = vld [vmem:[#allocation41_spill] sm:$0xff] }
 0x177   : > { %v9015_v47 = vpop.f32.mrf.mxu3 }
 0x178   : > { %v1995_v14 = vadd.f32 %v1994_v38, %v1911_v56  ;;  %2166 = vmatmul.bf16.gmra.mxu0 %v1370_v50  ;;  %2210 = vmatmul.bf16.gmra.mxu1 %v1329_v8  ;;  %v1039_v38 = vunpack.c.h.b16 %v8979_v43  ;;  %v9022_v50 = vunpack.c.l.b16 %v926_v10  ;;  %v11954_v8 = vld [vmem:[#allocation39_spill] sm:$0xff]  ;;  %v11958_v10 = vunpack.c.l.b16 %v11949_v40 }
 0x179   : > { %2757 = vmatmul.bf16.gmra.mxu2 %v11952_v21  ;;  %v898_v51 = vrot.slane %v11954_v8, 1 }
 0x17a   : > { %v9013_v18 = vadd.f32 %v2078_v25, %v1995_v14  ;;  %11953 = vst [vmem:[#allocation35_spill] sm:$0xff] %v9022_v50  ;;  %v899_v25 = vrot.slane %v11955_v37, 1  ;;  %v1376_v41 = vpack.c.b16 %v9022_v50, %v1039_v38  ;;  %v11962_v37 = vld [vmem:[#allocation40_spill] sm:$0xff] }
 0x17c   : > { %v1999_v60 = vpop.f32.mrf.mxu2 }
 0x17d   : > { %v1912_v20 = vpop.f32.mrf.mxu1  ;;  %v2129_v19 = vpop.f32.mrf.mxu0 }
 0x17e   : > { %v1913_v44 = vadd.f32 %v1912_v20, %v8904_v52  ;;  %v9019_v59 = vadd.f32 %v2129_v19, %v8698_v29  ;;  %v9032_v29 = vsel %vm876_vm1, %v898_v51, %v899_v25  ;;  %v11965_v51 = vld [vmem:[#allocation46_spill] sm:$0xff] }
 0x17f   : > { %v9028_v56 = vpop.f32.mrf.mxu3  ;;  %11956 = vst [vmem:[#allocation39_spill] sm:$0xff] %v9032_v29  ;;  %v904_v40 = vrot.slane %v11965_v51, 1 }
 0x180   : > { %v1997_v36 = vadd.f32 %v1996_v61, %v1913_v44  ;;  %v11957_v61 = vld [vmem:[#allocation31_spill] sm:$0xff]  ;;  %v11960_v44 = vld [vmem:[#allocation36_spill] sm:$0xff] }
 0x181   : > { %v9037_v19 = vpack.c.b16 %v11958_v10, %v11957_v61  ;;  %v11961_v8 = vunpack.c.h.b16 %v11960_v44  ;;  %v11966_v61 = vld [vmem:[#allocation47_spill] sm:$0xff] }
 0x182   : > { %v9026_v14 = vadd.f32 %v2080_v5, %v1997_v36  ;;  %v11964_v36 = vld [vmem:[#allocation70_spill] sm:$0xff]  ;;  %v905_v10 = vrot.slane %v11966_v61, 1 }
 0x183   : > { %11959 = vst [vmem:[#allocation41_spill] sm:$0xff] %v9037_v19  ;;  %v9042_v5 = vpack.c.b16 %v11962_v37, %v11961_v8 }
 0x184   : > { %v2001_v21 = vpop.f32.mrf.mxu2 }
 0x185   : > { %v1915_v52 = vpop.f32.mrf.mxu1  ;;  %v2132_v20 = vpop.f32.mrf.mxu0  ;;  %11963 = vst [vmem:[#allocation31_spill] sm:$0xff] %v9042_v5 }
 0x186   : > { %v1916_v43 = vadd.f32 %v1915_v52, %v11964_v36  ;;  %v9046_v38 = vadd.f32 %v2132_v20, %v8736_v31  ;;  %2851 = vmatmul.bf16.gmra.mxu3 %v9042_v5  ;;  %v932_v5 = vrot.slane %v8664_v39, 1  ;;  %v11972_v39 = vld [vmem:[#allocation43_spill] sm:$0xff] }
 0x188   : > { %v2000_v50 = vadd.f32 %v1999_v60, %v1916_v43  ;;  %2171 = vmatmul.bf16.gmra.mxu0 %v1376_v41  ;;  %2215 = vmatmul.bf16.gmra.mxu1 %v9032_v29  ;;  %v9055_v8 = vpop.f32.mrf.mxu3  ;;  %v9058_v43 = vsel %vm876_vm1, %v904_v40, %v905_v10  ;;  %v11968_v41 = vld [vmem:[#allocation73_spill] sm:$0xff] }
 0x189   : > { %2762 = vmatmul.bf16.gmra.mxu2 %v9037_v19  ;;  %11967 = vst [vmem:[#allocation36_spill] sm:$0xff] %v9058_v43  ;;  %v9064_v19 = vunpack.c.l.b16 %v899_v25  ;;  %v988_v61 = vunpack.c.l.b16 %v9058_v43 }
 0x18a   : > { %v9053_v49 = vadd.f32 %v2083_v7, %v2000_v50  ;;  %v7252_v7 = vld [vmem:[%s11511_s2 + $0xa0] sm:$0xff]  ;;  %v931_v50 = vrot.slane %v8089_v32, 1  ;;  %v11971_v32 = vunpack.c.l.b16 %v11960_v44  ;;  %v1199_v44 = vrot.slane %v7886_v28, 1 }
 0x18b   : > { %11969 = vst [vmem:[#allocation40_spill] sm:$0xff] %v9064_v19  ;;  %2905 = vmatpush.bf16.msra.mxu0 %v7252_v7 }
 0x18c   : > { %v2004_v52 = vpop.f32.mrf.mxu2 }
 0x18d   : > { %v1917_v37 = vpop.f32.mrf.mxu1  ;;  %v2134_v31 = vpop.f32.mrf.mxu0 }
 0x18e   : > { %v1918_v60 = vadd.f32 %v1917_v37, %v11968_v41  ;;  %v9062_v20 = vadd.f32 %v2134_v31, %v8774_v17  ;;  %v7260_v17 = vld [vmem:[%s11511_s2 + $0xe0] sm:$0xff] }
 0x18f   : > { %2989 = vmatpush.bf16.msrb.mxu1 %v7260_v17 }
 0x190   : > { %v2002_v36 = vadd.f32 %v2001_v21, %v1918_v60  ;;  %v9074_v37 = vpop.f32.mrf.mxu3  ;;  %v1339_v21 = vpack.c.b16 %v988_v61, %v9064_v19  ;;  %v9081_v60 = vsel %vm876_vm1, %v931_v50, %v932_v5  ;;  %v7251_v61 = vld [vmem:[%s11511_s2 + $0x98] sm:$0xff]  ;;  %v1200_v50 = vrot.slane %v8692_v63, 1 }
 0x191   : > { %11970 = vst [vmem:[#allocation70_spill] sm:$0xff] %v9081_v60  ;;  %2906 = vmatpush.bf16.msra.mxu0 %v7251_v61  ;;  %v7249_v61 = vld [vmem:[%s11511_s2 + $0x88] sm:$0xff] }
 0x192   : > { %v9072_v40 = vadd.f32 %v2085_v53, %v2002_v36  ;;  %v9086_v53 = vpack.c.b16 %v11972_v39, %v11971_v32  ;;  %v11974_v36 = vld [vmem:[#allocation81_spill] sm:$0xff]  ;;  %v9109_v39 = vsel %vm876_vm1, %v1199_v44, %v1200_v50 }
 0x193   : > { %11975 = vst [vmem:[#allocation73_spill] sm:$0xff] %v9109_v39  ;;  %v1207_v28 = vunpack.c.l.b16 %v9109_v39 }
 0x194   : > { %v2006_v25 = vpop.f32.mrf.mxu2  ;;  %11973 = vst [vmem:[#allocation47_spill] sm:$0xff] %v9086_v53 }
 0x195   : > { %v1920_v31 = vpop.f32.mrf.mxu1  ;;  %v2137_v41 = vpop.f32.mrf.mxu0 }
 0x196   : > { %v1921_v7 = vadd.f32 %v1920_v31, %v11974_v36  ;;  %v9090_v29 = vadd.f32 %v2137_v41, %v8803_v33  ;;  %2856 = vmatmul.bf16.gmra.mxu3 %v11965_v51  ;;  %v7250_v33 = vld [vmem:[%s11511_s2 + $0x90] sm:$0xff]  ;;  %v992_v51 = vunpack.c.h.b16 %v9058_v43 }
 0x197   : > { %v11976_v36 = vld [vmem:[#allocation84_spill] sm:$0xff]  ;;  %2907 = vmatpush.bf16.msra.mxu0 %v7250_v33 }
 0x198   : > { %v2005_v17 = vadd.f32 %v2004_v52, %v1921_v7  ;;  %2176 = vmatmul.bf16.gmra.mxu0 %v9081_v60  ;;  %2220 = vmatmul.bf16.gmra.mxu1 %v1339_v21  ;;  %v9122_v60 = vunpack.c.l.b16 %v905_v10  ;;  %v11980_v10 = vld [vmem:[#allocation53_spill] sm:$0xff] }
 0x199   : > { %2767 = vmatmul.bf16.gmra.mxu2 %v9086_v53  ;;  %v9106_v41 = vpop.f32.mrf.mxu3  ;;  %v11981_v53 = vunpack.c.h.b16 %v11980_v10 }
 0x19a   : > { %v9101_v31 = vadd.f32 %v9015_v47, %v2005_v17  ;;  %v9115_v47 = vunpack.c.l.b16 %v932_v5  ;;  %11978 = vst [vmem:[#allocation81_spill] sm:$0xff] %v9122_v60  ;;  %v1345_v33 = vpack.c.b16 %v9122_v60, %v992_v51 }
 0x19b   : > { %2908 = vmatpush.bf16.msra.mxu0 %v7249_v61 }
 0x19c   : > { %v2009_v52 = vpop.f32.mrf.mxu2  ;;  %11977 = vst [vmem:[#allocation43_spill] sm:$0xff] %v9115_v47  ;;  %v1386_v5 = vpack.c.b16 %v1207_v28, %v9115_v47 }
 0x19d   : > { %v1922_v21 = vpop.f32.mrf.mxu1  ;;  %v2139_v32 = vpop.f32.mrf.mxu0 }
 0x19e   : > { %v1923_v63 = vadd.f32 %v1922_v21, %v11976_v36  ;;  %v9113_v7 = vadd.f32 %v2139_v32, %v8829_v46  ;;  %v7248_v46 = vld [vmem:[%s11511_s2 + $0x80] sm:$0xff] }
 0x19f   : > { %2909 = vmatpush.bf16.msra.mxu0 %v7248_v46  ;;  %v1211_v46 = vunpack.c.h.b16 %v9109_v39  ;;  %v11991_v39 = vld [vmem:[#allocation50_spill] sm:$0xff] }
 0x1a0   : > { %v2007_v17 = vadd.f32 %v2006_v25, %v1923_v63  ;;  %v11979_v63 = vld [vmem:[#allocation44_spill] sm:$0xff] }
 0x1a1   : > { %v9132_v25 = vpop.f32.mrf.mxu3  ;;  %v9137_v43 = vpack.c.b16 %v11981_v53, %v11979_v63 }
 0x1a2   : > { %v9125_v44 = vadd.f32 %v9028_v56, %v2007_v17  ;;  %v11983_v56 = vld [vmem:[#allocation88_spill] sm:$0xff] }
 0x1a3   : > { %11982 = vst [vmem:[#allocation84_spill] sm:$0xff] %v9137_v43 }
 0x1a4   : > { %v2011_v21 = vpop.f32.mrf.mxu2 }
 0x1a5   : > { %v1925_v32 = vpop.f32.mrf.mxu1  ;;  %v2142_v36 = vpop.f32.mrf.mxu0 }
 0x1a6   : > { %v1926_v61 = vadd.f32 %v1925_v32, %v11983_v56  ;;  %v9141_v17 = vadd.f32 %v2142_v36, %v8857_v34  ;;  %2861 = vmatmul.bf16.gmra.mxu3 %v9137_v43  ;;  %v11985_v32 = vld [vmem:[#allocation93_spill] sm:$0xff] }
 0x1a7   : > { %v11989_v36 = vld [vmem:[#allocation61_spill] sm:$0xff] }
 0x1a8   : > { %11984 = vst [vmem:[#allocation44_spill] sm:$0xff] %v9141_v17  ;;  %v2010_v19 = vadd.f32 %v2009_v52, %v1926_v61  ;;  %2181 = vmatmul.bf16.gmra.mxu0 %v1386_v5  ;;  %2225 = vmatmul.bf16.gmra.mxu1 %v1345_v33  ;;  %v9155_v5 = vunpack.c.l.b16 %v1200_v50  ;;  %v911_v61 = vrot.slane %v11989_v36, 1  ;;  %v515_v50 = vunpack.c.l.b16 %v8890_v15 }
 0x1a9   : > { %2772 = vmatmul.bf16.gmra.mxu2 %v8205_v45  ;;  %v9148_v47 = vpop.f32.mrf.mxu3 }
 0x1aa   : > { %v9146_v28 = vadd.f32 %v9055_v8, %v2010_v19  ;;  %11987 = vst [vmem:[#allocation88_spill] sm:$0xff] %v9155_v5  ;;  %v7259_v19 = vld [vmem:[%s11511_s2 + $0xd8] sm:$0xff]  ;;  %v11988_v8 = vld [vmem:[#allocation58_spill] sm:$0xff] }
 0x1ab   : > { %v910_v33 = vrot.slane %v11988_v8, 1  ;;  %2990 = vmatpush.bf16.msrb.mxu1 %v7259_v19  ;;  %v11992_v8 = vunpack.c.l.b16 %v11980_v10  ;;  %v11996_v19 = vld [vmem:[#allocation59_spill] sm:$0xff] }
 0x1ac   : > { %v2014_v51 = vpop.f32.mrf.mxu2 }
 0x1ad   : > { %v1927_v53 = vpop.f32.mrf.mxu1  ;;  %v2144_v63 = vpop.f32.mrf.mxu0  ;;  %v9175_v36 = vpack.c.b16 %v11992_v8, %v11991_v39  ;;  %v12001_v39 = vld [vmem:[#allocation64_spill] sm:$0xff]  ;;  %v12002_v8 = vld [vmem:[#allocation65_spill] sm:$0xff] }
 0x1ae   : > { %v1928_v56 = vadd.f32 %v1927_v53, %v11985_v32  ;;  %v9152_v34 = vadd.f32 %v2144_v63, %v8874_v55  ;;  %v1392_v55 = vpack.c.b16 %v9155_v5, %v1211_v46  ;;  %v11998_v46 = vld [vmem:[#allocation72_spill] sm:$0xff]  ;;  %v916_v10 = vrot.slane %v12001_v39, 1 }
 0x1af   : > { %11993 = vst [vmem:[#allocation58_spill] sm:$0xff] %v9175_v36 }
 0x1b0   : > { %11986 = vst [vmem:[#allocation53_spill] sm:$0xff] %v9152_v34  ;;  %v2012_v52 = vadd.f32 %v2011_v21, %v1928_v56  ;;  %v9170_v56 = vsel %vm876_vm1, %v910_v33, %v911_v61  ;;  %v12000_v33 = vunpack.c.l.b16 %v8871_v13 }
 0x1b1   : > { %v9166_v21 = vpop.f32.mrf.mxu3  ;;  %11990 = vst [vmem:[#allocation93_spill] sm:$0xff] %v9170_v56 }
 0x1b2   : > { %v9163_v43 = vadd.f32 %v9074_v37, %v2012_v52  ;;  %v11994_v37 = vld [vmem:[#allocation54_spill] sm:$0xff]  ;;  %v9189_v9 = vpack.c.b16 %v515_v50, %v12000_v33  ;;  %v577_v50 = vshrl.u32 %v8887_v26, 16  ;;  %v12004_v33 = vld [vmem:[#allocation80_spill] sm:$0xff] }
 0x1b3   : > { %v11995_v52 = vunpack.c.h.b16 %v11994_v37 }
 0x1b4   : > { %v2016_v53 = vpop.f32.mrf.mxu2 }
 0x1b5   : > { %v1930_v63 = vpop.f32.mrf.mxu1  ;;  %v2147_v32 = vpop.f32.mrf.mxu0  ;;  %v9180_v45 = vpack.c.b16 %v11996_v19, %v11995_v52  ;;  %v917_v52 = vrot.slane %v12002_v8, 1  ;;  %v579_v19 = vshll.u32 %v8887_v26, 16 }
 0x1b6   : > { %v1931_v5 = vadd.f32 %v1930_v63, %v11998_v46  ;;  %v9184_v60 = vadd.f32 %v2147_v32, %v8900_v1  ;;  %v584_v46 = vshll.u32 %v9189_v9, 16 }
 0x1b7   : > { %11997 = vst [vmem:[#allocation61_spill] sm:$0xff] %v9180_v45  ;;  %2866 = vmatmul.bf16.gmra.mxu3 %v9180_v45  ;;  %v9200_v13 = vsel %vm876_vm1, %v916_v10, %v917_v52  ;;  %v581_v32 = vrot.slane %v579_v19, 1 }
 0x1b8   : > { %11999 = vst [vmem:[#allocation50_spill] sm:$0xff] %v9184_v60  ;;  %v2015_v15 = vadd.f32 %v2014_v51, %v1931_v5  ;;  %2186 = vmatmul.bf16.gmra.mxu0 %v1392_v55  ;;  %2230 = vmatmul.bf16.gmra.mxu1 %v9170_v56  ;;  %v586_v48 = vrot.slane %v584_v46, 1 }
 0x1b9   : > { %2777 = vmatmul.bf16.gmra.mxu2 %v9175_v36  ;;  %v2827_v5 = vpop.f32.mrf.mxu3  ;;  %12003 = vst [vmem:[#allocation54_spill] sm:$0xff] %v9200_v13  ;;  %v582_v56 = vor.u32 %v581_v32, %v577_v50 }
 0x1ba   : > { %v9197_v1 = vadd.f32 %v9106_v41, %v2015_v15  ;;  %v9208_v41 = vunpack.c.l.b16 %v911_v61  ;;  %v1012_v15 = vunpack.c.l.b16 %v9200_v13 }
 0x1bc   : > { %v2019_v51 = vpop.f32.mrf.mxu2  ;;  %v1355_v60 = vpack.c.b16 %v1012_v15, %v9208_v41  ;;  %v12009_v15 = vld [vmem:[#allocation87_spill] sm:$0xff] }
 0x1bd   : > { %v1932_v55 = vpop.f32.mrf.mxu1  ;;  %v2149_v63 = vpop.f32.mrf.mxu0 }
 0x1be   : > { %v1933_v8 = vadd.f32 %v1932_v55, %v12004_v33  ;;  %v9206_v36 = vadd.f32 %v2149_v63, %v8914_v22  ;;  %v587_v55 = vsel %vm575_vm0, %v582_v56, %v586_v48  ;;  %v12005_v22 = vunpack.c.l.b16 %v11994_v37  ;;  %v12008_v63 = vld [vmem:[#allocation83_spill] sm:$0xff] }
 0x1c0   : > { %v2017_v45 = vadd.f32 %v2016_v53, %v1933_v8  ;;  %v12006_v53 = vld [vmem:[#allocation62_spill] sm:$0xff] }
 0x1c1   : > { %v2829_v26 = vpop.f32.mrf.mxu3  ;;  %v9219_v61 = vpack.c.b16 %v12006_v53, %v12005_v22  ;;  %v9240_v53 = vunpack.c.l.b16 %v917_v52 }
 0x1c2   : > { %v9212_v10 = vadd.f32 %v9132_v25, %v2017_v45  ;;  %v600_v25 = vshrl.u32 %v9189_v9, 16 }
 0x1c3   : > { %12007 = vst [vmem:[#allocation59_spill] sm:$0xff] %v9219_v61 }
 0x1c4   : > { %v2021_v19 = vpop.f32.mrf.mxu2  ;;  %v602_v32 = vor.u32 %v600_v25, %v586_v48  ;;  %12011 = vst [vmem:[#allocation72_spill] sm:$0xff] %v9240_v53 }
 0x1c5   : > { %v1935_v34 = vpop.f32.mrf.mxu1  ;;  %v2152_v17 = vpop.f32.mrf.mxu0 }
 0x1c6   : > { %v1936_v33 = vadd.f32 %v1935_v34, %v12008_v63  ;;  %v9223_v50 = vadd.f32 %v2152_v17, %v8943_v35  ;;  %v945_v48 = vunpack.c.l.b16 %v602_v32 }
 0x1c7   : > { %2871 = vmatmul.bf16.gmra.mxu3 %v12001_v39 }
 0x1c8   : > { %v2020_v45 = vadd.f32 %v2019_v51, %v1936_v33  ;;  %2235 = vmatmul.bf16.gmra.mxu1 %v1355_v60  ;;  %2910 = vmatmul.bf16.vlgmr.msra.gmra.mxu0 %v587_v55  ;;  %v7258_v60 = vld [vmem:[%s11511_s2 + $0xd0] sm:$0xff]  ;;  %v12010_v51 = vld [vmem:[#allocation33_spill] sm:$0xff] }
 0x1c9   : > { %2782 = vmatmul.bf16.gmra.mxu2 %v9219_v61  ;;  %v2832_v46 = vpop.f32.mrf.mxu3  ;;  %v949_v55 = vunpack.c.l.b16 %v12010_v51  ;;  %2991 = vmatpush.bf16.msrb.mxu1 %v7258_v60 }
 0x1ca   : > { %v9229_v56 = vadd.f32 %v9148_v47, %v2020_v45  ;;  %v1016_v47 = vunpack.c.h.b16 %v9200_v13 }
 0x1cc   : > { %v2743_v37 = vpop.f32.mrf.mxu2  ;;  %v1361_v33 = vpack.c.b16 %v9240_v53, %v1016_v47 }
 0x1cd   : > { %v1937_v8 = vpop.f32.mrf.mxu1  ;;  %v2154_v34 = vpop.f32.mrf.mxu0 }
 0x1ce   : > { %v1938_v35 = vadd.f32 %v1937_v8, %v12009_v15  ;;  %v9233_v17 = vadd.f32 %v2154_v34, %v8958_v6  ;;  %v2282_v6 = vpack.c.b16 %v949_v55, %v945_v48  ;;  %v12012_v15 = vld [vmem:[#allocation74_spill] sm:$0xff] }
 0x1cf   : > { %v12013_v39 = vunpack.c.h.b16 %v12012_v15  ;;  %v12015_v48 = vld [vmem:[#allocation86_spill] sm:$0xff] }
 0x1d0   : > { %v2022_v22 = vadd.f32 %v2021_v19, %v1938_v35 }
 0x1d1   : > { %v2834_v25 = vpop.f32.mrf.mxu3  ;;  %v9249_v19 = vpack.c.b16 %v12013_v39, %v8325_v4 }
 0x1d2   : > { %v9243_v63 = vadd.f32 %v9166_v21, %v2022_v22 }
 0x1d3   : > { %12014 = vst [vmem:[#allocation65_spill] sm:$0xff] %v9249_v19 }
 0x1d4   : > { %v2745_v45 = vpop.f32.mrf.mxu2 }
 0x1d5   : > { %v2157_v8 = vpop.f32.mrf.mxu0  ;;  %v2201_v34 = vpop.f32.mrf.mxu1 }
 0x1d6   : > { %v9252_v52 = vadd.f32 %v2157_v8, %v8976_v3  ;;  %v2202_v32 = vadd.f32 %v2201_v34, %v8934_v58  ;;  %v953_v58 = vunpack.c.h.b16 %v12010_v51  ;;  %v12020_v51 = vunpack.c.l.b16 %v12012_v15 }
 0x1d7   : > { %2876 = vmatmul.bf16.gmra.mxu3 %v9249_v19 }
 0x1d8   : > { %v2744_v35 = vadd.f32 %v2743_v37, %v2202_v32  ;;  %2240 = vmatmul.bf16.gmra.mxu1 %v1361_v33  ;;  %2915 = vmatmul.bf16.gmra.mxu0 %v2282_v6  ;;  %v922_v37 = vrot.slane %v8452_v2, 1  ;;  %v923_v33 = vrot.slane %v12015_v48, 1  ;;  %v12022_v2 = vld [vmem:[#allocation75_spill] sm:$0xff] }
 0x1d9   : > { %2787 = vmatmul.bf16.gmra.mxu2 %v8349_v57  ;;  %v2837_v55 = vpop.f32.mrf.mxu3  ;;  %v12027_v48 = vld [vmem:[#allocation91_spill] sm:$0xff] }
 0x1da   : > { %v9257_v21 = vadd.f32 %v2827_v5, %v2744_v35  ;;  %v12016_v5 = vld [vmem:[#allocation37_spill] sm:$0xff] }
 0x1db   : > { %v12017_v8 = vunpack.c.l.b16 %v12016_v5  ;;  %v929_v5 = vrot.slane %v12027_v48, 1 }
 0x1dc   : > { %v2748_v60 = vpop.f32.mrf.mxu2 }
 0x1dd   : > { %v2159_v22 = vpop.f32.mrf.mxu0  ;;  %v2203_v47 = vpop.f32.mrf.mxu1  ;;  %v2288_v34 = vpack.c.b16 %v12017_v8, %v953_v58 }
 0x1de   : > { %v9260_v4 = vadd.f32 %v2159_v22, %v8992_v0  ;;  %v2204_v3 = vadd.f32 %v2203_v47, %v8950_v11  ;;  %v9271_v0 = vsel %vm876_vm1, %v922_v37, %v923_v33  ;;  %v12019_v11 = vld [vmem:[#allocation67_spill] sm:$0xff]  ;;  %v12023_v22 = vunpack.c.h.b16 %v12022_v2  ;;  %v12024_v47 = vld [vmem:[#allocation82_spill] sm:$0xff] }
 0x1df   : > { %12018 = vst [vmem:[#allocation80_spill] sm:$0xff] %v9271_v0  ;;  %v12026_v37 = vld [vmem:[#allocation11_spill] sm:$0xff] }
 0x1e0   : > { %v2746_v39 = vadd.f32 %v2745_v45, %v2204_v3  ;;  %v9276_v45 = vpack.c.b16 %v12020_v51, %v12019_v11  ;;  %v928_v15 = vrot.slane %v12026_v37, 1 }
 0x1e1   : > { %v2839_v35 = vpop.f32.mrf.mxu3 }
 0x1e2   : > { %v9266_v6 = vadd.f32 %v2829_v26, %v2746_v39  ;;  %12021 = vst [vmem:[#allocation62_spill] sm:$0xff] %v9276_v45  ;;  %v9281_v26 = vpack.c.b16 %v12024_v47, %v12023_v22 }
 0x1e4   : > { %v2750_v32 = vpop.f32.mrf.mxu2  ;;  %12025 = vst [vmem:[#allocation83_spill] sm:$0xff] %v9281_v26 }
 0x1e5   : > { %v2162_v19 = vpop.f32.mrf.mxu0  ;;  %v2206_v57 = vpop.f32.mrf.mxu1 }
 0x1e6   : > { %v9284_v3 = vadd.f32 %v2162_v19, %v9013_v18  ;;  %v2207_v58 = vadd.f32 %v2206_v57, %v8969_v30  ;;  %v7257_v18 = vld [vmem:[%s11511_s2 + $0xc8] sm:$0xff] }
 0x1e7   : > { %2881 = vmatmul.bf16.gmra.mxu3 %v9281_v26  ;;  %2992 = vmatpush.bf16.msrb.mxu1 %v7257_v18 }
 0x1e8   : > { %v2749_v39 = vadd.f32 %v2748_v60, %v2207_v58  ;;  %2245 = vmatmul.bf16.gmra.mxu1 %v9271_v0  ;;  %2920 = vmatmul.bf16.gmra.mxu0 %v2288_v34  ;;  %v9298_v34 = vsel %vm876_vm1, %v928_v15, %v929_v5 }
 0x1e9   : > { %2792 = vmatmul.bf16.gmra.mxu2 %v9276_v45  ;;  %v2842_v57 = vpop.f32.mrf.mxu3  ;;  %12028 = vst [vmem:[#allocation87_spill] sm:$0xff] %v9298_v34  ;;  %v1036_v47 = vunpack.c.l.b16 %v9298_v34  ;;  %v12030_v45 = vunpack.c.l.b16 %v12022_v2 }
 0x1ea   : > { %v9292_v8 = vadd.f32 %v2832_v46, %v2749_v39  ;;  %v9304_v46 = vunpack.c.l.b16 %v923_v33 }
 0x1ec   : > { %v2753_v19 = vpop.f32.mrf.mxu2  ;;  %12029 = vst [vmem:[#allocation33_spill] sm:$0xff] %v9304_v46  ;;  %v1371_v39 = vpack.c.b16 %v1036_v47, %v9304_v46 }
 0x1ed   : > { %v2164_v30 = vpop.f32.mrf.mxu0  ;;  %v2208_v60 = vpop.f32.mrf.mxu1 }
 0x1ee   : > { %v9301_v11 = vadd.f32 %v2164_v30, %v9026_v14  ;;  %v2209_v51 = vadd.f32 %v2208_v60, %v8983_v62  ;;  %v12031_v14 = vld [vmem:[#allocation15_spill] sm:$0xff] }
 0x1ef   : > { %v9315_v30 = vpack.c.b16 %v12031_v14, %v12030_v45 }
 0x1f0   : > { %v2751_v22 = vadd.f32 %v2750_v32, %v2209_v51 }
 0x1f1   : > { %v9310_v18 = vpop.f32.mrf.mxu3  ;;  %12032 = vst [vmem:[#allocation74_spill] sm:$0xff] %v9315_v30 }
 0x1f2   : > { %v9307_v58 = vadd.f32 %v2834_v25, %v2751_v22  ;;  %v12033_v25 = vld [vmem:[#allocation38_spill] sm:$0xff] }
 0x1f4   : > { %v2755_v48 = vpop.f32.mrf.mxu2 }
 0x1f5   : > { %v2167_v26 = vpop.f32.mrf.mxu0  ;;  %v2211_v15 = vpop.f32.mrf.mxu1 }
 0x1f6   : > { %v9318_v62 = vadd.f32 %v2167_v26, %v9053_v49  ;;  %v2212_v33 = vadd.f32 %v2211_v15, %v9009_v24  ;;  %v12034_v26 = vld [vmem:[#allocation52_spill] sm:$0xff]  ;;  %v9334_v15 = vunpack.c.l.b16 %v929_v5  ;;  %v12039_v5 = vld [vmem:[#allocation29_spill] sm:$0xff] }
 0x1f7   : > { %2886 = vmatmul.bf16.gmra.mxu3 %v12026_v37  ;;  %v7279_v37 = vld [vmem:[%s11511_s2 + $0x178] sm:$0xff] }
 0x1f8   : > { %v2754_v32 = vadd.f32 %v2753_v19, %v2212_v33  ;;  %2250 = vmatmul.bf16.gmra.mxu1 %v1371_v39  ;;  %2925 = vmatmul.bf16.gmra.mxu0 %v12033_v25  ;;  %v973_v19 = vunpack.c.l.b16 %v12034_v26  ;;  %v1040_v39 = vunpack.c.h.b16 %v9298_v34  ;;  %12035 = vst [vmem:[#allocation86_spill] sm:$0xff] %v9334_v15  ;;  %v12061_v25 = vld [vmem:[#allocation56_spill] sm:$0xff] }
 0x1f9   : > { %2797 = vmatmul.bf16.gmra.mxu2 %v9315_v30  ;;  %v9326_v2 = vpop.f32.mrf.mxu3  ;;  %3154 = vmatpush.bf16.msra.mxu3 %v7279_v37  ;;  %v7269_v37 = vld [vmem:[%s11511_s2 + $0x128] sm:$0xff] }
 0x1fa   : > { %v9324_v60 = vadd.f32 %v2837_v55, %v2754_v32  ;;  %v7271_v55 = vld [vmem:[%s11511_s2 + $0x138] sm:$0xff]  ;;  %v1377_v33 = vpack.c.b16 %v9334_v15, %v1040_v39  ;;  %v12036_v32 = vld [vmem:[#allocation42_spill] sm:$0xff] }
 0x1fb   : > { %3070 = vmatpush.bf16.msrb.mxu2 %v7271_v55  ;;  %v12066_v15 = vld [vmem:[#allocation17_spill] sm:$0xff] }
 0x1fc   : > { %v2758_v51 = vpop.f32.mrf.mxu2 }
 0x1fd   : > { %v2169_v45 = vpop.f32.mrf.mxu0  ;;  %v2213_v22 = vpop.f32.mrf.mxu1 }
 0x1fe   : > { %v9329_v49 = vadd.f32 %v2169_v45, %v9072_v40  ;;  %v2214_v24 = vadd.f32 %v2213_v22, %v9019_v59  ;;  %v12037_v40 = vunpack.c.l.b16 %v12036_v32  ;;  %v7270_v32 = vld [vmem:[%s11511_s2 + $0x130] sm:$0xff] }
 0x1ff   : > { %3071 = vmatpush.bf16.msrb.mxu2 %v7270_v32  ;;  %v977_v32 = vunpack.c.h.b16 %v12034_v26 }
 0x200   : > { %v2756_v47 = vadd.f32 %v2755_v48, %v2214_v24  ;;  %v9344_v45 = vpack.c.b16 %v973_v19, %v12037_v40 }
 0x201   : > { %v9346_v22 = vpop.f32.mrf.mxu3 }
 0x202   : > { %v9336_v14 = vadd.f32 %v2839_v35, %v2756_v47  ;;  %12038 = vst [vmem:[#allocation37_spill] sm:$0xff] %v9344_v45  ;;  %v12040_v35 = vunpack.c.h.b16 %v12039_v5 }
 0x203   : > { %3072 = vmatpush.bf16.msrb.mxu2 %v7269_v37  ;;  %v12043_v37 = vld [vmem:[#allocation55_spill] sm:$0xff] }
 0x204   : > { %v2760_v59 = vpop.f32.mrf.mxu2  ;;  %v9351_v47 = vpack.c.b16 %v12040_v35, %v8490_v12  ;;  %v7278_v12 = vld [vmem:[%s11511_s2 + $0x170] sm:$0xff]  ;;  %v12044_v26 = vunpack.c.l.b16 %v12043_v37 }
 0x205   : > { %v2172_v48 = vpop.f32.mrf.mxu0  ;;  %v2216_v24 = vpop.f32.mrf.mxu1  ;;  %3155 = vmatpush.bf16.msra.mxu3 %v7278_v12  ;;  %v934_v12 = vrot.slane %v8616_v54, 1 }
 0x206   : > { %12041 = vst [vmem:[#allocation67_spill] sm:$0xff] %v9351_v47  ;;  %v9357_v39 = vadd.f32 %v2172_v48, %v9101_v31  ;;  %v2217_v19 = vadd.f32 %v2216_v24, %v9046_v38  ;;  %v7256_v38 = vld [vmem:[%s11511_s2 + $0xc0] sm:$0xff] }
 0x207   : > { %2891 = vmatmul.bf16.gmra.mxu3 %v9351_v47  ;;  %2993 = vmatpush.bf16.msrb.mxu1 %v7256_v38  ;;  %v12042_v38 = vld [vmem:[#allocation103_spill] sm:$0xff] }
 0x208   : > { %v2759_v55 = vadd.f32 %v2758_v51, %v2217_v19  ;;  %2255 = vmatmul.bf16.gmra.mxu1 %v1377_v33  ;;  %2930 = vmatmul.bf16.gmra.mxu0 %v9344_v45  ;;  %v7268_v19 = vld [vmem:[%s11511_s2 + $0x120] sm:$0xff]  ;;  %v935_v47 = vrot.slane %v12042_v38, 1 }
 0x209   : > { %2802 = vmatmul.bf16.gmra.mxu2 %v7854_v16  ;;  %v9377_v33 = vpop.f32.mrf.mxu3 }
 0x20a   : > { %v9369_v31 = vadd.f32 %v2842_v57, %v2759_v55  ;;  %v7277_v57 = vld [vmem:[%s11511_s2 + $0x168] sm:$0xff]  ;;  %3073 = vmatpush.bf16.msrb.mxu2 %v7268_v19  ;;  %v9408_v38 = vsel %vm876_vm1, %v934_v12, %v935_v47  ;;  %v12048_v19 = vunpack.c.l.b16 %v12039_v5  ;;  %v7266_v5 = vld [vmem:[%s11511_s2 + $0x110] sm:$0xff] }
 0x20b   : > { %3156 = vmatpush.bf16.msra.mxu3 %v7277_v57  ;;  %12046 = vst [vmem:[#allocation82_spill] sm:$0xff] %v9408_v38 }
 0x20c   : > { %v2763_v51 = vpop.f32.mrf.mxu2 }
 0x20d   : > { %v2174_v40 = vpop.f32.mrf.mxu0  ;;  %v2218_v48 = vpop.f32.mrf.mxu1 }
 0x20e   : > { %v9383_v24 = vadd.f32 %v2174_v40, %v9125_v44  ;;  %v2219_v35 = vadd.f32 %v2218_v48, %v9062_v20  ;;  %v7276_v44 = vld [vmem:[%s11511_s2 + $0x160] sm:$0xff]  ;;  %v7267_v20 = vld [vmem:[%s11511_s2 + $0x118] sm:$0xff] }
 0x20f   : > { %3157 = vmatpush.bf16.msra.mxu3 %v7276_v44  ;;  %v12050_v44 = vld [vmem:[#allocation30_spill] sm:$0xff]  ;;  %3074 = vmatpush.bf16.msrb.mxu2 %v7267_v20 }
 0x210   : > { %v2761_v55 = vadd.f32 %v2760_v59, %v2219_v35  ;;  %v9403_v59 = vpack.c.b16 %v12044_v26, %v977_v32  ;;  %v12051_v16 = vunpack.c.h.b16 %v12050_v44  ;;  %v7275_v32 = vld [vmem:[%s11511_s2 + $0x158] sm:$0xff] }
 0x211   : > { %v9405_v48 = vpop.f32.mrf.mxu3 }
 0x212   : > { %v9396_v40 = vadd.f32 %v9310_v18, %v2761_v55  ;;  %12045 = vst [vmem:[#allocation75_spill] sm:$0xff] %v9403_v59  ;;  %v12047_v18 = vld [vmem:[#allocation21_spill] sm:$0xff]  ;;  %v9418_v45 = vpack.c.b16 %v8609_v27, %v12051_v16  ;;  %v12053_v16 = vld [vmem:[#allocation14_spill] sm:$0xff] }
 0x213   : > { %v9413_v55 = vpack.c.b16 %v12048_v19, %v12047_v18  ;;  %3158 = vmatpush.bf16.msra.mxu3 %v7275_v32  ;;  %v1202_v27 = vrot.slane %v12053_v16, 1  ;;  %3075 = vmatpush.bf16.msrb.mxu2 %v7266_v5  ;;  %v7273_v32 = vld [vmem:[%s11511_s2 + $0x148] sm:$0xff]  ;;  %v7264_v5 = vld [vmem:[%s11511_s2 + $0x100] sm:$0xff] }
 0x214   : > { %v2765_v54 = vpop.f32.mrf.mxu2  ;;  %12052 = vst [vmem:[#allocation15_spill] sm:$0xff] %v9418_v45  ;;  %v7272_v16 = vld [vmem:[%s11511_s2 + $0x140] sm:$0xff] }
 0x215   : > { %v2177_v57 = vpop.f32.mrf.mxu0  ;;  %v2221_v35 = vpop.f32.mrf.mxu1  ;;  %12049 = vst [vmem:[#allocation91_spill] sm:$0xff] %v9413_v55 }
 0x216   : > { %v9424_v37 = vadd.f32 %v2177_v57, %v9146_v28  ;;  %v2222_v12 = vadd.f32 %v2221_v35, %v9090_v29  ;;  %v1203_v28 = vrot.slane %v8667_v42, 1  ;;  %v7274_v29 = vld [vmem:[%s11511_s2 + $0x150] sm:$0xff] }
 0x217   : > { %2896 = vmatmul.bf16.gmra.mxu3 %v9418_v45  ;;  %v12057_v45 = vunpack.c.l.b16 %v12050_v44 }
 0x218   : > { %v2764_v26 = vadd.f32 %v2763_v51, %v2222_v12  ;;  %2260 = vmatmul.bf16.gmra.mxu1 %v9408_v38  ;;  %2935 = vmatmul.bf16.gmra.mxu0 %v9403_v59  ;;  %v7265_v51 = vld [vmem:[%s11511_s2 + $0x108] sm:$0xff]  ;;  %v9448_v19 = vsel %vm876_vm1, %v1202_v27, %v1203_v28 }
 0x219   : > { %2807 = vmatmul.bf16.gmra.mxu2 %v9413_v55  ;;  %3159 = vmatpush.bf16.msra.mxu3 %v7274_v29  ;;  %v9445_v35 = vpop.f32.mrf.mxu3  ;;  %12054 = vst [vmem:[#allocation52_spill] sm:$0xff] %v9448_v19  ;;  %v9460_v29 = vunpack.c.l.b16 %v935_v47  ;;  %v1208_v27 = vunpack.c.l.b16 %v9448_v19  ;;  %v12058_v55 = vld [vmem:[#allocation16_spill] sm:$0xff] }
 0x21a   : > { %v9440_v20 = vadd.f32 %v9326_v2, %v2764_v26  ;;  %3076 = vmatpush.bf16.msrb.mxu2 %v7265_v51  ;;  %v12056_v51 = vld [vmem:[#allocation121_spill] sm:$0xff]  ;;  %v9477_v59 = vpack.c.b16 %v12058_v55, %v12057_v45 }
 0x21b   : > { %12055 = vst [vmem:[#allocation42_spill] sm:$0xff] %v9460_v29  ;;  %v7343_v45 = vld [vmem:[%s11511_s2 + $0x378] sm:$0xff] }
 0x21c   : > { %v2768_v57 = vpop.f32.mrf.mxu2  ;;  %12059 = vst [vmem:[#allocation29_spill] sm:$0xff] %v9477_v59  ;;  %3805 = vmatpush.bf16.msra.mxu1 %v7343_v45  ;;  %v12065_v45 = vld [vmem:[#allocation120_spill] sm:$0xff] }
 0x21d   : > { %v2179_v18 = vpop.f32.mrf.mxu0  ;;  %v2223_v42 = vpop.f32.mrf.mxu1  ;;  %3160 = vmatpush.bf16.msra.mxu3 %v7273_v32 }
 0x21e   : > { %v9454_v2 = vadd.f32 %v2179_v18, %v9163_v43  ;;  %v2224_v12 = vadd.f32 %v2223_v42, %v9113_v7  ;;  %3077 = vmatpush.bf16.msrb.mxu2 %v7264_v5  ;;  %v880_v7 = vrot.slane %v8843_v23, 1  ;;  %v881_v18 = vrot.slane %v12056_v51, 1 }
 0x21f   : > { %v1387_v42 = vpack.c.b16 %v1208_v27, %v9460_v29  ;;  %v7335_v27 = vld [vmem:[%s11511_s2 + $0x338] sm:$0xff] }
 0x220   : > { %v2766_v26 = vadd.f32 %v2765_v54, %v2224_v12  ;;  %3721 = vmatpush.bf16.msrb.mxu0 %v7335_v27  ;;  %v603_v27 = vshrl.u32 %v12056_v51, 16 }
 0x221   : > { %3161 = vmatpush.bf16.msra.mxu3 %v7272_v16  ;;  %v9472_v47 = vpop.f32.mrf.mxu3  ;;  %v12060_v16 = vld [vmem:[#allocation44_spill] sm:$0xff] }
 0x222   : > { %v9467_v43 = vadd.f32 %v9346_v22, %v2766_v26  ;;  %v882_v26 = vsel %vm876_vm1, %v880_v7, %v881_v18 }
 0x224   : > { %v2770_v54 = vpop.f32.mrf.mxu2 }
 0x225   : > { %v2182_v32 = vpop.f32.mrf.mxu0  ;;  %v2226_v12 = vpop.f32.mrf.mxu1 }
 0x226   : > { %v9480_v22 = vadd.f32 %v2182_v32, %v9197_v1  ;;  %v2227_v5 = vadd.f32 %v2226_v12, %v12060_v16  ;;  %v12062_v12 = vld [vmem:[#allocation53_spill] sm:$0xff] }
 0x227   : > { %3162 = vmatmul.bf16.vlgmr.msra.gmra.mxu3 %v882_v26 }
 0x228   : > { %v2769_v30 = vadd.f32 %v2768_v57, %v2227_v5  ;;  %2265 = vmatmul.bf16.gmra.mxu1 %v1387_v42  ;;  %2940 = vmatmul.bf16.gmra.mxu0 %v12061_v25  ;;  %v596_v42 = vshll.u32 %v12056_v51, 16  ;;  %v12063_v5 = vld [vmem:[#allocation71_spill] sm:$0xff]  ;;  %v877_v25 = vrot.slane %v12065_v45, 1 }
 0x229   : > { %2812 = vmatmul.bf16.gmra.mxu2 %v9477_v59  ;;  %v9495_v44 = vpop.f32.mrf.mxu3  ;;  %v997_v59 = vunpack.c.l.b16 %v12063_v5 }
 0x22a   : > { %v9493_v1 = vadd.f32 %v9377_v33, %v2769_v30  ;;  %v1212_v30 = vunpack.c.h.b16 %v9448_v19  ;;  %v9504_v33 = vunpack.c.l.b16 %v1203_v28  ;;  %v598_v61 = vrot.slane %v596_v42, 1  ;;  %v12068_v28 = vld [vmem:[#allocation60_spill] sm:$0xff] }
 0x22b   : > { %v12069_v19 = vunpack.c.l.b16 %v12068_v28 }
 0x22c   : > { %v2773_v55 = vpop.f32.mrf.mxu2  ;;  %12064 = vst [vmem:[#allocation103_spill] sm:$0xff] %v9504_v33 }
 0x22d   : > { %v2184_v7 = vpop.f32.mrf.mxu0  ;;  %v2228_v57 = vpop.f32.mrf.mxu1  ;;  %v9517_v34 = vpack.c.b16 %v997_v59, %v12069_v19  ;;  %v591_v59 = vshll.u32 %v8843_v23, 16 }
 0x22e   : > { %v9499_v32 = vadd.f32 %v2184_v7, %v9212_v10  ;;  %v2229_v16 = vadd.f32 %v2228_v57, %v12062_v12  ;;  %v878_v10 = vrot.slane %v9189_v9, 1  ;;  %v948_v7 = vunpack.c.l.b16 %v881_v18  ;;  %v12067_v12 = vld [vmem:[#allocation24_spill] sm:$0xff]  ;;  %v12070_v18 = vld [vmem:[#allocation50_spill] sm:$0xff] }
 0x22f   : > { %v952_v57 = vunpack.c.l.b16 %v12066_v15  ;;  %v950_v38 = vunpack.c.l.b16 %v12067_v12 }
 0x230   : > { %v2771_v26 = vadd.f32 %v2770_v54, %v2229_v16  ;;  %v605_v54 = vor.u32 %v603_v27, %v598_v61  ;;  %v1393_v16 = vpack.c.b16 %v9504_v33, %v1212_v30  ;;  %v879_v0 = vsel %vm876_vm1, %v877_v25, %v878_v10  ;;  %v12104_v33 = vld [vmem:[#allocation93_spill] sm:$0xff] }
 0x231   : > { %v2864_v45 = vpop.f32.mrf.mxu3 }
 0x232   : > { %v9509_v29 = vadd.f32 %v9405_v48, %v2771_v26  ;;  %v2285_v48 = vpack.c.b16 %v952_v57, %v948_v7  ;;  %v946_v26 = vunpack.c.l.b16 %v605_v54  ;;  %v593_v54 = vrot.slane %v591_v59, 1 }
 0x234   : > { %v2775_v51 = vpop.f32.mrf.mxu2  ;;  %v2283_v27 = vpack.c.b16 %v950_v38, %v946_v26 }
 0x235   : > { %v2187_v42 = vpop.f32.mrf.mxu0  ;;  %v2231_v46 = vpop.f32.mrf.mxu1 }
 0x236   : > { %v9520_v9 = vadd.f32 %v2187_v42, %v9229_v56  ;;  %v2232_v53 = vadd.f32 %v2231_v46, %v12070_v18  ;;  %v589_v46 = vshrl.u32 %v8843_v23, 16  ;;  %v7334_v23 = vld [vmem:[%s11511_s2 + $0x330] sm:$0xff]  ;;  %v956_v42 = vunpack.c.h.b16 %v12066_v15 }
 0x237   : > { %3167 = vmatmul.bf16.gmra.mxu3 %v2285_v48  ;;  %3722 = vmatpush.bf16.msrb.mxu0 %v7334_v23  ;;  %v7342_v15 = vld [vmem:[%s11511_s2 + $0x370] sm:$0xff] }
 0x238   : > { %v2774_v13 = vadd.f32 %v2773_v55, %v2232_v53  ;;  %2270 = vmatmul.bf16.gmra.mxu1 %v1393_v16  ;;  %2945 = vmatmul.bf16.gmra.mxu0 %v9517_v34  ;;  %v12071_v55 = vld [vmem:[#allocation89_spill] sm:$0xff]  ;;  %v594_v28 = vor.u32 %v593_v54, %v589_v46 }
 0x239   : > { %3078 = vmatmul.bf16.vlgmr.msrb.gmra.mxu2 %v879_v0  ;;  %v1001_v0 = vunpack.c.h.b16 %v12063_v5  ;;  %v951_v16 = vunpack.c.l.b16 %v12071_v55  ;;  %3806 = vmatpush.bf16.msra.mxu1 %v7342_v15  ;;  %v12078_v15 = vld [vmem:[#allocation97_spill] sm:$0xff] }
 0x23a   : > { %v9527_v19 = vadd.f32 %v9445_v35, %v2774_v13  ;;  %v2867_v7 = vpop.f32.mrf.mxu3  ;;  %v947_v13 = vunpack.c.l.b16 %v878_v10  ;;  %v599_v10 = vsel %vm575_vm0, %v594_v28, %v598_v61 }
 0x23c   : > { %v2778_v30 = vpop.f32.mrf.mxu2  ;;  %v2284_v59 = vpack.c.b16 %v951_v16, %v947_v13 }
 0x23d   : > { %v2189_v56 = vpop.f32.mrf.mxu0  ;;  %v2233_v57 = vpop.f32.mrf.mxu1 }
 0x23e   : > { %v9531_v25 = vadd.f32 %v2189_v56, %v9243_v63  ;;  %v2234_v53 = vadd.f32 %v2233_v57, %v9206_v36  ;;  %v12072_v63 = vld [vmem:[#allocation76_spill] sm:$0xff] }
 0x23f   : > { %v12073_v48 = vunpack.c.l.b16 %v12072_v63 }
 0x240   : > { %v2776_v38 = vadd.f32 %v2775_v51, %v2234_v53 }
 0x241   : > { %v9545_v26 = vpack.c.b16 %v12073_v48, %v1001_v0  ;;  %v12075_v48 = vld [vmem:[#allocation94_spill] sm:$0xff] }
 0x242   : > { %v9537_v35 = vadd.f32 %v9472_v47, %v2776_v38  ;;  %v2869_v5 = vpop.f32.mrf.mxu3  ;;  %v12074_v47 = vld [vmem:[#allocation12_spill] sm:$0xff] }
 0x243   : > { %v2291_v56 = vpack.c.b16 %v12074_v47, %v956_v42 }
 0x244   : > { %v2780_v36 = vpop.f32.mrf.mxu2 }
 0x245   : > { %v2236_v51 = vpop.f32.mrf.mxu1  ;;  %v2911_v18 = vpop.f32.mrf.mxu0 }
 0x246   : > { %v2237_v57 = vadd.f32 %v2236_v51, %v9223_v50  ;;  %v9551_v46 = vadd.f32 %v2911_v18, %v9257_v21 }
 0x247   : > { %3172 = vmatmul.bf16.gmra.mxu3 %v2291_v56 }
 0x248   : > { %v2779_v54 = vadd.f32 %v2778_v30, %v2237_v57  ;;  %2950 = vmatmul.bf16.gmra.mxu0 %v9545_v26  ;;  %2994 = vmatmul.bf16.vlgmr.msrb.gmra.mxu1 %v599_v10  ;;  %v955_v30 = vunpack.c.h.b16 %v12071_v55 }
 0x249   : > { %3083 = vmatmul.bf16.gmra.mxu2 %v2284_v59  ;;  %v12076_v59 = vld [vmem:[#allocation77_spill] sm:$0xff] }
 0x24a   : > { %v9558_v61 = vadd.f32 %v9495_v44, %v2779_v54  ;;  %v2872_v0 = vpop.f32.mrf.mxu3  ;;  %v2290_v51 = vpack.c.b16 %v12075_v48, %v955_v30  ;;  %v1021_v54 = vunpack.c.l.b16 %v12078_v15 }
 0x24c   : > { %v2783_v53 = vpop.f32.mrf.mxu2 }
 0x24d   : > { %v2238_v50 = vpop.f32.mrf.mxu1  ;;  %v2913_v38 = vpop.f32.mrf.mxu0 }
 0x24e   : > { %v2239_v21 = vadd.f32 %v2238_v50, %v9233_v17  ;;  %v9562_v16 = vadd.f32 %v2913_v38, %v9266_v6  ;;  %v12077_v6 = vld [vmem:[#allocation19_spill] sm:$0xff] }
 0x250   : > { %v2781_v28 = vadd.f32 %v2780_v36, %v2239_v21  ;;  %v12080_v21 = vld [vmem:[#allocation85_spill] sm:$0xff] }
 0x252   : > { %v9565_v13 = vadd.f32 %v2864_v45, %v2781_v28  ;;  %v2874_v42 = vpop.f32.mrf.mxu3 }
 0x254   : > { %v2785_v23 = vpop.f32.mrf.mxu2 }
 0x255   : > { %v2241_v63 = vpop.f32.mrf.mxu1  ;;  %v2916_v44 = vpop.f32.mrf.mxu0 }
 0x256   : > { %v2242_v18 = vadd.f32 %v2241_v63, %v9252_v52  ;;  %v9570_v10 = vadd.f32 %v2916_v44, %v9292_v8  ;;  %v954_v8 = vunpack.c.h.b16 %v12067_v12  ;;  %v12082_v12 = vld [vmem:[#allocation27_spill] sm:$0xff] }
 0x257   : > { %3177 = vmatmul.bf16.gmra.mxu3 %v12077_v6  ;;  %v12083_v30 = vunpack.c.l.b16 %v12082_v12 }
 0x258   : > { %v2784_v17 = vadd.f32 %v2783_v53, %v2242_v18  ;;  %2955 = vmatmul.bf16.gmra.mxu0 %v12076_v59  ;;  %2999 = vmatmul.bf16.gmra.mxu1 %v2283_v27  ;;  %v12079_v27 = vld [vmem:[#allocation39_spill] sm:$0xff] }
 0x259   : > { %3088 = vmatmul.bf16.gmra.mxu2 %v2290_v51  ;;  %v976_v50 = vunpack.c.l.b16 %v12079_v27  ;;  %v2289_v63 = vpack.c.b16 %v12083_v30, %v954_v8  ;;  %v12084_v51 = vld [vmem:[#allocation20_spill] sm:$0xff]  ;;  %v980_v12 = vunpack.c.h.b16 %v12079_v27 }
 0x25a   : > { %v9574_v45 = vadd.f32 %v2867_v7, %v2784_v17  ;;  %v2877_v36 = vpop.f32.mrf.mxu3  ;;  %v7333_v7 = vld [vmem:[%s11511_s2 + $0x328] sm:$0xff] }
 0x25b   : > { %3723 = vmatpush.bf16.msrb.mxu0 %v7333_v7  ;;  %v9598_v18 = vpack.c.b16 %v976_v50, %v12084_v51 }
 0x25c   : > { %v2788_v55 = vpop.f32.mrf.mxu2 }
 0x25d   : > { %v2243_v47 = vpop.f32.mrf.mxu1  ;;  %v2918_v56 = vpop.f32.mrf.mxu0  ;;  %12085 = vst [vmem:[#allocation55_spill] sm:$0xff] %v9598_v18 }
 0x25e   : > { %v2244_v57 = vadd.f32 %v2243_v47, %v9260_v4  ;;  %v9578_v52 = vadd.f32 %v2918_v56, %v9307_v58  ;;  %v7341_v4 = vld [vmem:[%s11511_s2 + $0x368] sm:$0xff]  ;;  %v12081_v58 = vunpack.c.l.b16 %v12080_v21  ;;  %v12087_v21 = vld [vmem:[#allocation104_spill] sm:$0xff] }
 0x25f   : > { %3807 = vmatpush.bf16.msra.mxu1 %v7341_v4 }
 0x260   : > { %v2786_v53 = vadd.f32 %v2785_v23, %v2244_v57  ;;  %v9593_v28 = vpack.c.b16 %v1021_v54, %v12081_v58  ;;  %v12086_v57 = vld [vmem:[#allocation92_spill] sm:$0xff]  ;;  %v975_v58 = vunpack.c.l.b16 %v12087_v21 }
 0x262   : > { %v9583_v38 = vadd.f32 %v2869_v5, %v2786_v53  ;;  %v2879_v44 = vpop.f32.mrf.mxu3 }
 0x264   : > { %v2790_v23 = vpop.f32.mrf.mxu2 }
 0x265   : > { %v2246_v5 = vpop.f32.mrf.mxu1  ;;  %v2921_v48 = vpop.f32.mrf.mxu0 }
 0x266   : > { %v2247_v17 = vadd.f32 %v2246_v5, %v9284_v3  ;;  %v9602_v47 = vadd.f32 %v2921_v48, %v9324_v60  ;;  %v1025_v60 = vunpack.c.h.b16 %v12078_v15 }
 0x267   : > { %3182 = vmatmul.bf16.gmra.mxu3 %v9598_v18 }
 0x268   : > { %v2789_v56 = vadd.f32 %v2788_v55, %v2247_v17  ;;  %2960 = vmatmul.bf16.gmra.mxu0 %v9593_v28  ;;  %3004 = vmatmul.bf16.gmra.mxu1 %v2289_v63 }
 0x269   : > { %3093 = vmatmul.bf16.gmra.mxu2 %v12086_v57 }
 0x26a   : > { %v9607_v8 = vadd.f32 %v2872_v0, %v2789_v56  ;;  %v2882_v53 = vpop.f32.mrf.mxu3  ;;  %v12088_v0 = vld [vmem:[#allocation98_spill] sm:$0xff]  ;;  %v12091_v56 = vld [vmem:[#allocation100_spill] sm:$0xff] }
 0x26b   : > { %v12089_v63 = vunpack.c.l.b16 %v12088_v0 }
 0x26c   : > { %v2793_v54 = vpop.f32.mrf.mxu2 }
 0x26d   : > { %v2248_v7 = vpop.f32.mrf.mxu1  ;;  %v2923_v50 = vpop.f32.mrf.mxu0  ;;  %v9620_v5 = vpack.c.b16 %v12089_v63, %v1025_v60 }
 0x26e   : > { %v2249_v4 = vadd.f32 %v2248_v7, %v9301_v11  ;;  %v9611_v3 = vadd.f32 %v2923_v50, %v9336_v14  ;;  %v9623_v14 = vpack.c.b16 %v975_v58, %v12091_v56  ;;  %v12093_v7 = vld [vmem:[#allocation40_spill] sm:$0xff]  ;;  %v7340_v56 = vld [vmem:[%s11511_s2 + $0x360] sm:$0xff] }
 0x26f   : > { %12090 = vst [vmem:[#allocation21_spill] sm:$0xff] %v9620_v5  ;;  %v9626_v15 = vpack.c.b16 %v12093_v7, %v980_v12  ;;  %v12095_v50 = vld [vmem:[#allocation32_spill] sm:$0xff]  ;;  %3808 = vmatpush.bf16.msra.mxu1 %v7340_v56 }
 0x270   : > { %v2791_v55 = vadd.f32 %v2790_v23, %v2249_v4  ;;  %12092 = vst [vmem:[#allocation30_spill] sm:$0xff] %v9623_v14  ;;  %v12102_v56 = vld [vmem:[#allocation36_spill] sm:$0xff] }
 0x271   : > { %12094 = vst [vmem:[#allocation121_spill] sm:$0xff] %v9626_v15 }
 0x272   : > { %v9616_v30 = vadd.f32 %v2874_v42, %v2791_v55  ;;  %v2884_v51 = vpop.f32.mrf.mxu3 }
 0x274   : > { %v2795_v48 = vpop.f32.mrf.mxu2 }
 0x275   : > { %v2251_v17 = vpop.f32.mrf.mxu1  ;;  %v2926_v11 = vpop.f32.mrf.mxu0 }
 0x276   : > { %v2252_v23 = vadd.f32 %v2251_v17, %v9318_v62  ;;  %v9630_v27 = vadd.f32 %v2926_v11, %v9369_v31  ;;  %v7332_v17 = vld [vmem:[%s11511_s2 + $0x320] sm:$0xff]  ;;  %v979_v11 = vunpack.c.h.b16 %v12087_v21 }
 0x277   : > { %3187 = vmatmul.bf16.gmra.mxu3 %v9626_v15  ;;  %3724 = vmatpush.bf16.msrb.mxu0 %v7332_v17 }
 0x278   : > { %v2794_v42 = vadd.f32 %v2793_v54, %v2252_v23  ;;  %2965 = vmatmul.bf16.gmra.mxu0 %v9620_v5  ;;  %3009 = vmatmul.bf16.gmra.mxu1 %v12095_v50  ;;  %v12096_v54 = vld [vmem:[#allocation45_spill] sm:$0xff] }
 0x279   : > { %3098 = vmatmul.bf16.gmra.mxu2 %v9623_v14  ;;  %v974_v0 = vunpack.c.l.b16 %v12096_v54  ;;  %v12124_v14 = vld [vmem:[#allocation119_spill] sm:$0xff] }
 0x27a   : > { %v9636_v4 = vadd.f32 %v2877_v36, %v2794_v42  ;;  %v2887_v55 = vpop.f32.mrf.mxu3 }
 0x27c   : > { %v2798_v60 = vpop.f32.mrf.mxu2 }
 0x27d   : > { %v2253_v58 = vpop.f32.mrf.mxu1  ;;  %v2928_v12 = vpop.f32.mrf.mxu0 }
 0x27e   : > { %v2254_v62 = vadd.f32 %v2253_v58, %v9329_v49  ;;  %v9640_v31 = vadd.f32 %v2928_v12, %v9396_v40  ;;  %v12097_v49 = vld [vmem:[#allocation34_spill] sm:$0xff]  ;;  %v12099_v12 = vld [vmem:[#allocation108_spill] sm:$0xff] }
 0x27f   : > { %v12098_v7 = vunpack.c.l.b16 %v12097_v49 }
 0x280   : > { %v2796_v63 = vadd.f32 %v2795_v48, %v2254_v62  ;;  %v9657_v62 = vpack.c.b16 %v12099_v12, %v979_v11  ;;  %v978_v12 = vunpack.c.h.b16 %v12096_v54 }
 0x281   : > { %v9654_v40 = vpack.c.b16 %v974_v0, %v12098_v7  ;;  %v12101_v0 = vld [vmem:[#allocation99_spill] sm:$0xff] }
 0x282   : > { %v9647_v36 = vadd.f32 %v2879_v44, %v2796_v63  ;;  %v2889_v42 = vpop.f32.mrf.mxu3  ;;  %12100 = vst [vmem:[#allocation16_spill] sm:$0xff] %v9657_v62  ;;  %v7331_v63 = vld [vmem:[%s11511_s2 + $0x318] sm:$0xff] }
 0x283   : > { %3725 = vmatpush.bf16.msrb.mxu0 %v7331_v63 }
 0x284   : > { %v2800_v23 = vpop.f32.mrf.mxu2 }
 0x285   : > { %v2256_v48 = vpop.f32.mrf.mxu1  ;;  %v2931_v58 = vpop.f32.mrf.mxu0 }
 0x286   : > { %v2257_v44 = vadd.f32 %v2256_v48, %v9357_v39  ;;  %v9661_v21 = vadd.f32 %v2931_v58, %v9440_v20  ;;  %v7330_v39 = vld [vmem:[%s11511_s2 + $0x310] sm:$0xff] }
 0x287   : > { %3192 = vmatmul.bf16.gmra.mxu3 %v12102_v56  ;;  %3726 = vmatpush.bf16.msrb.mxu0 %v7330_v39  ;;  %v1000_v56 = vunpack.c.l.b16 %v12104_v33 }
 0x288   : > { %v2799_v17 = vadd.f32 %v2798_v60, %v2257_v44  ;;  %2970 = vmatmul.bf16.gmra.mxu0 %v12101_v0  ;;  %3014 = vmatmul.bf16.gmra.mxu1 %v9654_v40  ;;  %v12103_v44 = vld [vmem:[#allocation111_spill] sm:$0xff]  ;;  %v12110_v0 = vld [vmem:[#allocation81_spill] sm:$0xff] }
 0x289   : > { %3103 = vmatmul.bf16.gmra.mxu2 %v9657_v62  ;;  %v1045_v63 = vunpack.c.l.b16 %v12103_v44 }
 0x28a   : > { %v9670_v11 = vadd.f32 %v2882_v53, %v2799_v17  ;;  %v2892_v49 = vpop.f32.mrf.mxu3  ;;  %v7329_v53 = vld [vmem:[%s11511_s2 + $0x308] sm:$0xff] }
 0x28b   : > { %3727 = vmatpush.bf16.msrb.mxu0 %v7329_v53 }
 0x28c   : > { %v2803_v20 = vpop.f32.mrf.mxu2 }
 0x28d   : > { %v2258_v7 = vpop.f32.mrf.mxu1  ;;  %v2933_v48 = vpop.f32.mrf.mxu0 }
 0x28e   : > { %v2259_v60 = vadd.f32 %v2258_v7, %v9383_v24  ;;  %v9677_v58 = vadd.f32 %v2933_v48, %v9467_v43  ;;  %v7328_v24 = vld [vmem:[%s11511_s2 + $0x300] sm:$0xff]  ;;  %v12108_v48 = vld [vmem:[#allocation48_spill] sm:$0xff] }
 0x28f   : > { %v12105_v43 = vld [vmem:[#allocation102_spill] sm:$0xff]  ;;  %v12109_v18 = vunpack.c.l.b16 %v12108_v48  ;;  %3728 = vmatpush.bf16.msrb.mxu0 %v7328_v24  ;;  %v7339_v48 = vld [vmem:[%s11511_s2 + $0x358] sm:$0xff] }
 0x290   : > { %v2801_v17 = vadd.f32 %v2800_v23, %v2259_v60  ;;  %v12106_v39 = vunpack.c.l.b16 %v12105_v43  ;;  %3809 = vmatpush.bf16.msra.mxu1 %v7339_v48 }
 0x291   : > { %v9696_v6 = vpack.c.b16 %v12109_v18, %v978_v12  ;;  %v12112_v18 = vld [vmem:[#allocation107_spill] sm:$0xff] }
 0x292   : > { %v9685_v15 = vadd.f32 %v2884_v51, %v2801_v17  ;;  %v9692_v7 = vpack.c.b16 %v1045_v63, %v12106_v39  ;;  %v2894_v62 = vpop.f32.mrf.mxu3  ;;  %v9699_v51 = vpack.c.b16 %v1000_v56, %v12110_v0 }
 0x294   : > { %12107 = vst [vmem:[#allocation44_spill] sm:$0xff] %v9692_v7  ;;  %v2805_v54 = vpop.f32.mrf.mxu2 }
 0x295   : > { %v2261_v23 = vpop.f32.mrf.mxu1  ;;  %v2936_v60 = vpop.f32.mrf.mxu0  ;;  %12111 = vst [vmem:[#allocation53_spill] sm:$0xff] %v9699_v51 }
 0x296   : > { %v2262_v53 = vadd.f32 %v2261_v23, %v9424_v37  ;;  %v9703_v17 = vadd.f32 %v2936_v60, %v9493_v1  ;;  %v12113_v23 = vld [vmem:[#allocation117_spill] sm:$0xff] }
 0x297   : > { %3197 = vmatmul.bf16.gmra.mxu3 %v9699_v51  ;;  %v999_v60 = vunpack.c.l.b16 %v12113_v23 }
 0x298   : > { %v2804_v43 = vadd.f32 %v2803_v20, %v2262_v53  ;;  %2975 = vmatmul.bf16.gmra.mxu0 %v9692_v7  ;;  %3019 = vmatmul.bf16.gmra.mxu1 %v9696_v6  ;;  %v1049_v20 = vunpack.c.h.b16 %v12103_v44 }
 0x299   : > { %3108 = vmatmul.bf16.gmra.mxu2 %v12112_v18 }
 0x29a   : > { %v9709_v12 = vadd.f32 %v2887_v55, %v2804_v43  ;;  %v2897_v0 = vpop.f32.mrf.mxu3  ;;  %v1004_v55 = vunpack.c.h.b16 %v12104_v33  ;;  %v12114_v43 = vld [vmem:[#allocation112_spill] sm:$0xff] }
 0x29b   : > { %v12115_v51 = vunpack.c.l.b16 %v12114_v43  ;;  %v1003_v43 = vunpack.c.h.b16 %v12113_v23  ;;  %v12127_v23 = vld [vmem:[#allocation54_spill] sm:$0xff] }
 0x29c   : > { %v2808_v63 = vpop.f32.mrf.mxu2  ;;  %v9731_v18 = vpack.c.b16 %v9208_v41, %v1004_v55 }
 0x29d   : > { %v2263_v56 = vpop.f32.mrf.mxu1  ;;  %v2938_v39 = vpop.f32.mrf.mxu0 }
 0x29e   : > { %v2264_v37 = vadd.f32 %v2263_v56, %v9454_v2  ;;  %v9713_v1 = vadd.f32 %v2938_v39, %v9509_v29  ;;  %v9725_v2 = vpack.c.b16 %v12115_v51, %v1049_v20  ;;  %12119 = vst [vmem:[#allocation17_spill] sm:$0xff] %v9731_v18  ;;  %v12120_v51 = vld [vmem:[#allocation51_spill] sm:$0xff] }
 0x2a0   : > { %v2806_v24 = vadd.f32 %v2805_v54, %v2264_v37  ;;  %12116 = vst [vmem:[#allocation71_spill] sm:$0xff] %v9725_v2  ;;  %v12117_v54 = vld [vmem:[#allocation114_spill] sm:$0xff] }
 0x2a1   : > { %v9728_v37 = vpack.c.b16 %v999_v60, %v12117_v54 }
 0x2a2   : > { %v9721_v53 = vadd.f32 %v2889_v42, %v2806_v24  ;;  %v2899_v56 = vpop.f32.mrf.mxu3 }
 0x2a3   : > { %12118 = vst [vmem:[#allocation120_spill] sm:$0xff] %v9728_v37 }
 0x2a4   : > { %v2810_v29 = vpop.f32.mrf.mxu2 }
 0x2a5   : > { %v2266_v39 = vpop.f32.mrf.mxu1  ;;  %v2941_v44 = vpop.f32.mrf.mxu0 }
 0x2a6   : > { %v2267_v7 = vadd.f32 %v2266_v39, %v9480_v22  ;;  %v9735_v33 = vadd.f32 %v2941_v44, %v9527_v19  ;;  %v12122_v44 = vld [vmem:[#allocation57_spill] sm:$0xff] }
 0x2a7   : > { %3202 = vmatmul.bf16.gmra.mxu3 %v9731_v18  ;;  %v12123_v54 = vunpack.c.l.b16 %v12122_v44 }
 0x2a8   : > { %v2809_v42 = vadd.f32 %v2808_v63, %v2267_v7  ;;  %2980 = vmatmul.bf16.gmra.mxu0 %v9725_v2  ;;  %3024 = vmatmul.bf16.gmra.mxu1 %v12120_v51  ;;  %v12121_v7 = vld [vmem:[#allocation63_spill] sm:$0xff] }
 0x2a9   : > { %3113 = vmatmul.bf16.gmra.mxu2 %v9728_v37  ;;  %v998_v63 = vunpack.c.l.b16 %v12121_v7 }
 0x2aa   : > { %v9741_v20 = vadd.f32 %v2892_v49, %v2809_v42  ;;  %v3163_v48 = vpop.f32.mrf.mxu3 }
 0x2ab   : > { %v9753_v49 = vpack.c.b16 %v998_v63, %v12123_v54  ;;  %v12129_v54 = vld [vmem:[#allocation68_spill] sm:$0xff] }
 0x2ac   : > { %v2813_v24 = vpop.f32.mrf.mxu2 }
 0x2ad   : > { %v2268_v41 = vpop.f32.mrf.mxu1  ;;  %v2943_v60 = vpop.f32.mrf.mxu0 }
 0x2ae   : > { %v2269_v22 = vadd.f32 %v2268_v41, %v9499_v32  ;;  %v9745_v19 = vadd.f32 %v2943_v60, %v9537_v35  ;;  %v9756_v32 = vpack.c.b16 %v12124_v14, %v1003_v43  ;;  %v12128_v43 = vld [vmem:[#allocation80_spill] sm:$0xff] }
 0x2b0   : > { %v2811_v55 = vadd.f32 %v2810_v29, %v2269_v22  ;;  %12125 = vst [vmem:[#allocation24_spill] sm:$0xff] %v9756_v32 }
 0x2b2   : > { %v9749_v39 = vadd.f32 %v2894_v62, %v2811_v55  ;;  %v3165_v18 = vpop.f32.mrf.mxu3  ;;  %v12126_v62 = vld [vmem:[#allocation28_spill] sm:$0xff] }
 0x2b4   : > { %v2815_v42 = vpop.f32.mrf.mxu2 }
 0x2b5   : > { %v2271_v37 = vpop.f32.mrf.mxu1  ;;  %v2946_v2 = vpop.f32.mrf.mxu0 }
 0x2b6   : > { %v2272_v35 = vadd.f32 %v2271_v37, %v9520_v9  ;;  %v9760_v41 = vadd.f32 %v2946_v2, %v9558_v61  ;;  %v7338_v2 = vld [vmem:[%s11511_s2 + $0x350] sm:$0xff]  ;;  %v1002_v37 = vunpack.c.h.b16 %v12121_v7 }
 0x2b7   : > { %3207 = vmatmul.bf16.gmra.mxu3 %v12127_v23  ;;  %3810 = vmatpush.bf16.msra.mxu1 %v7338_v2 }
 0x2b8   : > { %v2814_v29 = vadd.f32 %v2813_v24, %v2272_v35  ;;  %3029 = vmatmul.bf16.gmra.mxu1 %v9753_v49  ;;  %3729 = vmatmul.bf16.vlgmr.msrb.gmra.mxu0 %v12126_v62  ;;  %v12130_v35 = vunpack.c.l.b16 %v12129_v54 }
 0x2b9   : > { %3118 = vmatmul.bf16.gmra.mxu2 %v9756_v32 }
 0x2ba   : > { %v9766_v60 = vadd.f32 %v2897_v0, %v2814_v29  ;;  %v3168_v63 = vpop.f32.mrf.mxu3  ;;  %v1024_v0 = vunpack.c.l.b16 %v12128_v43  ;;  %v9781_v29 = vpack.c.b16 %v12130_v35, %v1002_v37  ;;  %v12136_v35 = vld [vmem:[#allocation18_spill] sm:$0xff] }
 0x2bc   : > { %v3079_v22 = vpop.f32.mrf.mxu2 }
 0x2bd   : > { %v2273_v14 = vpop.f32.mrf.mxu1  ;;  %v2948_v55 = vpop.f32.mrf.mxu0 }
 0x2be   : > { %v2274_v9 = vadd.f32 %v2273_v14, %v9531_v25  ;;  %v9770_v61 = vadd.f32 %v2948_v55, %v9565_v13  ;;  %v12131_v55 = vld [vmem:[#allocation72_spill] sm:$0xff] }
 0x2bf   : > { %v9784_v23 = vpack.c.b16 %v1024_v0, %v12131_v55 }
 0x2c0   : > { %v2816_v24 = vadd.f32 %v2815_v42, %v2274_v9  ;;  %v12134_v9 = vld [vmem:[#allocation118_spill] sm:$0xff] }
 0x2c1   : > { %12132 = vst [vmem:[#allocation60_spill] sm:$0xff] %v9784_v23 }
 0x2c2   : > { %v9777_v44 = vadd.f32 %v2899_v56, %v2816_v24  ;;  %v3170_v62 = vpop.f32.mrf.mxu3  ;;  %v12133_v56 = vld [vmem:[#allocation41_spill] sm:$0xff] }
 0x2c4   : > { %v3081_v25 = vpop.f32.mrf.mxu2 }
 0x2c5   : > { %v2951_v13 = vpop.f32.mrf.mxu0  ;;  %v2995_v14 = vpop.f32.mrf.mxu1 }
 0x2c6   : > { %v9787_v32 = vadd.f32 %v2951_v13, %v9574_v45  ;;  %v2996_v7 = vadd.f32 %v2995_v14, %v9551_v46  ;;  %v1023_v13 = vunpack.c.l.b16 %v12136_v35  ;;  %v1028_v14 = vunpack.c.h.b16 %v12128_v43 }
 0x2c7   : > { %3212 = vmatmul.bf16.gmra.mxu3 %v9784_v23 }
 0x2c8   : > { %v3080_v42 = vadd.f32 %v3079_v22, %v2996_v7  ;;  %3034 = vmatmul.bf16.gmra.mxu1 %v9781_v29  ;;  %3734 = vmatmul.bf16.gmra.mxu0 %v12133_v56 }
 0x2c9   : > { %3123 = vmatmul.bf16.gmra.mxu2 %v12134_v9  ;;  %v12139_v9 = vld [vmem:[#allocation33_spill] sm:$0xff] }
 0x2ca   : > { %v9794_v2 = vadd.f32 %v3163_v48, %v3080_v42  ;;  %v3173_v24 = vpop.f32.mrf.mxu3  ;;  %v9808_v5 = vpack.c.b16 %v12139_v9, %v1028_v14  ;;  %v7337_v9 = vld [vmem:[%s11511_s2 + $0x348] sm:$0xff] }
 0x2cb   : > { %3811 = vmatpush.bf16.msra.mxu1 %v7337_v9 }
 0x2cc   : > { %12135 = vst [vmem:[#allocation50_spill] sm:$0xff] %v9794_v2  ;;  %v3084_v37 = vpop.f32.mrf.mxu2  ;;  %v12138_v2 = vld [vmem:[#allocation122_spill] sm:$0xff] }
 0x2cd   : > { %v2953_v0 = vpop.f32.mrf.mxu0  ;;  %v2997_v54 = vpop.f32.mrf.mxu1  ;;  %v9805_v23 = vpack.c.b16 %v1023_v13, %v12138_v2  ;;  %12140 = vst [vmem:[#allocation76_spill] sm:$0xff] %v9808_v5 }
 0x2ce   : > { %v9797_v45 = vadd.f32 %v2953_v0, %v9583_v38  ;;  %v2998_v46 = vadd.f32 %v2997_v54, %v9562_v16  ;;  %v12141_v0 = vld [vmem:[#allocation69_spill] sm:$0xff] }
 0x2d0   : > { %v3082_v22 = vadd.f32 %v3081_v25, %v2998_v46 }
 0x2d2   : > { %v9802_v55 = vadd.f32 %v3165_v18, %v3082_v22  ;;  %v3175_v56 = vpop.f32.mrf.mxu3  ;;  %v12142_v18 = vld [vmem:[#allocation47_spill] sm:$0xff]  ;;  %v12144_v22 = vld [vmem:[#allocation90_spill] sm:$0xff] }
 0x2d3   : > { %v1022_v13 = vunpack.c.l.b16 %v12144_v22 }
 0x2d4   : > { %12137 = vst [vmem:[#allocation89_spill] sm:$0xff] %v9802_v55  ;;  %v3086_v7 = vpop.f32.mrf.mxu2 }
 0x2d5   : > { %v2956_v48 = vpop.f32.mrf.mxu0  ;;  %v3000_v42 = vpop.f32.mrf.mxu1 }
 0x2d6   : > { %v9811_v38 = vadd.f32 %v2956_v48, %v9607_v8  ;;  %v3001_v16 = vadd.f32 %v3000_v42, %v9570_v10  ;;  %v12145_v42 = vld [vmem:[#allocation78_spill] sm:$0xff] }
 0x2d7   : > { %3217 = vmatmul.bf16.gmra.mxu3 %v9808_v5  ;;  %v12147_v5 = vld [vmem:[#allocation79_spill] sm:$0xff] }
 0x2d8   : > { %v3085_v25 = vadd.f32 %v3084_v37, %v3001_v16  ;;  %3039 = vmatmul.bf16.gmra.mxu1 %v12141_v0  ;;  %3739 = vmatmul.bf16.gmra.mxu0 %v12142_v18  ;;  %v12146_v16 = vunpack.c.l.b16 %v12145_v42 }
 0x2d9   : > { %3128 = vmatmul.bf16.gmra.mxu2 %v9805_v23 }
 0x2da   : > { %v9818_v43 = vadd.f32 %v3168_v63, %v3085_v25  ;;  %v3178_v8 = vpop.f32.mrf.mxu3  ;;  %v1027_v63 = vunpack.c.h.b16 %v12136_v35  ;;  %v9833_v25 = vpack.c.b16 %v1022_v13, %v12146_v16  ;;  %v12149_v35 = vld [vmem:[#allocation87_spill] sm:$0xff] }
 0x2db   : > { %v12153_v16 = vld [vmem:[#allocation95_spill] sm:$0xff] }
 0x2dc   : > { %12143 = vst [vmem:[#allocation12_spill] sm:$0xff] %v9818_v43  ;;  %v3089_v2 = vpop.f32.mrf.mxu2 }
 0x2dd   : > { %v2958_v54 = vpop.f32.mrf.mxu0  ;;  %v3002_v10 = vpop.f32.mrf.mxu1 }
 0x2de   : > { %v9824_v37 = vadd.f32 %v2958_v54, %v9616_v30  ;;  %v3003_v46 = vadd.f32 %v3002_v10, %v9578_v52  ;;  %v9836_v30 = vpack.c.b16 %v12147_v5, %v1027_v63 }
 0x2e0   : > { %v3087_v14 = vadd.f32 %v3086_v7, %v3003_v46 }
 0x2e2   : > { %v9829_v48 = vadd.f32 %v3170_v62, %v3087_v14  ;;  %v3180_v9 = vpop.f32.mrf.mxu3  ;;  %v12148_v62 = vld [vmem:[#allocation49_spill] sm:$0xff] }
 0x2e4   : > { %v3091_v18 = vpop.f32.mrf.mxu2 }
 0x2e5   : > { %v2961_v43 = vpop.f32.mrf.mxu0  ;;  %v3005_v55 = vpop.f32.mrf.mxu1 }
 0x2e6   : > { %v9839_v52 = vadd.f32 %v2961_v43, %v9636_v4  ;;  %v3006_v7 = vadd.f32 %v3005_v55, %v9602_v47  ;;  %v1026_v55 = vunpack.c.h.b16 %v12144_v22  ;;  %v12155_v22 = vld [vmem:[#allocation86_spill] sm:$0xff] }
 0x2e7   : > { %3222 = vmatmul.bf16.gmra.mxu3 %v12149_v35 }
 0x2e8   : > { %v3090_v54 = vadd.f32 %v3089_v2, %v3006_v7  ;;  %3044 = vmatmul.bf16.gmra.mxu1 %v9833_v25  ;;  %3744 = vmatmul.bf16.gmra.mxu0 %v12148_v62  ;;  %v12151_v2 = vld [vmem:[#allocation82_spill] sm:$0xff]  ;;  %v12154_v7 = vunpack.c.l.b16 %v12153_v16 }
 0x2e9   : > { %3133 = vmatmul.bf16.gmra.mxu2 %v9836_v30  ;;  %v1048_v63 = vunpack.c.l.b16 %v12151_v2 }
 0x2ea   : > { %v9846_v10 = vadd.f32 %v3173_v24, %v3090_v54  ;;  %v9848_v13 = vpop.f32.mrf.mxu3  ;;  %v7351_v24 = vld [vmem:[%s11511_s2 + $0x3b8] sm:$0xff]  ;;  %v9863_v54 = vpack.c.b16 %v12154_v7, %v1026_v55  ;;  %v7350_v55 = vld [vmem:[%s11511_s2 + $0x3b0] sm:$0xff] }
 0x2eb   : > { %3889 = vmatpush.bf16.msra.mxu2 %v7351_v24  ;;  %v12157_v24 = vld [vmem:[#allocation58_spill] sm:$0xff] }
 0x2ec   : > { %12150 = vst [vmem:[#allocation94_spill] sm:$0xff] %v9846_v10  ;;  %v3094_v46 = vpop.f32.mrf.mxu2 }
 0x2ed   : > { %v2963_v5 = vpop.f32.mrf.mxu0  ;;  %v3007_v14 = vpop.f32.mrf.mxu1 }
 0x2ee   : > { %v9851_v4 = vadd.f32 %v2963_v5, %v9647_v36  ;;  %v3008_v47 = vadd.f32 %v3007_v14, %v9611_v3 }
 0x2ef   : > { %3890 = vmatpush.bf16.msra.mxu2 %v7350_v55  ;;  %v7348_v55 = vld [vmem:[%s11511_s2 + $0x3a0] sm:$0xff] }
 0x2f0   : > { %v3092_v43 = vadd.f32 %v3091_v18, %v3008_v47  ;;  %v9868_v18 = vpack.c.b16 %v1048_v63, %v12155_v22  ;;  %v12158_v63 = vld [vmem:[#allocation26_spill] sm:$0xff] }
 0x2f2   : > { %v9856_v42 = vadd.f32 %v3175_v56, %v3092_v43  ;;  %v9865_v36 = vpop.f32.mrf.mxu3  ;;  %12156 = vst [vmem:[#allocation97_spill] sm:$0xff] %v9868_v18  ;;  %v7359_v56 = vld [vmem:[%s11511_s2 + $0x3f8] sm:$0xff] }
 0x2f3   : > { %3973 = vmatpush.bf16.msrb.mxu3 %v7359_v56 }
 0x2f4   : > { %12152 = vst [vmem:[#allocation77_spill] sm:$0xff] %v9856_v42  ;;  %v3096_v62 = vpop.f32.mrf.mxu2 }
 0x2f5   : > { %v2966_v5 = vpop.f32.mrf.mxu0  ;;  %v3010_v3 = vpop.f32.mrf.mxu1 }
 0x2f6   : > { %v9874_v14 = vadd.f32 %v2966_v5, %v9670_v11  ;;  %v3011_v47 = vadd.f32 %v3010_v3, %v9630_v27  ;;  %v7358_v11 = vld [vmem:[%s11511_s2 + $0x3f0] sm:$0xff]  ;;  %v7336_v27 = vld [vmem:[%s11511_s2 + $0x340] sm:$0xff] }
 0x2f7   : > { %3227 = vmatmul.bf16.gmra.mxu3 %v9868_v18  ;;  %3812 = vmatpush.bf16.msra.mxu1 %v7336_v27  ;;  %v1052_v27 = vunpack.c.h.b16 %v12151_v2  ;;  %v12163_v2 = vld [vmem:[#allocation42_spill] sm:$0xff] }
 0x2f8   : > { %v3095_v43 = vadd.f32 %v3094_v46, %v3011_v47  ;;  %3049 = vmatmul.bf16.gmra.mxu1 %v9863_v54  ;;  %3749 = vmatmul.bf16.gmra.mxu0 %v12157_v24  ;;  %v7349_v46 = vld [vmem:[%s11511_s2 + $0x3a8] sm:$0xff]  ;;  %v12160_v24 = vld [vmem:[#allocation70_spill] sm:$0xff] }
 0x2f9   : > { %3138 = vmatmul.bf16.gmra.mxu2 %v12158_v63  ;;  %3974 = vmatpush.bf16.msrb.mxu3 %v7358_v11  ;;  %v1047_v11 = vunpack.c.l.b16 %v12160_v24 }
 0x2fa   : > { %v9887_v16 = vadd.f32 %v3178_v8, %v3095_v43  ;;  %v9895_v5 = vpop.f32.mrf.mxu3  ;;  %v7357_v8 = vld [vmem:[%s11511_s2 + $0x3e8] sm:$0xff]  ;;  %3891 = vmatpush.bf16.msra.mxu2 %v7349_v46 }
 0x2fc   : > { %12159 = vst [vmem:[#allocation39_spill] sm:$0xff] %v9887_v16  ;;  %v3099_v7 = vpop.f32.mrf.mxu2  ;;  %v7356_v16 = vld [vmem:[%s11511_s2 + $0x3e0] sm:$0xff] }
 0x2fd   : > { %v2968_v3 = vpop.f32.mrf.mxu0  ;;  %v3012_v22 = vpop.f32.mrf.mxu1  ;;  %3975 = vmatpush.bf16.msrb.mxu3 %v7357_v8 }
 0x2fe   : > { %v9901_v56 = vadd.f32 %v2968_v3, %v9685_v15  ;;  %v3013_v47 = vadd.f32 %v3012_v22, %v9640_v31  ;;  %3892 = vmatpush.bf16.msra.mxu2 %v7348_v55  ;;  %v7347_v15 = vld [vmem:[%s11511_s2 + $0x398] sm:$0xff]  ;;  %v12162_v22 = vld [vmem:[#allocation35_spill] sm:$0xff] }
 0x2ff   : > { %v9920_v8 = vpack.c.b16 %v1047_v11, %v12162_v22  ;;  %v12165_v22 = vld [vmem:[#allocation96_spill] sm:$0xff] }
 0x300   : > { %v3097_v43 = vadd.f32 %v3096_v62, %v3013_v47  ;;  %v9923_v47 = vpack.c.b16 %v12163_v2, %v1052_v27  ;;  %v12166_v27 = vld [vmem:[#allocation59_spill] sm:$0xff] }
 0x301   : > { %3976 = vmatpush.bf16.msrb.mxu3 %v7356_v16 }
 0x302   : > { %v9912_v42 = vadd.f32 %v3180_v9, %v3097_v43  ;;  %v9917_v46 = vpop.f32.mrf.mxu3  ;;  %12164 = vst [vmem:[#allocation27_spill] sm:$0xff] %v9923_v47  ;;  %v7355_v9 = vld [vmem:[%s11511_s2 + $0x3d8] sm:$0xff]  ;;  %3893 = vmatpush.bf16.msra.mxu2 %v7347_v15  ;;  %v7346_v43 = vld [vmem:[%s11511_s2 + $0x390] sm:$0xff] }
 0x304   : > { %12161 = vst [vmem:[#allocation85_spill] sm:$0xff] %v9912_v42  ;;  %v3101_v31 = vpop.f32.mrf.mxu2  ;;  %v7352_v42 = vld [vmem:[%s11511_s2 + $0x3c0] sm:$0xff] }
 0x305   : > { %v2971_v62 = vpop.f32.mrf.mxu0  ;;  %v3015_v3 = vpop.f32.mrf.mxu1  ;;  %3977 = vmatpush.bf16.msrb.mxu3 %v7355_v9  ;;  %v7353_v9 = vld [vmem:[%s11511_s2 + $0x3c8] sm:$0xff] }
 0x306   : > { %v9929_v16 = vadd.f32 %v2971_v62, %v9709_v12  ;;  %v3016_v55 = vadd.f32 %v3015_v3, %v9661_v21  ;;  %v7354_v12 = vld [vmem:[%s11511_s2 + $0x3d0] sm:$0xff]  ;;  %3894 = vmatpush.bf16.msra.mxu2 %v7346_v43  ;;  %v7344_v43 = vld [vmem:[%s11511_s2 + $0x380] sm:$0xff] }
 0x307   : > { %3232 = vmatmul.bf16.gmra.mxu3 %v9923_v47 }
 0x308   : > { %v3100_v11 = vadd.f32 %v3099_v7, %v3016_v55  ;;  %3054 = vmatmul.bf16.gmra.mxu1 %v12165_v22  ;;  %3754 = vmatmul.bf16.gmra.mxu0 %v12166_v27  ;;  %v7345_v7 = vld [vmem:[%s11511_s2 + $0x388] sm:$0xff] }
 0x309   : > { %3143 = vmatmul.bf16.gmra.mxu2 %v9920_v8  ;;  %3978 = vmatpush.bf16.msrb.mxu3 %v7354_v12 }
 0x30a   : > { %v9943_v21 = vadd.f32 %v9848_v13, %v3100_v11  ;;  %v3193_v62 = vpop.f32.mrf.mxu3  ;;  %3895 = vmatpush.bf16.msra.mxu2 %v7345_v7  ;;  %v12168_v11 = vld [vmem:[#allocation106_spill] sm:$0xff] }
 0x30b   : > { %v1046_v27 = vunpack.c.l.b16 %v12168_v11 }
 0x30c   : > { %12167 = vst [vmem:[#allocation20_spill] sm:$0xff] %v9943_v21  ;;  %v3104_v15 = vpop.f32.mrf.mxu2  ;;  %v1051_v21 = vunpack.c.h.b16 %v12160_v24 }
 0x30d   : > { %v2973_v3 = vpop.f32.mrf.mxu0  ;;  %v3017_v2 = vpop.f32.mrf.mxu1  ;;  %3979 = vmatpush.bf16.msrb.mxu3 %v7353_v9 }
 0x30e   : > { %v9952_v55 = vadd.f32 %v2973_v3, %v9721_v53  ;;  %v3018_v13 = vadd.f32 %v3017_v2, %v9677_v58  ;;  %3896 = vmatpush.bf16.msra.mxu2 %v7344_v43  ;;  %v12169_v58 = vld [vmem:[#allocation101_spill] sm:$0xff]  ;;  %v12172_v43 = vld [vmem:[#allocation66_spill] sm:$0xff] }
 0x30f   : > { %v12170_v7 = vunpack.c.l.b16 %v12169_v58 }
 0x310   : > { %v3102_v12 = vadd.f32 %v3101_v31, %v3018_v13  ;;  %v12171_v31 = vld [vmem:[#allocation43_spill] sm:$0xff] }
 0x311   : > { %3980 = vmatpush.bf16.msrb.mxu3 %v7352_v42  ;;  %v9968_v3 = vpack.c.b16 %v1046_v27, %v12170_v7  ;;  %v9971_v13 = vpack.c.b16 %v12171_v31, %v1051_v21  ;;  %v7367_v42 = vld [vmem:[%s11511_s2 + $0x438] sm:$0xff] }
 0x312   : > { %v9964_v53 = vadd.f32 %v9865_v36, %v3102_v12  ;;  %v3195_v9 = vpop.f32.mrf.mxu3  ;;  %v7375_v27 = vld [vmem:[%s11511_s2 + $0x478] sm:$0xff]  ;;  %4057 = vmatpush.bf16.msra.mxu0 %v7367_v42  ;;  %v1050_v12 = vunpack.c.h.b16 %v12168_v11  ;;  %v12176_v11 = vld [vmem:[#allocation62_spill] sm:$0xff] }
 0x313   : > { %4141 = vmatpush.bf16.msrb.mxu1 %v7375_v27 }
 0x314   : > { %v3106_v2 = vpop.f32.mrf.mxu2 }
 0x315   : > { %v2976_v47 = vpop.f32.mrf.mxu0  ;;  %v3020_v18 = vpop.f32.mrf.mxu1 }
 0x316   : > { %v9974_v24 = vadd.f32 %v2976_v47, %v9741_v20  ;;  %v3021_v10 = vadd.f32 %v3020_v18, %v9703_v17 }
 0x317   : > { %3981 = vmatmul.bf16.vlgmr.msrb.gmra.mxu3 %v12095_v50  ;;  %v12174_v50 = vld [vmem:[#allocation109_spill] sm:$0xff] }
 0x318   : > { %v3105_v36 = vadd.f32 %v3104_v15, %v3021_v10  ;;  %3059 = vmatmul.bf16.gmra.mxu1 %v9968_v3  ;;  %3759 = vmatmul.bf16.gmra.mxu0 %v12172_v43 }
 0x319   : > { %3148 = vmatmul.bf16.gmra.mxu2 %v9971_v13 }
 0x31a   : > { %v9988_v20 = vadd.f32 %v9895_v5, %v3105_v36  ;;  %v3198_v18 = vpop.f32.mrf.mxu3  ;;  %v12175_v5 = vunpack.c.l.b16 %v12174_v50  ;;  %v7366_v50 = vld [vmem:[%s11511_s2 + $0x430] sm:$0xff] }
 0x31b   : > { %4058 = vmatpush.bf16.msra.mxu0 %v7366_v50 }
 0x31c   : > { %12173 = vst [vmem:[#allocation92_spill] sm:$0xff] %v9988_v20  ;;  %v3109_v17 = vpop.f32.mrf.mxu2  ;;  %v10000_v31 = vpack.c.b16 %v12175_v5, %v1050_v12 }
 0x31d   : > { %v2978_v10 = vpop.f32.mrf.mxu0  ;;  %v3022_v47 = vpop.f32.mrf.mxu1 }
 0x31e   : > { %v9991_v21 = vadd.f32 %v2978_v10, %v9749_v39  ;;  %v3023_v15 = vadd.f32 %v3022_v47, %v9713_v1 }
 0x320   : > { %v3107_v58 = vadd.f32 %v3106_v2, %v3023_v15 }
 0x322   : > { %v9996_v7 = vadd.f32 %v9917_v46, %v3107_v58  ;;  %v3200_v36 = vpop.f32.mrf.mxu3  ;;  %v12177_v46 = vld [vmem:[#allocation38_spill] sm:$0xff] }
 0x324   : > { %v3111_v42 = vpop.f32.mrf.mxu2 }
 0x325   : > { %v2981_v43 = vpop.f32.mrf.mxu0  ;;  %v3025_v27 = vpop.f32.mrf.mxu1 }
 0x326   : > { %v10003_v20 = vadd.f32 %v2981_v43, %v9766_v60  ;;  %v3026_v39 = vadd.f32 %v3025_v27, %v9735_v33 }
 0x327   : > { %3986 = vmatmul.bf16.gmra.mxu3 %v9654_v40 }
 0x328   : > { %v3110_v1 = vadd.f32 %v3109_v17, %v3026_v39  ;;  %3064 = vmatmul.bf16.gmra.mxu1 %v10000_v31  ;;  %3764 = vmatmul.bf16.gmra.mxu0 %v12176_v11  ;;  %v12181_v39 = vld [vmem:[#allocation37_spill] sm:$0xff] }
 0x329   : > { %3897 = vmatmul.bf16.vlgmr.msra.gmra.mxu2 %v12177_v46 }
 0x32a   : > { %v10010_v2 = vadd.f32 %v3193_v62, %v3110_v1  ;;  %v3203_v47 = vpop.f32.mrf.mxu3 }
 0x32c   : > { %v3114_v10 = vpop.f32.mrf.mxu2 }
 0x32d   : > { %v2983_v15 = vpop.f32.mrf.mxu0  ;;  %v3027_v12 = vpop.f32.mrf.mxu1 }
 0x32e   : > { %v10013_v60 = vadd.f32 %v2983_v15, %v9777_v44  ;;  %v3028_v33 = vadd.f32 %v3027_v12, %v9745_v19  ;;  %v7374_v44 = vld [vmem:[%s11511_s2 + $0x470] sm:$0xff] }
 0x32f   : > { %4142 = vmatpush.bf16.msrb.mxu1 %v7374_v44  ;;  %v12185_v44 = vld [vmem:[#allocation23_spill] sm:$0xff] }
 0x330   : > { %v3112_v17 = vadd.f32 %v3111_v42, %v3028_v33  ;;  %v12179_v42 = vld [vmem:[#allocation74_spill] sm:$0xff] }
 0x332   : > { %v10016_v58 = vadd.f32 %v3195_v9, %v3112_v17  ;;  %v3205_v40 = vpop.f32.mrf.mxu3  ;;  %v12180_v9 = vld [vmem:[#allocation25_spill] sm:$0xff] }
 0x334   : > { %12178 = vst [vmem:[#allocation104_spill] sm:$0xff] %v10016_v58  ;;  %v3116_v5 = vpop.f32.mrf.mxu2 }
 0x335   : > { %v3030_v62 = vpop.f32.mrf.mxu1  ;;  %v10021_v43 = vpop.f32.mrf.mxu0 }
 0x336   : > { %v3031_v27 = vadd.f32 %v3030_v62, %v9760_v41 }
 0x337   : > { %3991 = vmatmul.bf16.gmra.mxu3 %v9696_v6 }
 0x338   : > { %v3115_v19 = vadd.f32 %v3114_v10, %v3031_v27  ;;  %3769 = vmatmul.bf16.gmra.mxu0 %v12179_v42  ;;  %3813 = vmatmul.bf16.vlgmr.msra.gmra.mxu1 %v12180_v9  ;;  %v12186_v42 = vld [vmem:[#allocation75_spill] sm:$0xff] }
 0x339   : > { %3902 = vmatmul.bf16.gmra.mxu2 %v12181_v39 }
 0x33a   : > { %v10031_v1 = vadd.f32 %v3198_v18, %v3115_v19  ;;  %v3208_v46 = vpop.f32.mrf.mxu3  ;;  %v12184_v19 = vld [vmem:[#allocation10_spill] sm:$0xff] }
 0x33c   : > { %12182 = vst [vmem:[#allocation98_spill] sm:$0xff] %v10031_v1  ;;  %v3119_v11 = vpop.f32.mrf.mxu2  ;;  %v12243_v1 = vld [vmem:[#allocation14_spill] sm:$0xff] }
 0x33d   : > { %v3032_v15 = vpop.f32.mrf.mxu1  ;;  %v10033_v41 = vpop.f32.mrf.mxu0 }
 0x33e   : > { %v3033_v12 = vadd.f32 %v3032_v15, %v9770_v61 }
 0x340   : > { %v3117_v33 = vadd.f32 %v3116_v5, %v3033_v12 }
 0x342   : > { %v10036_v10 = vadd.f32 %v3200_v36, %v3117_v33  ;;  %v3210_v50 = vpop.f32.mrf.mxu3 }
 0x344   : > { %12183 = vst [vmem:[#allocation100_spill] sm:$0xff] %v10036_v10  ;;  %v3121_v17 = vpop.f32.mrf.mxu2 }
 0x345   : > { %v3035_v62 = vpop.f32.mrf.mxu1  ;;  %v10038_v27 = vpop.f32.mrf.mxu0 }
 0x346   : > { %v3036_v6 = vadd.f32 %v3035_v62, %v9787_v32 }
 0x347   : > { %3996 = vmatmul.bf16.gmra.mxu3 %v12120_v51  ;;  %v7373_v51 = vld [vmem:[%s11511_s2 + $0x468] sm:$0xff] }
 0x348   : > { %v3120_v18 = vadd.f32 %v3119_v11, %v3036_v6  ;;  %3774 = vmatmul.bf16.gmra.mxu0 %v12184_v19  ;;  %3818 = vmatmul.bf16.gmra.mxu1 %v12185_v44  ;;  %v7365_v11 = vld [vmem:[%s11511_s2 + $0x428] sm:$0xff]  ;;  %v12191_v19 = vld [vmem:[#allocation56_spill] sm:$0xff] }
 0x349   : > { %3907 = vmatmul.bf16.gmra.mxu2 %v12186_v42  ;;  %4059 = vmatpush.bf16.msra.mxu0 %v7365_v11 }
 0x34a   : > { %v10045_v61 = vadd.f32 %v3203_v47, %v3120_v18  ;;  %v3213_v5 = vpop.f32.mrf.mxu3  ;;  %4143 = vmatpush.bf16.msrb.mxu1 %v7373_v51  ;;  %v12190_v18 = vld [vmem:[#allocation31_spill] sm:$0xff] }
 0x34c   : > { %12187 = vst [vmem:[#allocation40_spill] sm:$0xff] %v10045_v61  ;;  %v3124_v36 = vpop.f32.mrf.mxu2 }
 0x34d   : > { %v3037_v9 = vpop.f32.mrf.mxu1  ;;  %v10047_v39 = vpop.f32.mrf.mxu0 }
 0x34e   : > { %v3038_v15 = vadd.f32 %v3037_v9, %v9797_v45 }
 0x350   : > { %v3122_v12 = vadd.f32 %v3121_v17, %v3038_v15 }
 0x352   : > { %v10050_v32 = vadd.f32 %v3205_v40, %v3122_v12  ;;  %v3215_v33 = vpop.f32.mrf.mxu3  ;;  %v12189_v40 = vld [vmem:[#allocation91_spill] sm:$0xff] }
 0x354   : > { %12188 = vst [vmem:[#allocation32_spill] sm:$0xff] %v10050_v32  ;;  %v3126_v47 = vpop.f32.mrf.mxu2 }
 0x355   : > { %v3040_v62 = vpop.f32.mrf.mxu1  ;;  %v10058_v6 = vpop.f32.mrf.mxu0 }
 0x356   : > { %v3041_v45 = vadd.f32 %v3040_v62, %v9811_v38 }
 0x357   : > { %4001 = vmatmul.bf16.gmra.mxu3 %v9753_v49 }
 0x358   : > { %v3125_v17 = vadd.f32 %v3124_v36, %v3041_v45  ;;  %3779 = vmatmul.bf16.gmra.mxu0 %v12189_v40  ;;  %3823 = vmatmul.bf16.gmra.mxu1 %v12190_v18 }
 0x359   : > { %3912 = vmatmul.bf16.gmra.mxu2 %v12191_v19 }
 0x35a   : > { %v10065_v44 = vadd.f32 %v3208_v46, %v3125_v17  ;;  %v3218_v9 = vpop.f32.mrf.mxu3  ;;  %v12194_v46 = vld [vmem:[#allocation29_spill] sm:$0xff]  ;;  %v12195_v17 = vld [vmem:[#allocation46_spill] sm:$0xff] }
 0x35c   : > { %12192 = vst [vmem:[#allocation45_spill] sm:$0xff] %v10065_v44  ;;  %v3129_v42 = vpop.f32.mrf.mxu2 }
 0x35d   : > { %v3042_v15 = vpop.f32.mrf.mxu1  ;;  %v10067_v12 = vpop.f32.mrf.mxu0 }
 0x35e   : > { %v3043_v11 = vadd.f32 %v3042_v15, %v9824_v37 }
 0x360   : > { %v3127_v51 = vadd.f32 %v3126_v47, %v3043_v11  ;;  %v7364_v11 = vld [vmem:[%s11511_s2 + $0x420] sm:$0xff] }
 0x361   : > { %4060 = vmatpush.bf16.msra.mxu0 %v7364_v11  ;;  %v12199_v11 = vld [vmem:[#allocation84_spill] sm:$0xff] }
 0x362   : > { %v10070_v38 = vadd.f32 %v3210_v50, %v3127_v51  ;;  %v3220_v62 = vpop.f32.mrf.mxu3 }
 0x364   : > { %12193 = vst [vmem:[#allocation34_spill] sm:$0xff] %v10070_v38  ;;  %v3131_v36 = vpop.f32.mrf.mxu2 }
 0x365   : > { %v3045_v45 = vpop.f32.mrf.mxu1  ;;  %v10072_v40 = vpop.f32.mrf.mxu0 }
 0x366   : > { %v3046_v18 = vadd.f32 %v3045_v45, %v9839_v52 }
 0x367   : > { %4006 = vmatmul.bf16.gmra.mxu3 %v9781_v29  ;;  %v10093_v29 = vld [vmem:[%s7825_s15 + $0x60] sm:$0xff] }
 0x368   : > { %v3130_v49 = vadd.f32 %v3129_v42, %v3046_v18  ;;  %3784 = vmatmul.bf16.gmra.mxu0 %v12194_v46  ;;  %3828 = vmatmul.bf16.gmra.mxu1 %v12195_v17  ;;  %v11782_v46 = vunpack.c.h.b16 %v10093_v29 }
 0x369   : > { %3917 = vmatmul.bf16.gmra.mxu2 %v9517_v34  ;;  %v7372_v34 = vld [vmem:[%s11511_s2 + $0x460] sm:$0xff] }
 0x36a   : > { %v10079_v37 = vadd.f32 %v3213_v5, %v3130_v49  ;;  %v3223_v47 = vpop.f32.mrf.mxu3  ;;  %v10096_v5 = vld [vmem:[%s7825_s15 + $0x68] sm:$0xff]  ;;  %4144 = vmatpush.bf16.msrb.mxu1 %v7372_v34 }
 0x36b   : > { %v3243_v17 = vunpack.c.l.b16 %v10096_v5  ;;  %v11783_v34 = vunpack.c.h.b16 %v10096_v5 }
 0x36c   : > { %12196 = vst [vmem:[#allocation108_spill] sm:$0xff] %v10079_v37  ;;  %v3134_v50 = vpop.f32.mrf.mxu2 }
 0x36d   : > { %v3047_v19 = vpop.f32.mrf.mxu1  ;;  %v10081_v15 = vpop.f32.mrf.mxu0 }
 0x36e   : > { %v3048_v52 = vadd.f32 %v3047_v19, %v9851_v4  ;;  %v7363_v19 = vld [vmem:[%s11511_s2 + $0x418] sm:$0xff] }
 0x36f   : > { %4061 = vmatpush.bf16.msra.mxu0 %v7363_v19  ;;  %v7360_v19 = vld [vmem:[%s11511_s2 + $0x400] sm:$0xff] }
 0x370   : > { %v3132_v42 = vadd.f32 %v3131_v36, %v3048_v52 }
 0x372   : > { %v10087_v51 = vadd.f32 %v3215_v33, %v3132_v42  ;;  %v3225_v18 = vpop.f32.mrf.mxu3  ;;  %v3241_v33 = vunpack.c.l.b16 %v10093_v29  ;;  %v12198_v42 = vld [vmem:[#allocation13_spill] sm:$0xff] }
 0x374   : > { %12197 = vst [vmem:[#allocation111_spill] sm:$0xff] %v10087_v51  ;;  %v3136_v45 = vpop.f32.mrf.mxu2  ;;  %v10110_v51 = vpack.c.b16 %v3243_v17, %v3241_v33 }
 0x375   : > { %v3050_v4 = vpop.f32.mrf.mxu1  ;;  %v10098_v36 = vpop.f32.mrf.mxu0 }
 0x376   : > { %v3051_v49 = vadd.f32 %v3050_v4, %v9874_v14  ;;  %v10120_v4 = vpack.c.b16 %v11783_v34, %v11782_v46  ;;  %v12202_v46 = vld [vmem:[#allocation22_spill] sm:$0xff] }
 0x377   : > { %4011 = vmatmul.bf16.gmra.mxu3 %v12141_v0  ;;  %v7361_v0 = vld [vmem:[%s11511_s2 + $0x408] sm:$0xff]  ;;  %v3403_v34 = vpack.c.b16 %v3241_v33, %v12202_v46 }
 0x378   : > { %v3135_v52 = vadd.f32 %v3134_v50, %v3051_v49  ;;  %3789 = vmatmul.bf16.gmra.mxu0 %v12198_v42  ;;  %3833 = vmatmul.bf16.gmra.mxu1 %v12199_v11  ;;  %v7362_v50 = vld [vmem:[%s11511_s2 + $0x410] sm:$0xff] }
 0x379   : > { %3922 = vmatmul.bf16.gmra.mxu2 %v9545_v26  ;;  %4062 = vmatpush.bf16.msra.mxu0 %v7362_v50 }
 0x37a   : > { %v10114_v14 = vadd.f32 %v3218_v9, %v3135_v52  ;;  %v3228_v42 = vpop.f32.mrf.mxu3 }
 0x37c   : > { %12200 = vst [vmem:[#allocation93_spill] sm:$0xff] %v10114_v14  ;;  %v3139_v49 = vpop.f32.mrf.mxu2 }
 0x37d   : > { %v3052_v11 = vpop.f32.mrf.mxu1  ;;  %v10125_v37 = vpop.f32.mrf.mxu0  ;;  %4063 = vmatpush.bf16.msra.mxu0 %v7361_v0 }
 0x37e   : > { %v3053_v26 = vadd.f32 %v3052_v11, %v9901_v56 }
 0x380   : > { %v3137_v9 = vadd.f32 %v3136_v45, %v3053_v26 }
 0x381   : > { %4064 = vmatpush.bf16.msra.mxu0 %v7360_v19 }
 0x382   : > { %v10131_v52 = vadd.f32 %v3220_v62, %v3137_v9  ;;  %v3230_v38 = vpop.f32.mrf.mxu3  ;;  %v12203_v62 = vld [vmem:[#allocation61_spill] sm:$0xff]  ;;  %v10148_v9 = vld [vmem:[%s7825_s15 + $0x70] sm:$0xff] }
 0x384   : > { %12201 = vst [vmem:[#allocation102_spill] sm:$0xff] %v10131_v52  ;;  %v3141_v14 = vpop.f32.mrf.mxu2  ;;  %v3257_v52 = vshll.u32 %v10110_v51, 16 }
 0x385   : > { %v3055_v44 = vpop.f32.mrf.mxu1  ;;  %v10137_v56 = vpop.f32.mrf.mxu0 }
 0x386   : > { %v3056_v50 = vadd.f32 %v3055_v44, %v9929_v16 }
 0x387   : > { %4016 = vmatmul.bf16.gmra.mxu3 %v9833_v25 }
 0x388   : > { %v3140_v11 = vadd.f32 %v3139_v49, %v3056_v50  ;;  %3794 = vmatmul.bf16.gmra.mxu0 %v3403_v34  ;;  %3838 = vmatmul.bf16.gmra.mxu1 %v12203_v62  ;;  %v11784_v34 = vunpack.c.l.b16 %v10148_v9  ;;  %v12206_v62 = vld [vmem:[#allocation64_spill] sm:$0xff] }
 0x389   : > { %3927 = vmatmul.bf16.gmra.mxu2 %v12076_v59  ;;  %v7371_v59 = vld [vmem:[%s11511_s2 + $0x458] sm:$0xff] }
 0x38a   : > { %v10143_v45 = vadd.f32 %v3223_v47, %v3140_v11  ;;  %v3233_v46 = vpop.f32.mrf.mxu3  ;;  %4145 = vmatpush.bf16.msrb.mxu1 %v7371_v59  ;;  %v3409_v25 = vpack.c.b16 %v11784_v34, %v3243_v17 }
 0x38c   : > { %12204 = vst [vmem:[#allocation48_spill] sm:$0xff] %v10143_v45  ;;  %v3144_v33 = vpop.f32.mrf.mxu2 }
 0x38d   : > { %v3057_v26 = vpop.f32.mrf.mxu1  ;;  %v10145_v0 = vpop.f32.mrf.mxu0 }
 0x38e   : > { %v3058_v16 = vadd.f32 %v3057_v26, %v9952_v55 }
 0x390   : > { %v3142_v44 = vadd.f32 %v3141_v14, %v3058_v16 }
 0x392   : > { %v10155_v49 = vadd.f32 %v3225_v18, %v3142_v44  ;;  %v3235_v19 = vpop.f32.mrf.mxu3 }
 0x394   : > { %12205 = vst [vmem:[#allocation81_spill] sm:$0xff] %v10155_v49  ;;  %v3146_v47 = vpop.f32.mrf.mxu2 }
 0x395   : > { %v3060_v50 = vpop.f32.mrf.mxu1  ;;  %v10159_v11 = vpop.f32.mrf.mxu0 }
 0x396   : > { %v3061_v55 = vadd.f32 %v3060_v50, %v9974_v24 }
 0x397   : > { %4021 = vmatmul.bf16.gmra.mxu3 %v9863_v54 }
 0x398   : > { %v3145_v14 = vadd.f32 %v3144_v33, %v3061_v55  ;;  %3799 = vmatmul.bf16.gmra.mxu0 %v3409_v25  ;;  %3843 = vmatmul.bf16.gmra.mxu1 %v12206_v62  ;;  %v12211_v55 = vld [vmem:[#allocation21_spill] sm:$0xff] }
 0x399   : > { %3932 = vmatmul.bf16.gmra.mxu2 %v9593_v28 }
 0x39a   : > { %v10165_v18 = vadd.f32 %v3228_v42, %v3145_v14  ;;  %v3982_v16 = vpop.f32.mrf.mxu3  ;;  %v12210_v42 = vld [vmem:[#allocation65_spill] sm:$0xff] }
 0x39c   : > { %12207 = vst [vmem:[#allocation117_spill] sm:$0xff] %v10165_v18  ;;  %v3149_v26 = vpop.f32.mrf.mxu2 }
 0x39d   : > { %v3062_v17 = vpop.f32.mrf.mxu1  ;;  %v10167_v44 = vpop.f32.mrf.mxu0 }
 0x39e   : > { %v3063_v59 = vadd.f32 %v3062_v17, %v9991_v21 }
 0x3a0   : > { %v3147_v34 = vadd.f32 %v3146_v47, %v3063_v59 }
 0x3a2   : > { %v10170_v49 = vadd.f32 %v3230_v38, %v3147_v34  ;;  %v3984_v33 = vpop.f32.mrf.mxu3 }
 0x3a4   : > { %12208 = vst [vmem:[#allocation112_spill] sm:$0xff] %v10170_v49  ;;  %v3151_v24 = vpop.f32.mrf.mxu2  ;;  %v12227_v49 = vld [vmem:[#allocation107_spill] sm:$0xff] }
 0x3a5   : > { %v3065_v25 = vpop.f32.mrf.mxu1  ;;  %v10172_v50 = vpop.f32.mrf.mxu0 }
 0x3a6   : > { %12209 = vst [vmem:[#allocation114_spill] sm:$0xff] %v10172_v50  ;;  %v3066_v28 = vadd.f32 %v3065_v25, %v10003_v20  ;;  %v7370_v20 = vld [vmem:[%s11511_s2 + $0x450] sm:$0xff] }
 0x3a7   : > { %4026 = vmatmul.bf16.gmra.mxu3 %v12165_v22  ;;  %4146 = vmatpush.bf16.msrb.mxu1 %v7370_v20 }
 0x3a8   : > { %v3150_v54 = vadd.f32 %v3149_v26, %v3066_v28  ;;  %3848 = vmatmul.bf16.gmra.mxu1 %v12210_v42  ;;  %4065 = vmatmul.bf16.vlgmr.msra.gmra.mxu0 %v12086_v57  ;;  %v12217_v42 = vld [vmem:[#allocation30_spill] sm:$0xff] }
 0x3a9   : > { %3937 = vmatmul.bf16.gmra.mxu2 %v12211_v55 }
 0x3aa   : > { %v10179_v21 = vadd.f32 %v3233_v46, %v3150_v54  ;;  %v3987_v34 = vpop.f32.mrf.mxu3  ;;  %v12216_v54 = vld [vmem:[#allocation83_spill] sm:$0xff] }
 0x3ac   : > { %12212 = vst [vmem:[#allocation51_spill] sm:$0xff] %v10179_v21  ;;  %v3898_v38 = vpop.f32.mrf.mxu2  ;;  %v12226_v21 = vld [vmem:[#allocation67_spill] sm:$0xff] }
 0x3ad   : > { %v3067_v47 = vpop.f32.mrf.mxu1  ;;  %v10181_v14 = vpop.f32.mrf.mxu0 }
 0x3ae   : > { %12213 = vst [vmem:[#allocation63_spill] sm:$0xff] %v10181_v14  ;;  %v3068_v62 = vadd.f32 %v3067_v47, %v10013_v60  ;;  %v12218_v60 = vld [vmem:[#allocation99_spill] sm:$0xff] }
 0x3b0   : > { %v3152_v26 = vadd.f32 %v3151_v24, %v3068_v62 }
 0x3b2   : > { %v10187_v57 = vadd.f32 %v3235_v19, %v3152_v26  ;;  %v3989_v59 = vpop.f32.mrf.mxu3 }
 0x3b4   : > { %12214 = vst [vmem:[#allocation57_spill] sm:$0xff] %v10187_v57  ;;  %v3900_v17 = vpop.f32.mrf.mxu2 }
 0x3b5   : > { %v10189_v22 = vpop.f32.mrf.mxu0  ;;  %v3814_v46 = vpop.f32.mrf.mxu1 }
 0x3b6   : > { %12215 = vst [vmem:[#allocation119_spill] sm:$0xff] %v10189_v22  ;;  %v3815_v25 = vadd.f32 %v3814_v46, %v10021_v43 }
 0x3b7   : > { %4031 = vmatmul.bf16.gmra.mxu3 %v9968_v3 }
 0x3b8   : > { %v3899_v28 = vadd.f32 %v3898_v38, %v3815_v25  ;;  %3853 = vmatmul.bf16.gmra.mxu1 %v12216_v54  ;;  %4070 = vmatmul.bf16.gmra.mxu0 %v12217_v42 }
 0x3b9   : > { %3942 = vmatmul.bf16.gmra.mxu2 %v12218_v60  ;;  %v12223_v60 = vld [vmem:[#allocation44_spill] sm:$0xff] }
 0x3ba   : > { %v10196_v24 = vadd.f32 %v3982_v16, %v3899_v28  ;;  %v3992_v55 = vpop.f32.mrf.mxu3  ;;  %v12221_v16 = vld [vmem:[#allocation11_spill] sm:$0xff]  ;;  %v12222_v28 = vld [vmem:[#allocation16_spill] sm:$0xff] }
 0x3bc   : > { %v3903_v19 = vpop.f32.mrf.mxu2 }
 0x3bd   : > { %v10198_v47 = vpop.f32.mrf.mxu0  ;;  %v3816_v62 = vpop.f32.mrf.mxu1 }
 0x3be   : > { %12219 = vst [vmem:[#allocation28_spill] sm:$0xff] %v10198_v47  ;;  %v3817_v20 = vadd.f32 %v3816_v62, %v10033_v41 }
 0x3c0   : > { %v3901_v26 = vadd.f32 %v3900_v17, %v3817_v20 }
 0x3c2   : > { %v10201_v43 = vadd.f32 %v3984_v33, %v3901_v26  ;;  %v3994_v46 = vpop.f32.mrf.mxu3  ;;  %v7369_v33 = vld [vmem:[%s11511_s2 + $0x448] sm:$0xff] }
 0x3c3   : > { %4147 = vmatpush.bf16.msrb.mxu1 %v7369_v33 }
 0x3c4   : > { %v3905_v38 = vpop.f32.mrf.mxu2 }
 0x3c5   : > { %v10203_v25 = vpop.f32.mrf.mxu0  ;;  %v3819_v54 = vpop.f32.mrf.mxu1 }
 0x3c6   : > { %12220 = vst [vmem:[#allocation80_spill] sm:$0xff] %v10203_v25  ;;  %v3820_v42 = vadd.f32 %v3819_v54, %v10038_v27 }
 0x3c7   : > { %4036 = vmatmul.bf16.gmra.mxu3 %v10000_v31 }
 0x3c8   : > { %v3904_v3 = vadd.f32 %v3903_v19, %v3820_v42  ;;  %3858 = vmatmul.bf16.gmra.mxu1 %v12221_v16  ;;  %4075 = vmatmul.bf16.gmra.mxu0 %v12222_v28  ;;  %v3246_v28 = vunpack.c.h.b16 %v10148_v9 }
 0x3c9   : > { %3947 = vmatmul.bf16.gmra.mxu2 %v12223_v60 }
 0x3ca   : > { %v10210_v41 = vadd.f32 %v3987_v34, %v3904_v3  ;;  %v10215_v62 = vpop.f32.mrf.mxu3  ;;  %v414_v34 = vld [vmem:[%s7825_s15 + $0x78] sm:$0x11]  ;;  %s5927_s15 = sadd.s32 %s7448_s29, %s7219_s13 }
 0x3cb   : > { %v3249_v60 = vunpack.c.h.b16 %v414_v34  ;;  %s7220_s19 = sshll.u32 %s5927_s15, 2 }
 0x3cc   : > { %v3908_v17 = vpop.f32.mrf.mxu2  ;;  %s5929_s17 = scalar_lea.hbm %s11515_s6, %s7220_s19 }
 0x3cd   : > { %v10217_v27 = vpop.f32.mrf.mxu0  ;;  %v3821_v19 = vpop.f32.mrf.mxu1  ;;  %s5932_s9 = sshll.u32 %s5929_s17, 4  ;;  %s5933_s9 = int_to_ptr.hbm [resolvable:$true] %s5932_s9 }
 0x3ce   : > { %12224 = vst [vmem:[#allocation68_spill] sm:$0xff] %v10217_v27  ;;  %v3822_v20 = vadd.f32 %v3821_v19, %v10047_v39  ;;  %v12228_v39 = vld [vmem:[#allocation71_spill] sm:$0xff] }
 0x3d0   : > { %v3906_v26 = vadd.f32 %v3905_v38, %v3822_v20  ;;  %v10233_v38 = vpack.c.b16 %v3249_v60, %v3246_v28  ;;  %v3269_v20 = vshll.u32 %v10120_v4, 16 }
 0x3d2   : > { %v10220_v54 = vadd.f32 %v3989_v59, %v3906_v26  ;;  %v10222_v31 = vpop.f32.mrf.mxu3  ;;  %v12229_v59 = vld [vmem:[#allocation110_spill] sm:$0xff]  ;;  %v3274_v60 = vshll.u32 %v10233_v38, 16 }
 0x3d4   : > { %v3910_v42 = vpop.f32.mrf.mxu2 }
 0x3d5   : > { %v10225_v3 = vpop.f32.mrf.mxu0  ;;  %v3824_v16 = vpop.f32.mrf.mxu1 }
 0x3d6   : > { %12225 = vst [vmem:[#allocation72_spill] sm:$0xff] %v10225_v3  ;;  %v3825_v33 = vadd.f32 %v3824_v16, %v10058_v6  ;;  %v3248_v16 = vunpack.c.l.b16 %v414_v34 }
 0x3d7   : > { %4041 = vmatmul.bf16.gmra.mxu3 %v12229_v59  ;;  %v12231_v59 = vunpack.c.l.b16 %v10148_v9 }
 0x3d8   : > { %v3909_v57 = vadd.f32 %v3908_v17, %v3825_v33  ;;  %3863 = vmatmul.bf16.gmra.mxu1 %v12226_v21  ;;  %4080 = vmatmul.bf16.gmra.mxu0 %v12227_v49  ;;  %v3267_v21 = vshrl.u32 %v10120_v4, 16  ;;  %v3271_v49 = vrot.slane %v3269_v20, 1 }
 0x3d9   : > { %3952 = vmatmul.bf16.gmra.mxu2 %v12228_v39  ;;  %v10249_v45 = vpack.c.b16 %v3248_v16, %v12231_v59  ;;  %v3259_v16 = vrot.slane %v3257_v52, 1 }
 0x3da   : > { %v10235_v19 = vadd.f32 %v3992_v55, %v3909_v57  ;;  %v10240_v18 = vpop.f32.mrf.mxu3  ;;  %v3272_v39 = vor.u32 %v3271_v49, %v3267_v21  ;;  %v3276_v55 = vrot.slane %v3274_v60, 1  ;;  %v3255_v49 = vshrl.u32 %v10110_v51, 16  ;;  %v12236_v60 = vld [vmem:[#allocation120_spill] sm:$0xff] }
 0x3dc   : > { %v10238_v26 = vpop.f32.mrf.mxu2 }
 0x3dd   : > { %v10242_v6 = vpop.f32.mrf.mxu0  ;;  %v3826_v17 = vpop.f32.mrf.mxu1 }
 0x3de   : > { %12230 = vst [vmem:[#allocation41_spill] sm:$0xff] %v10242_v6  ;;  %v3827_v33 = vadd.f32 %v3826_v17, %v10067_v12  ;;  %v3277_v6 = vsel %vm575_vm0, %v3272_v39, %v3276_v55  ;;  %v12237_v39 = vld [vmem:[#allocation113_spill] sm:$0xff] }
 0x3df   : > { %v3291_v27 = vunpack.c.l.b16 %v3277_v6 }
 0x3e0   : > { %v3911_v57 = vadd.f32 %v3910_v42, %v3827_v33  ;;  %v12233_v42 = vld [vmem:[#allocation115_spill] sm:$0xff] }
 0x3e1   : > { %v12234_v21 = vunpack.c.l.b16 %v12233_v42  ;;  %v12235_v33 = vld [vmem:[#allocation15_spill] sm:$0xff] }
 0x3e2   : > { %v10252_v3 = vadd.f32 %v3994_v46, %v3911_v57  ;;  %v10257_v34 = vpop.f32.mrf.mxu3  ;;  %v3262_v46 = vshll.u32 %v10249_v45, 16  ;;  %v3260_v57 = vor.u32 %v3259_v16, %v3255_v49  ;;  %v3295_v16 = vunpack.c.h.b16 %v3277_v6 }
 0x3e3   : > { %v3406_v9 = vpack.c.b16 %v3291_v27, %v12234_v21  ;;  %v3278_v6 = vshrl.u32 %v10249_v45, 16 }
 0x3e4   : > { %v10255_v20 = vpop.f32.mrf.mxu2  ;;  %v3264_v59 = vrot.slane %v3262_v46, 1 }
 0x3e5   : > { %v10259_v12 = vpop.f32.mrf.mxu0  ;;  %v10261_v17 = vpop.f32.mrf.mxu1 }
 0x3e6   : > { %12232 = vst [vmem:[#allocation18_spill] sm:$0xff] %v10259_v12  ;;  %v7368_v12 = vld [vmem:[%s11511_s2 + $0x440] sm:$0xff] }
 0x3e7   : > { %4046 = vmatmul.bf16.gmra.mxu3 %v3406_v9  ;;  %4148 = vmatpush.bf16.msrb.mxu1 %v7368_v12  ;;  %v12240_v12 = vld [vmem:[#allocation116_spill] sm:$0xff] }
 0x3e8   : > { %3868 = vmatmul.bf16.gmra.mxu1 %v12235_v33  ;;  %4085 = vmatmul.bf16.gmra.mxu0 %v12236_v60  ;;  %v3265_v33 = vsel %vm575_vm0, %v3260_v57, %v3264_v59  ;;  %v3281_v60 = vshrl.u32 %v10233_v38, 16  ;;  %v12242_v57 = vunpack.c.h.b16 %v10096_v5 }
 0x3e9   : > { %3957 = vmatmul.bf16.gmra.mxu2 %v12237_v39  ;;  %v3290_v49 = vunpack.c.l.b16 %v3265_v33 }
 0x3ea   : > { %v10275_v27 = vpop.f32.mrf.mxu3  ;;  %v3283_v9 = vor.u32 %v3281_v60, %v3276_v55  ;;  %v3410_v22 = vpack.c.b16 %v3246_v28, %v12242_v57  ;;  %v12244_v55 = vld [vmem:[#allocation24_spill] sm:$0xff]  ;;  %v12246_v28 = vld [vmem:[#allocation105_spill] sm:$0xff] }
 0x3ec   : > { %v10273_v42 = vpop.f32.mrf.mxu2  ;;  %v3299_v46 = vunpack.c.l.b16 %v3283_v9 }
 0x3ed   : > { %v10277_v52 = vpop.f32.mrf.mxu0  ;;  %v10279_v21 = vpop.f32.mrf.mxu1 }
 0x3ee   : > { %12238 = vst [vmem:[#allocation122_spill] sm:$0xff] %v10277_v52  ;;  %v12241_v52 = vunpack.c.l.b16 %v12240_v12  ;;  %v3412_v10 = vpack.c.b16 %v3299_v46, %v3295_v16 }
 0x3f0   : > { %v3405_v47 = vpack.c.b16 %v3290_v49, %v12241_v52  ;;  %v3280_v52 = vor.u32 %v3278_v6, %v3264_v59  ;;  %v3294_v49 = vunpack.c.h.b16 %v3265_v33  ;;  %v7407_v59 = vld [vmem:[%s11513_s4 + $0xf8] sm:$0xff] }
 0x3f1   : > { %5026 = vmatpush.bf16.msrb.mxu2 %v7407_v59 }
 0x3f2   : > { %v10285_v32 = vpop.f32.mrf.mxu3  ;;  %v3298_v5 = vunpack.c.l.b16 %v3280_v52 }
 0x3f4   : > { %v10283_v39 = vpop.f32.mrf.mxu2 }
 0x3f5   : > { %v10287_v25 = vpop.f32.mrf.mxu0  ;;  %v10289_v61 = vpop.f32.mrf.mxu1 }
 0x3f6   : > { %12239 = vst [vmem:[#allocation33_spill] sm:$0xff] %v10287_v25 }
 0x3f7   : > { %4051 = vmatmul.bf16.gmra.mxu3 %v3412_v10 }
 0x3f8   : > { %3873 = vmatmul.bf16.gmra.mxu1 %v12243_v1  ;;  %4090 = vmatmul.bf16.gmra.mxu0 %v12244_v55  ;;  %v12247_v1 = vunpack.c.h.b16 %v10093_v29  ;;  %v3411_v55 = vpack.c.b16 %v3298_v5, %v3294_v49  ;;  %v7415_v29 = vld [vmem:[%s11513_s4 + $0x138] sm:$0xff] }
 0x3f9   : > { %3962 = vmatmul.bf16.gmra.mxu2 %v3405_v47  ;;  %5075 = vmatpush.bf16.msra.mxu3 %v7415_v29 }
 0x3fa   : > { %v10300_v9 = vpop.f32.mrf.mxu3  ;;  %v3404_v16 = vpack.c.b16 %v12247_v1, %v12246_v28 }
 0x3fc   : > { %v10298_v60 = vpop.f32.mrf.mxu2 }
 0x3fd   : > { %v10302_v25 = vpop.f32.mrf.mxu0  ;;  %v10304_v12 = vpop.f32.mrf.mxu1 }
 0x3fe   : > { %12245 = vst [vmem:[#allocation69_spill] sm:$0xff] %v10302_v25  ;;  %v12250_v25 = vld [vmem:[#allocation118_spill] sm:$0xff] }
 0x402   : > { %v10311_v47 = vpop.f32.mrf.mxu3 }
 0x403   : > { %12248 = vst [vmem:[#allocation47_spill] sm:$0xff] %v10311_v47 }
 0x404   : > { %v10309_v46 = vpop.f32.mrf.mxu2 }
 0x405   : > { %v10313_v10 = vpop.f32.mrf.mxu0  ;;  %v10315_v57 = vpop.f32.mrf.mxu1 }
 0x406   : > { %12249 = vst [vmem:[#allocation90_spill] sm:$0xff] %v10313_v10 }
 0x408   : > { %3878 = vmatmul.bf16.gmra.mxu1 %v3404_v16  ;;  %4095 = vmatmul.bf16.gmra.mxu0 %v12250_v25 }
 0x409   : > { %3967 = vmatmul.bf16.gmra.mxu2 %v3411_v55 }
 0x40a   : > { %v10326_v6 = vpop.f32.mrf.mxu3 }
 0x40b   : > { %12251 = vst [vmem:[#allocation78_spill] sm:$0xff] %v10326_v6 }
 0x40c   : > { %v10324_v33 = vpop.f32.mrf.mxu2 }
 0x40d   : > { %v10328_v52 = vpop.f32.mrf.mxu0  ;;  %v10330_v49 = vpop.f32.mrf.mxu1 }
 0x40e   : > { %12252 = vst [vmem:[#allocation79_spill] sm:$0xff] %v10328_v52 }
 0x412   : > { %v10334_v5 = vpop.f32.mrf.mxu3 }
 0x413   : > { %12253 = vst [vmem:[#allocation49_spill] sm:$0xff] %v10334_v5 }
 0x414   : > { %v10332_v25 = vpop.f32.mrf.mxu2 }
 0x415   : > { %v10336_v28 = vpop.f32.mrf.mxu0  ;;  %v10338_v1 = vpop.f32.mrf.mxu1 }
 0x418   : > { %3883 = vmatmul.bf16.gmra.mxu1 %v3410_v22  ;;  %4100 = vmatmul.bf16.gmra.mxu0 %v9805_v23  ;;  %v12259_v23 = vld [vmem:[#allocation19_spill] sm:$0xff]  ;;  %v7406_v22 = vld [vmem:[%s11513_s4 + $0xf0] sm:$0xff] }
 0x419   : > { %5027 = vmatpush.bf16.msrb.mxu2 %v7406_v22 }
 0x41a   : > { %v10343_v55 = vpop.f32.mrf.mxu3 }
 0x41b   : > { %12255 = vst [vmem:[#allocation82_spill] sm:$0xff] %v10343_v55  ;;  %v7414_v55 = vld [vmem:[%s11513_s4 + $0x130] sm:$0xff] }
 0x41c   : > { %v10341_v16 = vpop.f32.mrf.mxu2  ;;  %5076 = vmatpush.bf16.msra.mxu3 %v7414_v55  ;;  %v12265_v55 = vld [vmem:[#allocation55_spill] sm:$0xff] }
 0x41d   : > { %12254 = vst [vmem:[#allocation87_spill] sm:$0xff] %v10341_v16  ;;  %v10345_v59 = vpop.f32.mrf.mxu0  ;;  %v10347_v29 = vpop.f32.mrf.mxu1 }
 0x422   : > { %v10356_v6 = vpop.f32.mrf.mxu3 }
 0x423   : > { %12258 = vst [vmem:[#allocation58_spill] sm:$0xff] %v10356_v6 }
 0x424   : > { %v10349_v52 = vpop.f32.mrf.mxu2 }
 0x425   : > { %12256 = vst [vmem:[#allocation95_spill] sm:$0xff] %v10349_v52  ;;  %v10351_v10 = vpop.f32.mrf.mxu1  ;;  %v4066_v5 = vpop.f32.mrf.mxu0 }
 0x426   : > { %12257 = vst [vmem:[#allocation86_spill] sm:$0xff] %v10351_v10  ;;  %v10354_v14 = vadd.f32 %v4066_v5, %v10196_v24 }
 0x428   : > { %4105 = vmatmul.bf16.gmra.mxu0 %v9836_v30  ;;  %4149 = vmatmul.bf16.vlgmr.msrb.gmra.mxu1 %v12259_v23 }
 0x42a   : > { %v10373_v30 = vpop.f32.mrf.mxu3 }
 0x42b   : > { %12262 = vst [vmem:[#allocation35_spill] sm:$0xff] %v10373_v30 }
 0x42c   : > { %v10366_v52 = vpop.f32.mrf.mxu2 }
 0x42d   : > { %12260 = vst [vmem:[#allocation26_spill] sm:$0xff] %v10366_v52  ;;  %v10368_v24 = vpop.f32.mrf.mxu1  ;;  %v4068_v5 = vpop.f32.mrf.mxu0 }
 0x42e   : > { %12261 = vst [vmem:[#allocation70_spill] sm:$0xff] %v10368_v24  ;;  %v10371_v6 = vadd.f32 %v4068_v5, %v10201_v43  ;;  %v12311_v24 = vld [vmem:[#allocation12_spill] sm:$0xff] }
 0x432   : > { %v10384_v22 = vpop.f32.mrf.mxu3 }
 0x433   : > { %12266 = vst [vmem:[#allocation59_spill] sm:$0xff] %v10384_v22  ;;  %v7413_v22 = vld [vmem:[%s11513_s4 + $0x128] sm:$0xff] }
 0x434   : > { %v10375_v23 = vpop.f32.mrf.mxu2  ;;  %5077 = vmatpush.bf16.msra.mxu3 %v7413_v22 }
 0x435   : > { %12263 = vst [vmem:[#allocation42_spill] sm:$0xff] %v10375_v23  ;;  %v10377_v58 = vpop.f32.mrf.mxu1  ;;  %v4071_v16 = vpop.f32.mrf.mxu0 }
 0x436   : > { %12264 = vst [vmem:[#allocation96_spill] sm:$0xff] %v10377_v58  ;;  %v10380_v10 = vadd.f32 %v4071_v16, %v10210_v41 }
 0x438   : > { %4110 = vmatmul.bf16.gmra.mxu0 %v12158_v63  ;;  %4154 = vmatmul.bf16.gmra.mxu1 %v12265_v55  ;;  %v7405_v55 = vld [vmem:[%s11513_s4 + $0xe8] sm:$0xff] }
 0x439   : > { %5028 = vmatpush.bf16.msrb.mxu2 %v7405_v55 }
 0x43a   : > { %v10395_v58 = vpop.f32.mrf.mxu3 }
 0x43b   : > { %12270 = vst [vmem:[#allocation66_spill] sm:$0xff] %v10395_v58 }
 0x43c   : > { %v10386_v52 = vpop.f32.mrf.mxu2 }
 0x43d   : > { %12267 = vst [vmem:[#allocation106_spill] sm:$0xff] %v10386_v52  ;;  %v10388_v43 = vpop.f32.mrf.mxu1  ;;  %v4073_v5 = vpop.f32.mrf.mxu0 }
 0x43e   : > { %12268 = vst [vmem:[#allocation101_spill] sm:$0xff] %v10388_v43  ;;  %v10391_v30 = vadd.f32 %v4073_v5, %v10220_v54  ;;  %v12272_v54 = vld [vmem:[#allocation121_spill] sm:$0xff] }
 0x444   : > { %v10393_v23 = vpop.f32.mrf.mxu2 }
 0x445   : > { %12269 = vst [vmem:[#allocation43_spill] sm:$0xff] %v10393_v23  ;;  %v10397_v41 = vpop.f32.mrf.mxu1  ;;  %v4076_v16 = vpop.f32.mrf.mxu0 }
 0x446   : > { %12271 = vst [vmem:[#allocation109_spill] sm:$0xff] %v10397_v41  ;;  %v10400_v63 = vadd.f32 %v4076_v16, %v10235_v19  ;;  %v10417_v23 = vpop.f32.mrf.mxu3 }
 0x447   : > { %12275 = vst [vmem:[#allocation74_spill] sm:$0xff] %v10417_v23 }
 0x448   : > { %4115 = vmatmul.bf16.gmra.mxu0 %v9920_v8  ;;  %4159 = vmatmul.bf16.gmra.mxu1 %v12272_v54  ;;  %v12278_v8 = vld [vmem:[#allocation36_spill] sm:$0xff] }
 0x44c   : > { %v10410_v5 = vpop.f32.mrf.mxu2 }
 0x44d   : > { %12273 = vst [vmem:[#allocation62_spill] sm:$0xff] %v10410_v5  ;;  %v10412_v58 = vpop.f32.mrf.mxu1  ;;  %v4078_v19 = vpop.f32.mrf.mxu0 }
 0x44e   : > { %12274 = vst [vmem:[#allocation38_spill] sm:$0xff] %v10412_v58  ;;  %v10415_v16 = vadd.f32 %v4078_v19, %v10252_v3  ;;  %v10425_v55 = vpop.f32.mrf.mxu3  ;;  %v7404_v3 = vld [vmem:[%s11513_s4 + $0xe0] sm:$0xff] }
 0x44f   : > { %12279 = vst [vmem:[#allocation10_spill] sm:$0xff] %v10425_v55  ;;  %v7412_v19 = vld [vmem:[%s11513_s4 + $0x120] sm:$0xff]  ;;  %5029 = vmatpush.bf16.msrb.mxu2 %v7404_v3  ;;  %v12286_v55 = vld [vmem:[#allocation53_spill] sm:$0xff] }
 0x450   : > { %5078 = vmatpush.bf16.msra.mxu3 %v7412_v19  ;;  %v12290_v19 = vld [vmem:[#allocation88_spill] sm:$0xff] }
 0x454   : > { %v10419_v52 = vpop.f32.mrf.mxu2 }
 0x455   : > { %12276 = vst [vmem:[#allocation25_spill] sm:$0xff] %v10419_v52  ;;  %v10421_v41 = vpop.f32.mrf.mxu1 }
 0x456   : > { %12277 = vst [vmem:[#allocation37_spill] sm:$0xff] %v10421_v41  ;;  %v10437_v23 = vpop.f32.mrf.mxu3 }
 0x457   : > { %12282 = vst [vmem:[#allocation91_spill] sm:$0xff] %v10437_v23 }
 0x458   : > { %4120 = vmatmul.bf16.gmra.mxu0 %v9971_v13  ;;  %4164 = vmatmul.bf16.gmra.mxu1 %v12278_v8  ;;  %v12285_v8 = vld [vmem:[#allocation73_spill] sm:$0xff] }
 0x45c   : > { %v10427_v22 = vpop.f32.mrf.mxu2 }
 0x45d   : > { %12280 = vst [vmem:[#allocation23_spill] sm:$0xff] %v10427_v22  ;;  %v10429_v54 = vpop.f32.mrf.mxu1  ;;  %v3284_v22 = vrot.slane %v10110_v51, 1  ;;  %v12294_v51 = vld [vmem:[#allocation17_spill] sm:$0xff] }
 0x45e   : > { %12281 = vst [vmem:[#allocation75_spill] sm:$0xff] %v10429_v54  ;;  %v3285_v54 = vrot.slane %v10249_v45, 1  ;;  %v10452_v58 = vpop.f32.mrf.mxu3 }
 0x45f   : > { %12289 = vst [vmem:[#allocation13_spill] sm:$0xff] %v10452_v58 }
 0x460   : > { %v3286_v23 = vsel %vm876_vm1, %v3284_v22, %v3285_v54  ;;  %v3300_v22 = vunpack.c.l.b16 %v3285_v54  ;;  %v7391_v54 = vld [vmem:[%s11513_s4 + $0x78] sm:$0xff] }
 0x461   : > { %v3292_v3 = vunpack.c.l.b16 %v3286_v23  ;;  %5366 = vmatpush.bf16.msrb.mxu0 %v7391_v54 }
 0x464   : > { %v10439_v52 = vpop.f32.mrf.mxu2 }
 0x465   : > { %12283 = vst [vmem:[#allocation31_spill] sm:$0xff] %v10439_v52  ;;  %v10441_v13 = vpop.f32.mrf.mxu1  ;;  %v3407_v52 = vpack.c.b16 %v3292_v3, %v12290_v19  ;;  %v7403_v3 = vld [vmem:[%s11513_s4 + $0xd8] sm:$0xff] }
 0x466   : > { %12284 = vst [vmem:[#allocation56_spill] sm:$0xff] %v10441_v13  ;;  %v7411_v19 = vld [vmem:[%s11513_s4 + $0x118] sm:$0xff]  ;;  %5030 = vmatpush.bf16.msrb.mxu2 %v7403_v3 }
 0x467   : > { %5079 = vmatpush.bf16.msra.mxu3 %v7411_v19 }
 0x468   : > { %4125 = vmatmul.bf16.gmra.mxu0 %v12285_v8  ;;  %4169 = vmatmul.bf16.gmra.mxu1 %v12286_v55  ;;  %v10459_v55 = vpop.f32.mrf.mxu3 }
 0x469   : > { %12293 = vst [vmem:[#allocation61_spill] sm:$0xff] %v10459_v55 }
 0x46c   : > { %v10447_v5 = vpop.f32.mrf.mxu2 }
 0x46d   : > { %12287 = vst [vmem:[#allocation29_spill] sm:$0xff] %v10447_v5  ;;  %v10449_v41 = vpop.f32.mrf.mxu1 }
 0x46e   : > { %12288 = vst [vmem:[#allocation46_spill] sm:$0xff] %v10449_v41  ;;  %v3296_v41 = vunpack.c.h.b16 %v3286_v23 }
 0x470   : > { %v10466_v43 = vpop.f32.mrf.mxu3  ;;  %v3413_v55 = vpack.c.b16 %v3300_v22, %v3296_v41  ;;  %v7390_v41 = vld [vmem:[%s11513_s4 + $0x70] sm:$0xff] }
 0x471   : > { %12297 = vst [vmem:[#allocation21_spill] sm:$0xff] %v10466_v43  ;;  %5367 = vmatpush.bf16.msrb.mxu0 %v7390_v41  ;;  %v7387_v41 = vld [vmem:[%s11513_s4 + $0x58] sm:$0xff] }
 0x474   : > { %v10457_v8 = vpop.f32.mrf.mxu2 }
 0x475   : > { %v10455_v13 = vpop.f32.mrf.mxu1  ;;  %12292 = vst [vmem:[#allocation22_spill] sm:$0xff] %v10457_v8  ;;  %v7386_v8 = vld [vmem:[%s11513_s4 + $0x50] sm:$0xff] }
 0x476   : > { %12291 = vst [vmem:[#allocation84_spill] sm:$0xff] %v10455_v13 }
 0x478   : > { %4130 = vmatmul.bf16.gmra.mxu0 %v3407_v52  ;;  %4174 = vmatmul.bf16.gmra.mxu1 %v12294_v51  ;;  %v12299_v51 = vld [vmem:[#allocation54_spill] sm:$0xff]  ;;  %v10482_v43 = vpop.f32.mrf.mxu3 }
 0x479   : > { %12301 = vst [vmem:[#allocation99_spill] sm:$0xff] %v10482_v43 }
 0x47c   : > { %v10464_v5 = vpop.f32.mrf.mxu2 }
 0x47d   : > { %v10462_v45 = vpop.f32.mrf.mxu1  ;;  %12296 = vst [vmem:[#allocation65_spill] sm:$0xff] %v10464_v5 }
 0x47e   : > { %12295 = vst [vmem:[#allocation64_spill] sm:$0xff] %v10462_v45 }
 0x480   : > { %v4052_v19 = vpop.f32.mrf.mxu3 }
 0x484   : > { %v10477_v23 = vpop.f32.mrf.mxu2 }
 0x485   : > { %v10474_v52 = vpop.f32.mrf.mxu1  ;;  %12300 = vst [vmem:[#allocation30_spill] sm:$0xff] %v10477_v23  ;;  %v12303_v23 = vld [vmem:[#allocation60_spill] sm:$0xff] }
 0x486   : > { %12298 = vst [vmem:[#allocation83_spill] sm:$0xff] %v10474_v52 }
 0x488   : > { %4135 = vmatmul.bf16.gmra.mxu0 %v3413_v55  ;;  %4179 = vmatmul.bf16.gmra.mxu1 %v12299_v51  ;;  %v7389_v55 = vld [vmem:[%s11513_s4 + $0x68] sm:$0xff]  ;;  %v7388_v51 = vld [vmem:[%s11513_s4 + $0x60] sm:$0xff] }
 0x489   : > { %5368 = vmatpush.bf16.msrb.mxu0 %v7389_v55 }
 0x48c   : > { %v3968_v22 = vpop.f32.mrf.mxu2 }
 0x48d   : > { %v10484_v5 = vpop.f32.mrf.mxu1  ;;  %5369 = vmatpush.bf16.msrb.mxu0 %v7388_v51  ;;  %v10509_v51 = vpop.f32.mrf.mxu0 }
 0x48e   : > { %12302 = vst [vmem:[#allocation11_spill] sm:$0xff] %v10484_v5 }
 0x491   : > { %5370 = vmatpush.bf16.msrb.mxu0 %v7387_v41  ;;  %v7384_v41 = vld [vmem:[%s11513_s4 + $0x40] sm:$0xff] }
 0x494   : > { %v3970_v52 = vpop.f32.mrf.mxu2 }
 0x495   : > { %v3884_v3 = vpop.f32.mrf.mxu1  ;;  %5371 = vmatpush.bf16.msrb.mxu0 %v7386_v8  ;;  %v10521_v8 = vld [vmem:[%s11512_s3] ss:$0 sm:$0xff] }
 0x496   : > { %v3885_v54 = vadd.f32 %v3884_v3, %v10336_v28  ;;  %v4054_v3 = vpop.f32.mrf.mxu3 }
 0x498   : > { %v3969_v43 = vadd.f32 %v3968_v22, %v3885_v54  ;;  %4184 = vmatmul.bf16.gmra.mxu1 %v12303_v23  ;;  %v7385_v23 = vld [vmem:[%s11513_s4 + $0x48] sm:$0xff] }
 0x499   : > { %5372 = vmatpush.bf16.msrb.mxu0 %v7385_v23  ;;  %v7402_v23 = vld [vmem:[%s11513_s4 + $0xd0] sm:$0xff] }
 0x49a   : > { %v10500_v5 = vadd.f32 %v4052_v19, %v3969_v43  ;;  %v4331_v19 = vlaneseq  ;;  %5031 = vmatpush.bf16.msrb.mxu2 %v7402_v23 }
 0x49c   : > { %12304 = vst [vmem:[#allocation16_spill] sm:$0xff] %v10500_v5 }
 0x49d   : > { %v3886_v55 = vpop.f32.mrf.mxu1  ;;  %5373 = vmatpush.bf16.msrb.mxu0 %v7384_v41 }
 0x49e   : > { %v3887_v28 = vadd.f32 %v3886_v55, %v10345_v59  ;;  %v12306_v55 = vld [vmem:[#allocation50_spill] sm:$0xff] }
 0x4a0   : > { %v3971_v22 = vadd.f32 %v3970_v52, %v3887_v28  ;;  %v10523_v52 = vstv %s6831_s14  ;;  %s7606_s14 = sshra.s32 %s5933_s9, 4  ;;  %s7607_s14 = int_to_ptr.hbm [resolvable:$true] %s7606_s14 }
 0x4a1   : > { %vm4335_vm2 = vcmp.ge.s32.totalorder %v10523_v52, 0  ;;  %vm4345_vm3 = vcmp.lt.s32.totalorder %v10523_v52, 16  ;;  %s7608_s30 = scalar_lea.hbm %s7607_s14, 64  ;;  %p7613_p5 = scmp.lt.s32.totalorder %s7607_s14, %s11515_s6 }
 0x4a2   : > { %v10511_v43 = vadd.f32 %v4054_v3, %v3971_v22  ;;  %v10526_v3 = vshrl.u32 %v4331_v19, 7  ;;  %v12307_v22 = vld [vmem:[#allocation76_spill] sm:$0xff]  ;;  %v10538_v19 = vpop.f32.mrf.mxu0  ;;  %vm10540_vm4 = vmand %vm4335_vm2, %vm4345_vm3  ;;  %p7609_p1 = scmp.ne.s32.totalorder %s7607_s14, %s7608_s30  ;;  %p7614_p6 = scmp.lt.s32.totalorder %s7612_s26, %s7608_s30 }
 0x4a4   : > { %12305 = vst [vmem:[#allocation44_spill] sm:$0xff] %v10511_v43  ;;  %vm4365_vm5 = vcmp.ge.s32.totalorder %v10526_v3, 1  ;;  %p7610_p2 = pnand %p7609_p1, %p7776_p3  ;;  %p7615_p7 = por %p7614_p6, %p7613_p5 }
 0x4a5   : > { %v4150_v54 = vpop.f32.mrf.mxu1  ;;  %vm4368_vm6 = vmand %vm10540_vm4, %vm4365_vm5 }
 0x4a6   : > { %v4151_v59 = vadd.f32 %v4150_v54, %v10354_v14  ;;  %v7410_v14 = vld [vmem:[%s11513_s4 + $0x110] sm:$0xff]  ;;  %p7611_p4 = pneg %p7610_p2 }
 0x4a7   : > { %5080 = vmatpush.bf16.msra.mxu3 %v7410_v14  ;;  %v7400_v14 = vld [vmem:[%s11513_s4 + $0xc0] sm:$0xff] }
 0x4a8   : > { %v4225_v28 = vadd.f32 %v4151_v59, %v12306_v55  ;;  %4189 = vmatmul.bf16.gmra.mxu1 %v12307_v22  ;;  %v7401_v59 = vld [vmem:[%s11513_s4 + $0xc8] sm:$0xff]  ;;  %p7616_p9 = pnand %p7615_p7, %p7611_p4 }
 0x4a9   : > { %5032 = vmatpush.bf16.msrb.mxu2 %v7401_v59 }
 0x4aa   : > { %v4259_v54 = vadd.f32 %v10521_v8, %v4225_v28  ;;  %v12310_v28 = vld [vmem:[#allocation89_spill] sm:$0xff] }
 0x4ac   : > { %v4289_v22 = vmax.f32 %v4259_v54, 0.0  ;;  %v10559_v54 = vadd.s32 16, %v10526_v3  ;;  %v7430_v3 = vld [vmem:[%s11513_s4 + $0x1b0] sm:$0xff] }
 0x4ad   : > { %v4152_v55 = vpop.f32.mrf.mxu1  ;;  %5033 = vmatpush.bf16.msrb.mxu2 %v7400_v14 }
 0x4ae   : > { %v4153_v43 = vadd.f32 %v4152_v55, %v10371_v6  ;;  %v4491_v5 = vsel %vm4368_vm6, %v4289_v22, 0.0  ;;  %v10561_v55 = vpop.f32.mrf.mxu0  ;;  %vm4400_vm7 = vcmp.le.s32.totalorder %v10559_v54, 16 }
 0x4af   : > { %v4521_v6 = vpack.c.bf16 %v4491_v5, %v4491_v5  ;;  %v7409_v5 = vld [vmem:[%s11513_s4 + $0x108] sm:$0xff]  ;;  %vm4403_vm8 = vmand %vm10540_vm4, %vm4400_vm7 }
 0x4b0   : > { %v4226_v23 = vadd.f32 %v4153_v43, %v12310_v28  ;;  %5081 = vmatpush.bf16.msra.mxu3 %v7409_v5 }
 0x4b2   : > { %v4260_v45 = vadd.f32 %v10521_v8, %v4226_v23 }
 0x4b4   : > { %v4290_v58 = vmax.f32 %v4260_v45, 0.0  ;;  %v4567_v45 = vunpack.c.l.b16 %v4521_v6 }
 0x4b5   : > { %v4155_v59 = vpop.f32.mrf.mxu1 }
 0x4b6   : > { %v4492_v13 = vsel %vm10540_vm4, %v4290_v58, 0.0  ;;  %v4156_v43 = vadd.f32 %v4155_v59, %v10380_v10 }
 0x4b7   : > { %v4522_v28 = vpack.c.bf16 %v4492_v13, %v4492_v13 }
 0x4b8   : > { %v4227_v50 = vadd.f32 %v4156_v43, %v12311_v24  ;;  %4194 = vmatmul.bf16.gmra.mxu1 %v12149_v35  ;;  %v4322_v35 = vadd.s32 1, %v10523_v52  ;;  %v7408_v24 = vld [vmem:[%s11513_s4 + $0x100] sm:$0xff]  ;;  %v10585_v43 = vpop.f32.mrf.mxu0 }
 0x4b9   : > { %v4568_v22 = vunpack.c.l.b16 %v4522_v28  ;;  %5082 = vmatpush.bf16.msra.mxu3 %v7408_v24 }
 0x4ba   : > { %v4261_v23 = vadd.f32 %v10521_v8, %v4227_v50  ;;  %vm4336_vm9 = vcmp.ge.s32.totalorder %v4322_v35, 0  ;;  %vm4346_vm10 = vcmp.lt.s32.totalorder %v4322_v35, 16 }
 0x4bb   : > { %v10573_v14 = vpack.c.b16 %v4568_v22, %v4567_v45  ;;  %vm10591_vm11 = vmand %vm4336_vm9, %vm4346_vm10 }
 0x4bc   : > { %v4291_v58 = vmax.f32 %v4261_v23, 0.0  ;;  %vm4371_vm12 = vmand %vm10591_vm11, %vm4365_vm5  ;;  %v7399_v23 = vld [vmem:[%s11513_s4 + $0xb8] sm:$0xff] }
 0x4bd   : > { %12312 = vst [vmem:[#allocation67_spill] sm:$0xff] %v10573_v14  ;;  %v4157_v10 = vpop.f32.mrf.mxu1  ;;  %v4626_v59 = vshll.u32 %v10573_v14, 16  ;;  %vm4406_vm13 = vmand %vm10591_vm11, %vm4400_vm7  ;;  %5415 = vmatpush.bf16.msra.mxu1 %v7399_v23  ;;  %v7396_v23 = vld [vmem:[%s11513_s4 + $0xa0] sm:$0xff] }
 0x4be   : > { %v4493_v13 = vsel %vm4403_vm8, %v4291_v58, 0.0  ;;  %v4158_v6 = vadd.f32 %v4157_v10, %v10391_v30  ;;  %v4624_v10 = vshrl.u32 %v10573_v14, 16 }
 0x4bf   : > { %v4523_v50 = vpack.c.bf16 %v4493_v13, %v4493_v13  ;;  %v4628_v5 = vrot.slane %v4626_v59, 1  ;;  %v12317_v59 = vld [vmem:[#allocation97_spill] sm:$0xff] }
 0x4c0   : > { %v4228_v41 = vadd.f32 %v4158_v6, %v9829_v48  ;;  %v12316_v6 = vld [vmem:[#allocation94_spill] sm:$0xff]  ;;  %v10607_v14 = vpop.f32.mrf.mxu0 }
 0x4c1   : > { %v4607_v28 = vunpack.c.l.b16 %v4523_v50  ;;  %v4629_v35 = vor.u32 %v4628_v5, %v4624_v10 }
 0x4c2   : > { %v4262_v45 = vadd.f32 %v10521_v8, %v4228_v41 }
 0x4c3   : > { %v10589_v22 = vpack.c.b16 %v4607_v28, %v4607_v28  ;;  %v3830_v28 = vadd.f32 %v10261_v17, %v10072_v40 }
 0x4c4   : > { %v4292_v24 = vmax.f32 %v4262_v45, 0.0 }
 0x4c5   : > { %12313 = vst [vmem:[#allocation107_spill] sm:$0xff] %v10589_v22  ;;  %v4631_v30 = vshll.u32 %v10589_v22, 16  ;;  %v4160_v58 = vpop.f32.mrf.mxu1  ;;  %v3914_v5 = vadd.f32 %v10238_v26, %v3830_v28 }
 0x4c6   : > { %v4161_v48 = vadd.f32 %v4160_v58, %v10400_v63  ;;  %v4494_v45 = vsel %vm4371_vm12, %v4292_v24, 0.0 }
 0x4c7   : > { %v4633_v13 = vrot.slane %v4631_v30, 1  ;;  %v4524_v22 = vpack.c.bf16 %v4494_v45, %v4494_v45  ;;  %v3998_v24 = vadd.f32 %v10215_v62, %v3914_v5  ;;  %v4323_v62 = vadd.s32 2, %v10523_v52 }
 0x4c8   : > { %v4229_v50 = vadd.f32 %v4161_v48, %v12316_v6  ;;  %4199 = vmatmul.bf16.gmra.mxu1 %v12317_v59  ;;  %v3832_v6 = vadd.f32 %v10279_v21, %v10081_v15 }
 0x4c9   : > { %v4634_v41 = vsel %vm575_vm0, %v4629_v35, %v4633_v13  ;;  %v12318_v35 = vld [vmem:[#allocation77_spill] sm:$0xff]  ;;  %v4569_v40 = vunpack.c.l.b16 %v4524_v22  ;;  %v4082_v26 = vadd.f32 %v10509_v51, %v3998_v24  ;;  %v12319_v51 = vld [vmem:[#allocation39_spill] sm:$0xff]  ;;  %vm4337_vm14 = vcmp.ge.s32.totalorder %v4323_v62, 0 }
 0x4ca   : > { %v4263_v63 = vadd.f32 %v10521_v8, %v4229_v50  ;;  %5374 = vmatmul.bf16.vlgmr.msrb.gmra.mxu0 %v4634_v41  ;;  %v3916_v15 = vadd.f32 %v10255_v20, %v3832_v6  ;;  %vm4347_vm15 = vcmp.lt.s32.totalorder %v4323_v62, 16  ;;  %v3835_v20 = vadd.f32 %v10289_v61, %v10098_v36  ;;  %v12323_v62 = vld [vmem:[#allocation85_spill] sm:$0xff] }
 0x4cb   : > { %vm10647_vm2 = vmand %vm4337_vm14, %vm4347_vm15 }
 0x4cc   : > { %v4293_v58 = vmax.f32 %v4263_v63, 0.0  ;;  %v3919_v36 = vadd.f32 %v10273_v42, %v3835_v20  ;;  %vm4374_vm3 = vmand %vm10647_vm2, %vm4365_vm5  ;;  %v7395_v20 = vld [vmem:[%s11513_s4 + $0x98] sm:$0xff] }
 0x4cd   : > { %v4162_v47 = vpop.f32.mrf.mxu1  ;;  %vm4409_vm4 = vmand %vm10647_vm2, %vm4400_vm7 }
 0x4ce   : > { %v4495_v30 = vsel %vm10591_vm11, %v4293_v58, 0.0  ;;  %v4163_v10 = vadd.f32 %v4162_v47, %v10415_v16  ;;  %v10626_v47 = vpop.f32.mrf.mxu0  ;;  %v12320_v58 = vld [vmem:[#allocation27_spill] sm:$0xff]  ;;  %v4003_v42 = vadd.f32 %v10240_v18, %v3919_v36  ;;  %v3840_v36 = vadd.f32 %v10315_v57, %v10137_v56 }
 0x4cf   : > { %v4525_v48 = vpack.c.bf16 %v4495_v30, %v4495_v30  ;;  %v4000_v30 = vadd.f32 %v10222_v31, %v3916_v15 }
 0x4d0   : > { %v4230_v13 = vadd.f32 %v4163_v10, %v12318_v35  ;;  %v3924_v57 = vadd.f32 %v10298_v60, %v3840_v36  ;;  %v3842_v60 = vadd.f32 %v10330_v49, %v10145_v0 }
 0x4d1   : > { %v4570_v17 = vunpack.c.l.b16 %v4525_v48 }
 0x4d2   : > { %v4264_v50 = vadd.f32 %v10521_v8, %v4230_v13  ;;  %v7398_v13 = vld [vmem:[%s11513_s4 + $0xb0] sm:$0xff] }
 0x4d3   : > { %v10619_v59 = vpack.c.b16 %v4570_v17, %v4569_v40  ;;  %v4084_v40 = vadd.f32 %v10538_v19, %v4000_v30  ;;  %5416 = vmatpush.bf16.msra.mxu1 %v7398_v13 }
 0x4d4   : > { %v4294_v16 = vmax.f32 %v4264_v50, 0.0 }
 0x4d5   : > { %v4165_v22 = vpop.f32.mrf.mxu1  ;;  %5034 = vmatmul.bf16.vlgmr.msrb.gmra.mxu2 %v10619_v59  ;;  %v4638_v45 = vshll.u32 %v10619_v59, 16  ;;  %v4636_v31 = vshrl.u32 %v10619_v59, 16 }
 0x4d6   : > { %v4496_v21 = vsel %vm4406_vm13, %v4294_v16, 0.0  ;;  %v4166_v41 = vadd.f32 %v4165_v22, %v4082_v26  ;;  %v10654_v6 = vpop.f32.mrf.mxu0  ;;  %v7397_v22 = vld [vmem:[%s11513_s4 + $0xa8] sm:$0xff] }
 0x4d7   : > { %v4526_v28 = vpack.c.bf16 %v4496_v21, %v4496_v21  ;;  %v4640_v35 = vrot.slane %v4638_v45, 1  ;;  %5417 = vmatpush.bf16.msra.mxu1 %v7397_v22  ;;  %v4324_v22 = vadd.s32 3, %v10523_v52 }
 0x4d8   : > { %v4231_v63 = vadd.f32 %v4166_v41, %v12319_v51  ;;  %4204 = vmatmul.bf16.gmra.mxu1 %v12320_v58  ;;  %v3837_v41 = vadd.f32 %v10304_v12, %v10125_v37  ;;  %v4087_v51 = vadd.f32 %v10561_v55, %v4003_v42  ;;  %v12325_v55 = vld [vmem:[#allocation52_spill] sm:$0xff] }
 0x4d9   : > { %v4608_v5 = vunpack.c.l.b16 %v4526_v28  ;;  %v4641_v19 = vor.u32 %v4640_v35, %v4636_v31  ;;  %v12324_v35 = vld [vmem:[#allocation20_spill] sm:$0xff]  ;;  %v3287_v31 = vrot.slane %v10120_v4, 1  ;;  %vm4338_vm6 = vcmp.ge.s32.totalorder %v4324_v22, 0 }
 0x4da   : > { %v4265_v10 = vadd.f32 %v10521_v8, %v4231_v63  ;;  %v3921_v18 = vadd.f32 %v10283_v39, %v3837_v41  ;;  %v3288_v39 = vrot.slane %v10233_v38, 1  ;;  %v7394_v4 = vld [vmem:[%s11513_s4 + $0x90] sm:$0xff]  ;;  %vm4348_vm8 = vcmp.lt.s32.totalorder %v4324_v22, 16  ;;  %v7383_v38 = vld [vmem:[%s11513_s4 + $0x38] sm:$0xff] }
 0x4db   : > { %v10641_v48 = vpack.c.b16 %v4608_v5, %v4608_v5  ;;  %5418 = vmatpush.bf16.msra.mxu1 %v7396_v23  ;;  %vm10725_vm9 = vmand %vm4338_vm6, %vm4348_vm8  ;;  %5317 = vmatpush.bf16.msrb.mxu3 %v7383_v38  ;;  %v12341_v38 = vld [vmem:[#allocation67_spill] sm:$0xff] }
 0x4dc   : > { %v4295_v50 = vmax.f32 %v4265_v10, 0.0  ;;  %v10704_v56 = vsel %vm876_vm1, %v3287_v31, %v3288_v39  ;;  %vm4377_vm10 = vmand %vm10725_vm9, %vm4365_vm5 }
 0x4dd   : > { %v4167_v24 = vpop.f32.mrf.mxu1  ;;  %v4643_v61 = vshll.u32 %v10641_v48, 16  ;;  %v3293_v41 = vunpack.c.l.b16 %v10704_v56  ;;  %vm4412_vm11 = vmand %vm10725_vm9, %vm4400_vm7 }
 0x4de   : > { %v4168_v26 = vadd.f32 %v4167_v24, %v4084_v40  ;;  %v4497_v28 = vsel %vm4374_vm3, %v4295_v50, 0.0  ;;  %v10679_v10 = vpop.f32.mrf.mxu0 }
 0x4df   : > { %v4645_v16 = vrot.slane %v4643_v61, 1  ;;  %v4527_v58 = vpack.c.bf16 %v4497_v28, %v4497_v28  ;;  %5419 = vmatpush.bf16.msra.mxu1 %v7395_v20  ;;  %v4005_v61 = vadd.f32 %v10257_v34, %v3921_v18 }
 0x4e0   : > { %v4232_v15 = vadd.f32 %v4168_v26, %v12323_v62 }
 0x4e1   : > { %v4646_v21 = vsel %vm575_vm0, %v4641_v19, %v4645_v16  ;;  %v4571_v40 = vunpack.c.l.b16 %v4527_v58  ;;  %v4089_v19 = vadd.f32 %v10585_v43, %v4005_v61  ;;  %v7393_v43 = vld [vmem:[%s11513_s4 + $0x88] sm:$0xff] }
 0x4e2   : > { %v4266_v45 = vadd.f32 %v10521_v8, %v4232_v15  ;;  %5083 = vmatmul.bf16.vlgmr.msra.gmra.mxu3 %v4646_v21  ;;  %5379 = vmatmul.bf16.gmra.mxu0 %v4646_v21 }
 0x4e3   : > { %5420 = vmatpush.bf16.msra.mxu1 %v7394_v4 }
 0x4e4   : > { %v4296_v63 = vmax.f32 %v4266_v45, 0.0  ;;  %v4008_v45 = vadd.f32 %v10275_v27, %v3924_v57  ;;  %v12328_v27 = vld [vmem:[#allocation103_spill] sm:$0xff] }
 0x4e5   : > { %v4170_v5 = vpop.f32.mrf.mxu1 }
 0x4e6   : > { %v4498_v37 = vsel %vm10647_vm2, %v4296_v63, 0.0  ;;  %v4171_v12 = vadd.f32 %v4170_v5, %v4087_v51  ;;  %v10716_v23 = vpop.f32.mrf.mxu0  ;;  %v4092_v5 = vadd.f32 %v10607_v14, %v4008_v45 }
 0x4e7   : > { %v4528_v30 = vpack.c.bf16 %v4498_v37, %v4498_v37  ;;  %5421 = vmatpush.bf16.msra.mxu1 %v7393_v43  ;;  %v3408_v37 = vpack.c.b16 %v3293_v41, %v12328_v27  ;;  %v3847_v43 = vadd.f32 %v10347_v29, %v10167_v44  ;;  %v12331_v27 = vld [vmem:[#allocation114_spill] sm:$0xff] }
 0x4e8   : > { %v4233_v13 = vadd.f32 %v4171_v12, %v12324_v35  ;;  %4209 = vmatmul.bf16.gmra.mxu1 %v12325_v55  ;;  %v12329_v55 = vld [vmem:[#allocation92_spill] sm:$0xff] }
 0x4e9   : > { %v4572_v24 = vunpack.c.l.b16 %v4528_v30  ;;  %v3926_v30 = vadd.f32 %v10309_v46, %v3842_v60  ;;  %v3845_v46 = vadd.f32 %v10338_v1, %v10159_v11  ;;  %v3931_v41 = vadd.f32 %v10332_v25, %v3847_v43 }
 0x4ea   : > { %v4267_v50 = vadd.f32 %v10521_v8, %v4233_v13 }
 0x4eb   : > { %v10689_v26 = vpack.c.b16 %v4572_v24, %v4571_v40  ;;  %v4010_v31 = vadd.f32 %v10285_v32, %v3926_v30  ;;  %v3929_v22 = vadd.f32 %v10324_v33, %v3845_v46 }
 0x4ec   : > { %v4297_v16 = vmax.f32 %v4267_v50, 0.0 }
 0x4ed   : > { %v4172_v34 = vpop.f32.mrf.mxu1  ;;  %5039 = vmatmul.bf16.gmra.mxu2 %v10689_v26  ;;  %v4650_v21 = vshll.u32 %v10689_v26, 16  ;;  %v4648_v49 = vshrl.u32 %v10689_v26, 16  ;;  %v4094_v50 = vadd.f32 %v10626_v47, %v4010_v31 }
 0x4ee   : > { %v4499_v17 = vsel %vm4409_vm4, %v4297_v16, 0.0  ;;  %v4173_v62 = vadd.f32 %v4172_v34, %v4089_v19  ;;  %v10748_v4 = vpop.f32.mrf.mxu0 }
 0x4ef   : > { %v4529_v15 = vpack.c.bf16 %v4499_v17, %v4499_v17  ;;  %v4652_v58 = vrot.slane %v4650_v21, 1  ;;  %v3297_v17 = vunpack.c.h.b16 %v10704_v56  ;;  %v4013_v21 = vadd.f32 %v10300_v9, %v3929_v22  ;;  %v12338_v22 = vld [vmem:[#allocation63_spill] sm:$0xff] }
 0x4f0   : > { %v4234_v42 = vadd.f32 %v4173_v62, %v9964_v53  ;;  %v7392_v53 = vld [vmem:[%s11513_s4 + $0x80] sm:$0xff]  ;;  %v3301_v62 = vunpack.c.l.b16 %v3288_v39  ;;  %v4325_v56 = vadd.s32 4, %v10523_v52 }
 0x4f1   : > { %v4609_v28 = vunpack.c.l.b16 %v4529_v15  ;;  %5422 = vmatpush.bf16.msra.mxu1 %v7392_v53  ;;  %v4653_v14 = vor.u32 %v4652_v58, %v4648_v49  ;;  %v4097_v9 = vadd.f32 %v10654_v6, %v4013_v21 }
 0x4f2   : > { %v4268_v51 = vadd.f32 %v10521_v8, %v4234_v42  ;;  %v3414_v29 = vpack.c.b16 %v3301_v62, %v3297_v17  ;;  %vm4339_vm12 = vcmp.ge.s32.totalorder %v4325_v56, 0  ;;  %vm4349_vm13 = vcmp.lt.s32.totalorder %v4325_v56, 16  ;;  %v12340_v17 = vld [vmem:[#allocation107_spill] sm:$0xff] }
 0x4f3   : > { %v10719_v63 = vpack.c.b16 %v4609_v28, %v4609_v28  ;;  %vm10788_vm14 = vmand %vm4339_vm12, %vm4349_vm13  ;;  %v4728_v62 = vrot.slane %v12340_v17, 1  ;;  %v4731_v17 = vrot.slane %v10641_v48, 1 }
 0x4f4   : > { %v4298_v20 = vmax.f32 %v4268_v51, 0.0  ;;  %vm4380_vm15 = vmand %vm10788_vm14, %vm4365_vm5 }
 0x4f5   : > { %v4175_v0 = vpop.f32.mrf.mxu1  ;;  %v4655_v12 = vshll.u32 %v10719_v63, 16  ;;  %vm4415_vm2 = vmand %vm10788_vm14, %vm4400_vm7 }
 0x4f6   : > { %v4176_v35 = vadd.f32 %v4175_v0, %v4092_v5  ;;  %v4500_v61 = vsel %vm4377_vm10, %v4298_v20, 0.0  ;;  %v10777_v28 = vpop.f32.mrf.mxu0  ;;  %v12330_v5 = vld [vmem:[#allocation47_spill] sm:$0xff] }
 0x4f7   : > { %v4657_v13 = vrot.slane %v4655_v12, 1  ;;  %v4530_v16 = vpack.c.bf16 %v4500_v61, %v4500_v61  ;;  %v4015_v18 = vadd.f32 %v12330_v5, %v3931_v41  ;;  %v12345_v5 = vld [vmem:[#allocation119_spill] sm:$0xff] }
 0x4f8   : > { %v4235_v40 = vadd.f32 %v4176_v35, %v12329_v55  ;;  %4214 = vmatmul.bf16.gmra.mxu1 %v3408_v37  ;;  %v12332_v37 = vld [vmem:[#allocation86_spill] sm:$0xff]  ;;  %v7381_v20 = vld [vmem:[%s11513_s4 + $0x28] sm:$0xff] }
 0x4f9   : > { %v10739_v24 = vsel %vm575_vm0, %v4653_v14, %v4657_v13  ;;  %v4573_v47 = vunpack.c.l.b16 %v4530_v16  ;;  %v3850_v0 = vadd.f32 %v12332_v37, %v12331_v27  ;;  %v4099_v30 = vadd.f32 %v10679_v10, %v4015_v18  ;;  %v12335_v13 = vld [vmem:[#allocation87_spill] sm:$0xff]  ;;  %v12337_v16 = vld [vmem:[#allocation78_spill] sm:$0xff]  ;;  %v12346_v18 = vld [vmem:[#allocation96_spill] sm:$0xff] }
 0x4fa   : > { %v4269_v36 = vadd.f32 %v10521_v8, %v4235_v40  ;;  %5088 = vmatmul.bf16.gmra.mxu3 %v10739_v24  ;;  %5384 = vmatmul.bf16.gmra.mxu0 %v10739_v24  ;;  %v3855_v27 = vadd.f32 %v12346_v18, %v12345_v5 }
 0x4fb   : > { %v3934_v55 = vadd.f32 %v12335_v13, %v3850_v0 }
 0x4fc   : > { %v4299_v19 = vmax.f32 %v4269_v36, 0.0  ;;  %v12336_v36 = vld [vmem:[#allocation104_spill] sm:$0xff] }
 0x4fd   : > { %v4177_v34 = vpop.f32.mrf.mxu1 }
 0x4fe   : > { %v4501_v32 = vsel %vm10725_vm9, %v4299_v19, 0.0  ;;  %v4178_v11 = vadd.f32 %v4177_v34, %v4094_v50  ;;  %v10799_v61 = vpop.f32.mrf.mxu0  ;;  %v4018_v34 = vadd.f32 %v12337_v16, %v3934_v55  ;;  %v12349_v16 = vld [vmem:[#allocation82_spill] sm:$0xff] }
 0x4ff   : > { %v4531_v1 = vpack.c.bf16 %v4501_v32, %v4501_v32  ;;  %v12339_v32 = vld [vmem:[#allocation70_spill] sm:$0xff] }
 0x500   : > { %v4236_v57 = vadd.f32 %v4178_v11, %v9996_v7  ;;  %v7423_v7 = vld [vmem:[%s11513_s4 + $0x178] sm:$0xff]  ;;  %v3852_v11 = vadd.f32 %v12339_v32, %v12338_v22  ;;  %v4102_v21 = vadd.f32 %v10716_v23, %v4018_v34  ;;  %v12350_v22 = vld [vmem:[#allocation28_spill] sm:$0xff] }
 0x501   : > { %v4574_v15 = vunpack.c.l.b16 %v4531_v1  ;;  %5124 = vmatpush.bf16.msra.mxu2 %v7423_v7  ;;  %v12351_v32 = vld [vmem:[#allocation101_spill] sm:$0xff] }
 0x502   : > { %v4270_v33 = vadd.f32 %v10521_v8, %v4236_v57 }
 0x503   : > { %v10761_v42 = vpack.c.b16 %v4574_v15, %v4573_v47  ;;  %v7422_v47 = vld [vmem:[%s11513_s4 + $0x170] sm:$0xff] }
 0x504   : > { %v4300_v44 = vmax.f32 %v4270_v33, 0.0  ;;  %v7382_v15 = vld [vmem:[%s11513_s4 + $0x30] sm:$0xff] }
 0x505   : > { %v4180_v39 = vpop.f32.mrf.mxu1  ;;  %5044 = vmatmul.bf16.gmra.mxu2 %v10761_v42  ;;  %v4662_v58 = vshll.u32 %v10761_v42, 16  ;;  %v4660_v35 = vshrl.u32 %v10761_v42, 16  ;;  %5318 = vmatpush.bf16.msrb.mxu3 %v7382_v15 }
 0x506   : > { %v4502_v45 = vsel %vm4412_vm11, %v4300_v44, 0.0  ;;  %v4181_v60 = vadd.f32 %v4180_v39, %v4097_v9  ;;  %v4727_v9 = vrot.slane %v12341_v38, 1  ;;  %5125 = vmatpush.bf16.msra.mxu2 %v7422_v47  ;;  %v12342_v44 = vld [vmem:[#allocation95_spill] sm:$0xff]  ;;  %v10828_v37 = vpop.f32.mrf.mxu0 }
 0x507   : > { %v4532_v51 = vpack.c.bf16 %v4502_v45, %v4502_v45  ;;  %v4664_v12 = vrot.slane %v4662_v58, 1 }
 0x508   : > { %v4237_v6 = vadd.f32 %v4181_v60, %v10010_v2  ;;  %4219 = vmatmul.bf16.gmra.mxu1 %v3414_v29  ;;  %v3936_v29 = vadd.f32 %v12342_v44, %v3852_v11  ;;  %v4729_v45 = vsel %vm876_vm1, %v4727_v9, %v4728_v62  ;;  %v12343_v60 = vld [vmem:[#allocation98_spill] sm:$0xff]  ;;  %v3857_v11 = vadd.f32 %v12351_v32, %v12350_v22 }
 0x509   : > { %v4610_v53 = vunpack.c.l.b16 %v4532_v51  ;;  %v4665_v46 = vor.u32 %v4664_v12, %v4660_v35  ;;  %v4326_v35 = vadd.s32 5, %v10523_v52  ;;  %5319 = vmatpush.bf16.msrb.mxu3 %v7381_v20  ;;  %v12354_v44 = vld [vmem:[#allocation42_spill] sm:$0xff] }
 0x50a   : > { %v4271_v25 = vadd.f32 %v10521_v8, %v4237_v6  ;;  %v12344_v6 = vld [vmem:[#allocation49_spill] sm:$0xff]  ;;  %v3941_v48 = vadd.f32 %v12354_v44, %v3857_v11  ;;  %v4734_v11 = vrot.slane %v10719_v63, 1  ;;  %v12364_v63 = vld [vmem:[#allocation43_spill] sm:$0xff] }
 0x50b   : > { %v10785_v49 = vpack.c.b16 %v4610_v53, %v4610_v53  ;;  %v4020_v53 = vadd.f32 %v12344_v6, %v3936_v29  ;;  %vm4340_vm3 = vcmp.ge.s32.totalorder %v4326_v35, 0  ;;  %vm4350_vm4 = vcmp.lt.s32.totalorder %v4326_v35, 16  ;;  %v12357_v6 = vld [vmem:[#allocation80_spill] sm:$0xff]  ;;  %v12359_v35 = vld [vmem:[#allocation106_spill] sm:$0xff] }
 0x50c   : > { %v4301_v40 = vmax.f32 %v4271_v25, 0.0  ;;  %vm10859_vm6 = vmand %vm4340_vm3, %vm4350_vm4 }
 0x50d   : > { %v4182_v2 = vpop.f32.mrf.mxu1  ;;  %v4667_v14 = vshll.u32 %v10785_v49, 16  ;;  %v4104_v12 = vadd.f32 %v10748_v4, %v4020_v53  ;;  %v7421_v4 = vld [vmem:[%s11513_s4 + $0x168] sm:$0xff]  ;;  %vm4383_vm8 = vmand %vm10859_vm6, %vm4365_vm5  ;;  %v12358_v53 = vld [vmem:[#allocation109_spill] sm:$0xff] }
 0x50e   : > { %v4183_v31 = vadd.f32 %v4182_v2, %v4099_v30  ;;  %v4503_v1 = vsel %vm4380_vm15, %v4301_v40, 0.0  ;;  %5126 = vmatpush.bf16.msra.mxu2 %v7421_v4  ;;  %v10857_v15 = vpop.f32.mrf.mxu0  ;;  %v3860_v5 = vadd.f32 %v12358_v53, %v12357_v6  ;;  %v12361_v4 = vld [vmem:[#allocation35_spill] sm:$0xff]  ;;  %vm4418_vm9 = vmand %vm10859_vm6, %vm4400_vm7  ;;  %v12368_v6 = vld [vmem:[#allocation37_spill] sm:$0xff] }
 0x50f   : > { %v4669_v10 = vrot.slane %v4667_v14, 1  ;;  %v4533_v33 = vpack.c.bf16 %v4503_v1, %v4503_v1  ;;  %v12347_v14 = vld [vmem:[#allocation26_spill] sm:$0xff] }
 0x510   : > { %v4238_v50 = vadd.f32 %v4183_v31, %v12336_v36  ;;  %v3939_v13 = vadd.f32 %v12347_v14, %v3855_v27  ;;  %v3944_v14 = vadd.f32 %v12359_v35, %v3860_v5 }
 0x511   : > { %v10803_v19 = vsel %vm575_vm0, %v4665_v46, %v4669_v10  ;;  %v4575_v23 = vunpack.c.l.b16 %v4533_v33  ;;  %v12348_v10 = vld [vmem:[#allocation100_spill] sm:$0xff]  ;;  %v4730_v33 = vrot.slane %v10619_v59, 1 }
 0x512   : > { %v4272_v57 = vadd.f32 %v10521_v8, %v4238_v50  ;;  %5093 = vmatmul.bf16.gmra.mxu3 %v10803_v19  ;;  %5389 = vmatmul.bf16.gmra.mxu0 %v10803_v19  ;;  %v4023_v34 = vadd.f32 %v12349_v16, %v3939_v13  ;;  %v4028_v20 = vadd.f32 %v12361_v4, %v3944_v14  ;;  %v12362_v16 = vld [vmem:[#allocation68_spill] sm:$0xff]  ;;  %v12371_v14 = vld [vmem:[#allocation62_spill] sm:$0xff]  ;;  %v7447_v4 = vld [vmem:[%s11513_s4 + $0x238] sm:$0xff] }
 0x513   : > { %5781 = vmatpush.bf16.msra.mxu0 %v7447_v4 }
 0x514   : > { %v4302_v43 = vmax.f32 %v4272_v57, 0.0  ;;  %v4107_v47 = vadd.f32 %v10777_v28, %v4023_v34  ;;  %v10872_v28 = vsel %vm876_vm1, %v4730_v33, %v4731_v17  ;;  %v7380_v17 = vld [vmem:[%s11513_s4 + $0x20] sm:$0xff]  ;;  %v4327_v33 = vadd.s32 6, %v10523_v52 }
 0x515   : > { %v4185_v7 = vpop.f32.mrf.mxu1  ;;  %5320 = vmatpush.bf16.msrb.mxu3 %v7380_v17 }
 0x516   : > { %v4504_v39 = vsel %vm10788_vm14, %v4302_v43, 0.0  ;;  %v4186_v56 = vadd.f32 %v4185_v7, %v4102_v21  ;;  %v10887_v13 = vpop.f32.mrf.mxu0  ;;  %v4733_v21 = vrot.slane %v10689_v26, 1  ;;  %vm4341_vm10 = vcmp.ge.s32.totalorder %v4327_v33, 0 }
 0x517   : > { %v4534_v41 = vpack.c.bf16 %v4504_v39, %v4504_v39  ;;  %vm4351_vm11 = vcmp.lt.s32.totalorder %v4327_v33, 16 }
 0x518   : > { %v4239_v51 = vadd.f32 %v4186_v56, %v12343_v60  ;;  %5423 = vmatmul.bf16.vlgmr.msra.gmra.mxu1 %v4729_v45  ;;  %v12355_v45 = vld [vmem:[#allocation40_spill] sm:$0xff]  ;;  %vm10927_vm12 = vmand %vm4341_vm10, %vm4351_vm11 }
 0x519   : > { %v4576_v58 = vunpack.c.l.b16 %v4534_v41  ;;  %vm4386_vm13 = vmand %vm10927_vm12, %vm4365_vm5 }
 0x51a   : > { %v4273_v0 = vadd.f32 %v10521_v8, %v4239_v51  ;;  %vm4421_vm14 = vmand %vm10927_vm12, %vm4400_vm7 }
 0x51b   : > { %v10831_v25 = vpack.c.b16 %v4576_v58, %v4575_v23  ;;  %v12356_v23 = vld [vmem:[#allocation58_spill] sm:$0xff] }
 0x51c   : > { %v4303_v30 = vmax.f32 %v4273_v0, 0.0  ;;  %v4025_v58 = vadd.f32 %v12356_v23, %v3941_v48 }
 0x51d   : > { %v4187_v2 = vpop.f32.mrf.mxu1  ;;  %5049 = vmatmul.bf16.gmra.mxu2 %v10831_v25  ;;  %v4674_v46 = vshll.u32 %v10831_v25, 16  ;;  %v4672_v7 = vshrl.u32 %v10831_v25, 16 }
 0x51e   : > { %v4505_v55 = vsel %vm4415_vm2, %v4303_v30, 0.0  ;;  %v4188_v40 = vadd.f32 %v4187_v2, %v4104_v12  ;;  %v4109_v0 = vadd.f32 %v10799_v61, %v4025_v58  ;;  %v12363_v61 = vld [vmem:[#allocation38_spill] sm:$0xff]  ;;  %v12367_v58 = vld [vmem:[#allocation72_spill] sm:$0xff] }
 0x51f   : > { %v4535_v31 = vpack.c.bf16 %v4505_v55, %v4505_v55  ;;  %v4676_v62 = vrot.slane %v4674_v46, 1  ;;  %v12360_v46 = vld [vmem:[#allocation32_spill] sm:$0xff]  ;;  %v3862_v34 = vadd.f32 %v12363_v61, %v12362_v16  ;;  %v3865_v53 = vadd.f32 %v12368_v6, %v12367_v58  ;;  %v12374_v61 = vld [vmem:[#allocation41_spill] sm:$0xff]  ;;  %v7445_v6 = vld [vmem:[%s11513_s4 + $0x228] sm:$0xff] }
 0x520   : > { %v4240_v36 = vadd.f32 %v4188_v40, %v12348_v10 }
 0x521   : > { %v4611_v50 = vunpack.c.l.b16 %v4535_v31  ;;  %v4677_v56 = vor.u32 %v4676_v62, %v4672_v7  ;;  %v4112_v62 = vadd.f32 %v10828_v37, %v4028_v20  ;;  %v3946_v7 = vadd.f32 %v12364_v63, %v3862_v34  ;;  %v12373_v20 = vld [vmem:[#allocation66_spill] sm:$0xff]  ;;  %v12375_v34 = vld [vmem:[#allocation75_spill] sm:$0xff] }
 0x522   : > { %v4274_v1 = vadd.f32 %v10521_v8, %v4240_v36 }
 0x523   : > { %v10853_v57 = vpack.c.b16 %v4611_v50, %v4611_v50 }
 0x524   : > { %v4304_v29 = vmax.f32 %v4274_v1, 0.0  ;;  %v7420_v1 = vld [vmem:[%s11513_s4 + $0x160] sm:$0xff] }
 0x525   : > { %v4190_v43 = vpop.f32.mrf.mxu1  ;;  %v4679_v9 = vshll.u32 %v10853_v57, 16  ;;  %5127 = vmatpush.bf16.msra.mxu2 %v7420_v1 }
 0x526   : > { %v4191_v39 = vadd.f32 %v4190_v43, %v4107_v47  ;;  %v4506_v18 = vsel %vm4383_vm8, %v4304_v29, 0.0  ;;  %v10915_v29 = vsel %vm876_vm1, %v4733_v21, %v4734_v11 }
 0x527   : > { %v4681_v41 = vrot.slane %v4679_v9, 1  ;;  %v4536_v30 = vpack.c.bf16 %v4506_v18, %v4506_v18 }
 0x528   : > { %v4241_v60 = vadd.f32 %v4191_v39, %v12355_v45  ;;  %5428 = vmatmul.bf16.gmra.mxu1 %v10872_v28  ;;  %v4118_v39 = vpop.f32.mrf.mxu0 }
 0x529   : > { %v10877_v51 = vsel %vm575_vm0, %v4677_v56, %v4681_v41  ;;  %v4577_v36 = vunpack.c.l.b16 %v4536_v30  ;;  %v12365_v56 = vld [vmem:[#allocation45_spill] sm:$0xff] }
 0x52a   : > { %v4275_v27 = vadd.f32 %v10521_v8, %v4241_v60  ;;  %5098 = vmatmul.bf16.gmra.mxu3 %v10877_v51  ;;  %5394 = vmatmul.bf16.gmra.mxu0 %v10877_v51  ;;  %v12366_v60 = vld [vmem:[#allocation59_spill] sm:$0xff] }
 0x52b   : > { %v4030_v23 = vadd.f32 %v12366_v60, %v3946_v7 }
 0x52c   : > { %v4305_v12 = vmax.f32 %v4275_v27, 0.0 }
 0x52d   : > { %v4192_v2 = vpop.f32.mrf.mxu1 }
 0x52e   : > { %v4507_v55 = vsel %vm10859_vm6, %v4305_v12, 0.0  ;;  %v4193_v40 = vadd.f32 %v4192_v2, %v4109_v0  ;;  %v4114_v0 = vadd.f32 %v10857_v15, %v4030_v23 }
 0x52f   : > { %v4537_v31 = vpack.c.bf16 %v4507_v55, %v4507_v55  ;;  %v3949_v55 = vadd.f32 %v12371_v14, %v3865_v53  ;;  %v12378_v53 = vld [vmem:[#allocation74_spill] sm:$0xff] }
 0x530   : > { %v4242_v10 = vadd.f32 %v4193_v40, %v12360_v46  ;;  %v4121_v11 = vpop.f32.mrf.mxu0 }
 0x531   : > { %v4578_v50 = vunpack.c.l.b16 %v4537_v31  ;;  %v4033_v16 = vadd.f32 %v12373_v20, %v3949_v55 }
 0x532   : > { %v4276_v22 = vadd.f32 %v10521_v8, %v4242_v10  ;;  %v12372_v10 = vld [vmem:[#allocation34_spill] sm:$0xff] }
 0x533   : > { %v10896_v32 = vpack.c.b16 %v4578_v50, %v4577_v36  ;;  %v4117_v33 = vadd.f32 %v10887_v13, %v4033_v16 }
 0x534   : > { %v4306_v47 = vmax.f32 %v4276_v22, 0.0  ;;  %v3867_v22 = vadd.f32 %v12375_v34, %v12374_v61 }
 0x535   : > { %v4195_v43 = vpop.f32.mrf.mxu1  ;;  %5054 = vmatmul.bf16.gmra.mxu2 %v10896_v32  ;;  %v4686_v37 = vshll.u32 %v10896_v32, 16  ;;  %v4684_v2 = vshrl.u32 %v10896_v32, 16 }
 0x536   : > { %v4508_v9 = vsel %vm4418_vm9, %v4306_v47, 0.0  ;;  %v4196_v44 = vadd.f32 %v4195_v43, %v4112_v62  ;;  %v4737_v62 = vrot.slane %v10785_v49, 1  ;;  %v7419_v47 = vld [vmem:[%s11513_s4 + $0x158] sm:$0xff]  ;;  %v7446_v49 = vld [vmem:[%s11513_s4 + $0x230] sm:$0xff] }
 0x537   : > { %v4538_v48 = vpack.c.bf16 %v4508_v9, %v4508_v9  ;;  %v4688_v27 = vrot.slane %v4686_v37, 1  ;;  %v7379_v43 = vld [vmem:[%s11513_s4 + $0x18] sm:$0xff]  ;;  %v4736_v9 = vrot.slane %v10761_v42, 1  ;;  %5128 = vmatpush.bf16.msra.mxu2 %v7419_v47  ;;  %5782 = vmatpush.bf16.msra.mxu0 %v7446_v49 }
 0x538   : > { %v4243_v41 = vadd.f32 %v4196_v44, %v12365_v56  ;;  %5433 = vmatmul.bf16.gmra.mxu1 %v10915_v29  ;;  %5321 = vmatpush.bf16.msrb.mxu3 %v7379_v43  ;;  %v12376_v44 = vld [vmem:[#allocation25_spill] sm:$0xff]  ;;  %v4123_v55 = vpop.f32.mrf.mxu0  ;;  %v12384_v43 = vld [vmem:[#allocation122_spill] sm:$0xff] }
 0x539   : > { %v4612_v45 = vunpack.c.l.b16 %v4538_v48  ;;  %v4689_v46 = vor.u32 %v4688_v27, %v4684_v2  ;;  %v3951_v48 = vadd.f32 %v12376_v44, %v3867_v22  ;;  %v10967_v13 = vsel %vm876_vm1, %v4736_v9, %v4737_v62  ;;  %v12379_v27 = vld [vmem:[#allocation18_spill] sm:$0xff]  ;;  %v7418_v22 = vld [vmem:[%s11513_s4 + $0x150] sm:$0xff] }
 0x53a   : > { %v4277_v5 = vadd.f32 %v10521_v8, %v4243_v41  ;;  %v12383_v62 = vld [vmem:[#allocation10_spill] sm:$0xff]  ;;  %v4740_v9 = vrot.slane %v10853_v57, 1  ;;  %v7442_v57 = vld [vmem:[%s11513_s4 + $0x210] sm:$0xff] }
 0x53b   : > { %v10924_v18 = vpack.c.b16 %v4612_v45, %v4612_v45  ;;  %v12377_v45 = vld [vmem:[#allocation108_spill] sm:$0xff]  ;;  %5783 = vmatpush.bf16.msra.mxu0 %v7445_v6  ;;  %5129 = vmatpush.bf16.msra.mxu2 %v7418_v22 }
 0x53c   : > { %v4307_v40 = vmax.f32 %v4277_v5, 0.0  ;;  %v4035_v5 = vadd.f32 %v12378_v53, %v3951_v48 }
 0x53d   : > { %v4197_v30 = vpop.f32.mrf.mxu1  ;;  %v4691_v35 = vshll.u32 %v10924_v18, 16 }
 0x53e   : > { %v4198_v31 = vadd.f32 %v4197_v30, %v4114_v0  ;;  %v4509_v1 = vsel %vm4386_vm13, %v4307_v40, 0.0  ;;  %v12380_v0 = vld [vmem:[#allocation56_spill] sm:$0xff]  ;;  %v4119_v14 = vadd.f32 %v4118_v39, %v4035_v5  ;;  %v12382_v39 = vld [vmem:[#allocation111_spill] sm:$0xff] }
 0x53f   : > { %v4693_v15 = vrot.slane %v4691_v35, 1  ;;  %v4539_v63 = vpack.c.bf16 %v4509_v1, %v4509_v1  ;;  %v3870_v30 = vadd.f32 %v12380_v0, %v12379_v27  ;;  %v7378_v1 = vld [vmem:[%s11513_s4 + $0x10] sm:$0xff]  ;;  %v12389_v0 = vld [vmem:[#allocation93_spill] sm:$0xff] }
 0x540   : > { %v4244_v36 = vadd.f32 %v4198_v31, %v12372_v10  ;;  %v12381_v10 = vld [vmem:[#allocation23_spill] sm:$0xff]  ;;  %5322 = vmatpush.bf16.msrb.mxu3 %v7378_v1 }
 0x541   : > { %v10940_v50 = vsel %vm575_vm0, %v4689_v46, %v4693_v15  ;;  %v4579_v23 = vunpack.c.l.b16 %v4539_v63  ;;  %v4328_v46 = vadd.s32 7, %v10523_v52  ;;  %v7444_v15 = vld [vmem:[%s11513_s4 + $0x220] sm:$0xff] }
 0x542   : > { %v4278_v17 = vadd.f32 %v10521_v8, %v4244_v36  ;;  %5103 = vmatmul.bf16.gmra.mxu3 %v10940_v50  ;;  %5399 = vmatmul.bf16.gmra.mxu0 %v10940_v50  ;;  %v3954_v36 = vadd.f32 %v12381_v10, %v3870_v30 }
 0x543   : > { %5784 = vmatpush.bf16.msra.mxu0 %v7444_v15  ;;  %vm4342_vm15 = vcmp.ge.s32.totalorder %v4328_v46, 0  ;;  %vm4352_vm2 = vcmp.lt.s32.totalorder %v4328_v46, 16  ;;  %v12391_v46 = vld [vmem:[#allocation33_spill] sm:$0xff]  ;;  %v12392_v15 = vld [vmem:[#allocation84_spill] sm:$0xff] }
 0x544   : > { %v4308_v21 = vmax.f32 %v4278_v17, 0.0  ;;  %v7443_v17 = vld [vmem:[%s11513_s4 + $0x218] sm:$0xff]  ;;  %v4038_v47 = vadd.f32 %v12383_v62, %v3954_v36  ;;  %vm11008_vm3 = vmand %vm4342_vm15, %vm4352_vm2  ;;  %v3875_v10 = vadd.f32 %v12392_v15, %v12391_v46 }
 0x545   : > { %v4200_v7 = vpop.f32.mrf.mxu1  ;;  %vm4389_vm4 = vmand %vm11008_vm3, %vm4365_vm5 }
 0x546   : > { %v4510_v37 = vsel %vm10927_vm12, %v4308_v21, 0.0  ;;  %v4201_v56 = vadd.f32 %v4200_v7, %v4117_v33  ;;  %v12385_v33 = vld [vmem:[#allocation46_spill] sm:$0xff]  ;;  %v4122_v44 = vadd.f32 %v4121_v11, %v4038_v47  ;;  %vm4424_vm6 = vmand %vm11008_vm3, %vm4400_vm7 }
 0x547   : > { %v4540_v41 = vpack.c.bf16 %v4510_v37, %v4510_v37  ;;  %v3872_v21 = vadd.f32 %v12385_v33, %v12384_v43  ;;  %5785 = vmatpush.bf16.msra.mxu0 %v7443_v17  ;;  %v12394_v47 = vld [vmem:[#allocation102_spill] sm:$0xff] }
 0x548   : > { %v4245_v60 = vadd.f32 %v4201_v56, %v12377_v45  ;;  %5438 = vmatmul.bf16.gmra.mxu1 %v10967_v13  ;;  %v4739_v56 = vrot.slane %v10831_v25, 1 }
 0x549   : > { %v4580_v58 = vunpack.c.l.b16 %v4540_v41 }
 0x54a   : > { %v4279_v2 = vadd.f32 %v10521_v8, %v4245_v60  ;;  %v12388_v60 = vld [vmem:[#allocation31_spill] sm:$0xff]  ;;  %v11024_v53 = vsel %vm876_vm1, %v4739_v56, %v4740_v9  ;;  %v12396_v9 = vld [vmem:[#allocation69_spill] sm:$0xff] }
 0x54b   : > { %v10978_v35 = vpack.c.b16 %v4580_v58, %v4579_v23  ;;  %v3956_v23 = vadd.f32 %v12388_v60, %v3872_v21  ;;  %v4126_v58 = vpop.f32.mrf.mxu0  ;;  %5786 = vmatpush.bf16.msra.mxu0 %v7442_v57  ;;  %v12395_v21 = vld [vmem:[#allocation13_spill] sm:$0xff]  ;;  %v7417_v57 = vld [vmem:[%s11513_s4 + $0x148] sm:$0xff] }
 0x54c   : > { %v4309_v40 = vmax.f32 %v4279_v2, 0.0  ;;  %v7377_v60 = vld [vmem:[%s11513_s4 + $0x8] sm:$0xff]  ;;  %5130 = vmatpush.bf16.msra.mxu2 %v7417_v57 }
 0x54d   : > { %v4202_v31 = vpop.f32.mrf.mxu1  ;;  %5059 = vmatmul.bf16.gmra.mxu2 %v10978_v35  ;;  %v4698_v12 = vshll.u32 %v10978_v35, 16  ;;  %v4696_v41 = vshrl.u32 %v10978_v35, 16  ;;  %5323 = vmatpush.bf16.msrb.mxu3 %v7377_v60 }
 0x54e   : > { %v4511_v4 = vsel %vm4421_vm14, %v4309_v40, 0.0  ;;  %v4203_v20 = vadd.f32 %v4202_v31, %v4119_v14  ;;  %v7441_v14 = vld [vmem:[%s11513_s4 + $0x208] sm:$0xff] }
 0x54f   : > { %v4541_v16 = vpack.c.bf16 %v4511_v4, %v4511_v4  ;;  %v4700_v49 = vrot.slane %v4698_v12, 1  ;;  %v12390_v40 = vld [vmem:[#allocation91_spill] sm:$0xff]  ;;  %5787 = vmatpush.bf16.msra.mxu0 %v7441_v14 }
 0x550   : > { %v4246_v61 = vadd.f32 %v4203_v20, %v12382_v39  ;;  %v4040_v31 = vadd.f32 %v12390_v40, %v3956_v23 }
 0x551   : > { %v4613_v34 = vunpack.c.l.b16 %v4541_v16  ;;  %v4701_v5 = vor.u32 %v4700_v49, %v4696_v41  ;;  %v12397_v49 = vld [vmem:[#allocation64_spill] sm:$0xff] }
 0x552   : > { %v4280_v63 = vadd.f32 %v10521_v8, %v4246_v61  ;;  %v4124_v20 = vadd.f32 %v4123_v55, %v4040_v31  ;;  %v7440_v61 = vld [vmem:[%s11513_s4 + $0x200] sm:$0xff] }
 0x553   : > { %v11005_v7 = vpack.c.b16 %v4613_v34, %v4613_v34  ;;  %v12393_v34 = vld [vmem:[#allocation29_spill] sm:$0xff]  ;;  %v4128_v62 = vpop.f32.mrf.mxu0  ;;  %5788 = vmatpush.bf16.msra.mxu0 %v7440_v61  ;;  %v12402_v61 = vld [vmem:[#allocation83_spill] sm:$0xff] }
 0x554   : > { %v4310_v11 = vmax.f32 %v4280_v63, 0.0  ;;  %v3959_v22 = vadd.f32 %v12393_v34, %v3875_v10  ;;  %v12399_v10 = vld [vmem:[#allocation48_spill] sm:$0xff] }
 0x555   : > { %v4205_v37 = vpop.f32.mrf.mxu1  ;;  %v4703_v45 = vshll.u32 %v11005_v7, 16 }
 0x556   : > { %v4206_v6 = vadd.f32 %v4205_v37, %v4122_v44  ;;  %v4512_v36 = vsel %vm4389_vm4, %v4310_v11, 0.0  ;;  %v4043_v63 = vadd.f32 %v12395_v21, %v3959_v22  ;;  %v3877_v44 = vadd.f32 %v12397_v49, %v12396_v9  ;;  %v11053_v37 = vld [vmem:[%s11512_s3] ss:$0 sm:$0xff] }
 0x557   : > { %v4705_v27 = vrot.slane %v4703_v45, 1  ;;  %v4542_v12 = vpack.c.bf16 %v4512_v36, %v4512_v36  ;;  %v4743_v45 = vrot.slane %v10924_v18, 1  ;;  %v12398_v18 = vld [vmem:[#allocation22_spill] sm:$0xff] }
 0x558   : > { %v4247_v30 = vadd.f32 %v4206_v6, %v12389_v0  ;;  %5443 = vmatmul.bf16.gmra.mxu1 %v11024_v53  ;;  %v4127_v23 = vadd.f32 %v4126_v58, %v4043_v63  ;;  %v5035_v11 = vpop.f32.mrf.mxu2  ;;  %v4742_v0 = vrot.slane %v10896_v32, 1  ;;  %v12405_v63 = vld [vmem:[#allocation65_spill] sm:$0xff] }
 0x559   : > { %v11029_v2 = vsel %vm575_vm0, %v4701_v5, %v4705_v27  ;;  %v4581_v55 = vunpack.c.l.b16 %v4542_v12  ;;  %v4329_v27 = vadd.s32 8, %v10523_v52 }
 0x55a   : > { %v4281_v4 = vadd.f32 %v10521_v8, %v4247_v30  ;;  %5108 = vmatmul.bf16.gmra.mxu3 %v11029_v2  ;;  %5404 = vmatmul.bf16.gmra.mxu0 %v11029_v2  ;;  %v3961_v30 = vadd.f32 %v12398_v18, %v3877_v44  ;;  %v11076_v58 = vsel %vm876_vm1, %v4742_v0, %v4743_v45  ;;  %v12406_v45 = vld [vmem:[#allocation81_spill] sm:$0xff]  ;;  %v4746_v18 = vrot.slane %v11005_v7, 1 }
 0x55b   : > { %vm4343_vm8 = vcmp.ge.s32.totalorder %v4329_v27, 0  ;;  %vm4353_vm9 = vcmp.lt.s32.totalorder %v4329_v27, 16  ;;  %v4131_v22 = vpop.f32.mrf.mxu0 }
 0x55c   : > { %v4311_v16 = vmax.f32 %v4281_v4, 0.0  ;;  %v7416_v4 = vld [vmem:[%s11513_s4 + $0x140] sm:$0xff]  ;;  %vm11090_vm10 = vmand %vm4343_vm8, %vm4353_vm9 }
 0x55d   : > { %v4207_v39 = vpop.f32.mrf.mxu1  ;;  %5131 = vmatpush.bf16.msra.mxu2 %v7416_v4  ;;  %vm4392_vm11 = vmand %vm11090_vm10, %vm4365_vm5 }
 0x55e   : > { %v4513_v1 = vsel %vm11008_vm3, %v4311_v16, 0.0  ;;  %v4208_v17 = vadd.f32 %v4207_v39, %v4124_v20  ;;  %v12400_v16 = vld [vmem:[#allocation61_spill] sm:$0xff]  ;;  %v12401_v39 = vld [vmem:[#allocation90_spill] sm:$0xff]  ;;  %vm4427_vm12 = vmand %vm11090_vm10, %vm4400_vm7 }
 0x55f   : > { %v4543_v8 = vpack.c.bf16 %v4513_v1, %v4513_v1  ;;  %v4045_v12 = vadd.f32 %v12400_v16, %v3961_v30  ;;  %v3880_v34 = vadd.f32 %v12402_v61, %v12401_v39  ;;  %v7376_v30 = vld [vmem:[%s11513_s4] sm:$0xff] }
 0x560   : > { %v4248_v43 = vadd.f32 %v4208_v17, %v12394_v47  ;;  %5324 = vmatpush.bf16.msrb.mxu3 %v7376_v30  ;;  %v12410_v16 = vld [vmem:[#allocation30_spill] sm:$0xff] }
 0x561   : > { %v4582_v33 = vunpack.c.l.b16 %v4543_v8  ;;  %v4129_v47 = vadd.f32 %v4128_v62, %v4045_v12  ;;  %v3964_v9 = vadd.f32 %v12405_v63, %v3880_v34  ;;  %v7431_v63 = vld [vmem:[%s11513_s4 + $0x1b8] sm:$0xff] }
 0x562   : > { %v4282_v56 = vadd.f32 %v11053_v37, %v4248_v43  ;;  %5683 = vmatpush.bf16.msrb.mxu2 %v7431_v63 }
 0x563   : > { %v11056_v41 = vpack.c.b16 %v4582_v33, %v4581_v55 }
 0x564   : > { %v4312_v6 = vmax.f32 %v4282_v56, 0.0 }
 0x565   : > { %v4210_v5 = vpop.f32.mrf.mxu1  ;;  %5064 = vmatmul.bf16.gmra.mxu2 %v11056_v41  ;;  %v5084_v48 = vpop.f32.mrf.mxu3  ;;  %v4710_v15 = vshll.u32 %v11056_v41, 16  ;;  %v4708_v33 = vshrl.u32 %v11056_v41, 16 }
 0x566   : > { %v4514_v14 = vsel %vm4424_vm6, %v4312_v6, 0.0  ;;  %v4211_v40 = vadd.f32 %v4210_v5, %v4127_v23  ;;  %v11073_v31 = vadd.f32 %v5084_v48, %v5035_v11  ;;  %v12407_v23 = vld [vmem:[#allocation21_spill] sm:$0xff]  ;;  %v12408_v6 = vld [vmem:[#allocation79_spill] sm:$0xff]  ;;  %5684 = vmatpush.bf16.msrb.mxu2 %v7430_v3 }
 0x567   : > { %v4544_v46 = vpack.c.bf16 %v4514_v14, %v4514_v14  ;;  %v4712_v8 = vrot.slane %v4710_v15, 1  ;;  %v4048_v11 = vadd.f32 %v12407_v23, %v3964_v9  ;;  %v12409_v5 = vld [vmem:[#allocation11_spill] sm:$0xff]  ;;  %v7439_v9 = vld [vmem:[%s11513_s4 + $0x1f8] sm:$0xff] }
 0x568   : > { %v4249_v36 = vadd.f32 %v4211_v40, %v12399_v10  ;;  %5448 = vmatmul.bf16.gmra.mxu1 %v11076_v58  ;;  %v3882_v27 = vadd.f32 %v12409_v5, %v12408_v6  ;;  %v4133_v40 = vpop.f32.mrf.mxu0  ;;  %5732 = vmatpush.bf16.msra.mxu3 %v7439_v9 }
 0x569   : > { %v4614_v20 = vunpack.c.l.b16 %v4544_v46  ;;  %v4713_v56 = vor.u32 %v4712_v8, %v4708_v33  ;;  %v4132_v14 = vadd.f32 %v4131_v22, %v4048_v11  ;;  %v11115_v46 = vpop.f32.mrf.mxu2  ;;  %v12411_v22 = vld [vmem:[#allocation117_spill] sm:$0xff] }
 0x56a   : > { %v4283_v1 = vadd.f32 %v11053_v37, %v4249_v36  ;;  %v3966_v12 = vadd.f32 %v12410_v16, %v3882_v27 }
 0x56b   : > { %v11088_v17 = vpack.c.b16 %v4614_v20, %v4614_v20  ;;  %v4745_v20 = vrot.slane %v10978_v35, 1 }
 0x56c   : > { %v4313_v49 = vmax.f32 %v4283_v1, 0.0 }
 0x56d   : > { %v4212_v55 = vpop.f32.mrf.mxu1  ;;  %v4715_v21 = vshll.u32 %v11088_v17, 16  ;;  %v11117_v36 = vpop.f32.mrf.mxu3  ;;  %v11124_v34 = vsel %vm876_vm1, %v4745_v20, %v4746_v18 }
 0x56e   : > { %v4213_v44 = vadd.f32 %v4212_v55, %v4129_v47  ;;  %v4515_v48 = vsel %vm4392_vm11, %v4313_v49, 0.0  ;;  %v12412_v55 = vld [vmem:[#allocation99_spill] sm:$0xff] }
 0x56f   : > { %v4717_v62 = vrot.slane %v4715_v21, 1  ;;  %v4545_v10 = vpack.c.bf16 %v4515_v48, %v4515_v48  ;;  %v4050_v33 = vadd.f32 %v12412_v55, %v3966_v12  ;;  %v4748_v12 = vrot.slane %v11056_v41, 1 }
 0x570   : > { %v4250_v57 = vadd.f32 %v4213_v44, %v12406_v45  ;;  %v4136_v27 = vpop.f32.mrf.mxu0 }
 0x571   : > { %v11103_v60 = vsel %vm575_vm0, %v4713_v56, %v4717_v62  ;;  %v4809_v8 = vunpack.c.l.b16 %v4545_v10  ;;  %v4134_v44 = vadd.f32 %v4133_v40, %v4050_v33  ;;  %v5040_v56 = vpop.f32.mrf.mxu2  ;;  %v4749_v40 = vrot.slane %v11088_v17, 1  ;;  %v12414_v10 = vld [vmem:[#allocation16_spill] sm:$0xff] }
 0x572   : > { %v4284_v0 = vadd.f32 %v11053_v37, %v4250_v57  ;;  %5113 = vmatmul.bf16.gmra.mxu3 %v11103_v60  ;;  %5409 = vmatmul.bf16.gmra.mxu0 %v11103_v60  ;;  %v4330_v57 = vadd.s32 9, %v10523_v52 }
 0x573   : > { %v11166_v17 = vsel %vm876_vm1, %v4748_v12, %v4749_v40 }
 0x574   : > { %v4314_v15 = vmax.f32 %v4284_v0, 0.0  ;;  %v12413_v0 = vld [vmem:[#allocation112_spill] sm:$0xff]  ;;  %vm4344_vm13 = vcmp.ge.s32.totalorder %v4330_v57, 0  ;;  %vm4354_vm14 = vcmp.lt.s32.totalorder %v4330_v57, 16 }
 0x575   : > { %v4215_v4 = vpop.f32.mrf.mxu1  ;;  %vm11154_vm15 = vmand %vm4344_vm13, %vm4354_vm14 }
 0x576   : > { %v4516_v7 = vsel %vm11090_vm10, %v4314_v15, 0.0  ;;  %v4216_v39 = vadd.f32 %v4215_v4, %v4132_v14  ;;  %v4137_v4 = vadd.f32 %v4136_v27, %v12414_v10  ;;  %vm4395_vm2 = vmand %vm11154_vm15, %vm4365_vm5 }
 0x577   : > { %v4546_v61 = vpack.c.bf16 %v4516_v7, %v4516_v7  ;;  %vm4430_vm5 = vmand %vm11154_vm15, %vm4400_vm7 }
 0x578   : > { %v4251_v1 = vadd.f32 %v4216_v39, %v12411_v22  ;;  %5453 = vmatmul.bf16.gmra.mxu1 %v11124_v34  ;;  %v4138_v33 = vpop.f32.mrf.mxu0 }
 0x579   : > { %v4810_v47 = vunpack.c.l.b16 %v4546_v61 }
 0x57a   : > { %v4285_v21 = vadd.f32 %v11053_v37, %v4251_v1 }
 0x57b   : > { %v11136_v49 = vpack.c.b16 %v4810_v47, %v4809_v8  ;;  %v12417_v47 = vld [vmem:[#allocation51_spill] sm:$0xff] }
 0x57c   : > { %v4315_v62 = vmax.f32 %v4285_v21, 0.0 }
 0x57d   : > { %v4217_v45 = vpop.f32.mrf.mxu1  ;;  %5069 = vmatmul.bf16.gmra.mxu2 %v11136_v49  ;;  %v5089_v23 = vpop.f32.mrf.mxu3  ;;  %v4819_v43 = vshll.u32 %v11136_v49, 16  ;;  %v4817_v7 = vshrl.u32 %v11136_v49, 16 }
 0x57e   : > { %v4517_v11 = vsel %vm4427_vm12, %v4315_v62, 0.0  ;;  %v4218_v6 = vadd.f32 %v4217_v45, %v4134_v44  ;;  %v11144_v5 = vadd.f32 %v5089_v23, %v5040_v56  ;;  %v7438_v44 = vld [vmem:[%s11513_s4 + $0x1f0] sm:$0xff]  ;;  %v11182_v45 = vpop.f32.mrf.mxu2 }
 0x57f   : > { %v4547_v48 = vpack.c.bf16 %v4517_v11, %v4517_v11  ;;  %v4821_v15 = vrot.slane %v4819_v43, 1  ;;  %v12418_v56 = vld [vmem:[#allocation44_spill] sm:$0xff]  ;;  %5733 = vmatpush.bf16.msra.mxu3 %v7438_v44 }
 0x580   : > { %v4252_v18 = vadd.f32 %v4218_v6, %v12413_v0  ;;  %v4139_v62 = vadd.f32 %v4138_v33, %v12418_v56  ;;  %v12419_v0 = vld [vmem:[#allocation57_spill] sm:$0xff]  ;;  %v7426_v44 = vld [vmem:[%s11513_s4 + $0x190] sm:$0xff] }
 0x581   : > { %v4814_v30 = vunpack.c.l.b16 %v4547_v48  ;;  %v4822_v1 = vor.u32 %v4821_v15, %v4817_v7  ;;  %v7434_v56 = vld [vmem:[%s11513_s4 + $0x1d0] sm:$0xff] }
 0x582   : > { %v4286_v14 = vadd.f32 %v11053_v37, %v4252_v18  ;;  %5789 = vmatmul.bf16.vlgmr.msra.gmra.mxu0 %v10915_v29 }
 0x583   : > { %v11150_v52 = vpack.c.b16 %v4814_v30, %v4814_v30 }
 0x584   : > { %v4316_v61 = vmax.f32 %v4286_v14, 0.0 }
 0x585   : > { %v4220_v16 = vpop.f32.mrf.mxu1  ;;  %v4824_v39 = vshll.u32 %v11150_v52, 16  ;;  %v11184_v11 = vpop.f32.mrf.mxu3 }
 0x586   : > { %v4221_v22 = vadd.f32 %v4220_v16, %v4137_v4  ;;  %v4518_v63 = vsel %vm4395_vm2, %v4316_v61, 0.0  ;;  %v7437_v16 = vld [vmem:[%s11513_s4 + $0x1e8] sm:$0xff] }
 0x587   : > { %v4826_v8 = vrot.slane %v4824_v39, 1  ;;  %v4548_v23 = vpack.c.bf16 %v4518_v63, %v4518_v63  ;;  %5734 = vmatpush.bf16.msra.mxu3 %v7437_v16  ;;  %v7436_v39 = vld [vmem:[%s11513_s4 + $0x1e0] sm:$0xff] }
 0x588   : > { %v4253_v55 = vadd.f32 %v4221_v22, %v12417_v47  ;;  %5458 = vmatmul.bf16.gmra.mxu1 %v11166_v17  ;;  %v5045_v15 = vpop.f32.mrf.mxu2 }
 0x589   : > { %v11171_v21 = vsel %vm575_vm0, %v4822_v1, %v4826_v8  ;;  %v5466_v30 = vunpack.c.l.b16 %v4548_v23  ;;  %v11218_v1 = vpop.f32.mrf.mxu0  ;;  %v7435_v8 = vld [vmem:[%s11513_s4 + $0x1d8] sm:$0xff] }
 0x58a   : > { %v4287_v9 = vadd.f32 %v11053_v37, %v4253_v55  ;;  %5118 = vmatmul.bf16.gmra.mxu3 %v11171_v21 }
 0x58b   : > { %5735 = vmatpush.bf16.msra.mxu3 %v7436_v39 }
 0x58c   : > { %v4317_v57 = vmax.f32 %v4287_v9, 0.0 }
 0x58d   : > { %v4222_v6 = vpop.f32.mrf.mxu1  ;;  %5132 = vmatmul.bf16.vlgmr.msra.gmra.mxu2 %v10872_v28  ;;  %v7429_v28 = vld [vmem:[%s11513_s4 + $0x1a8] sm:$0xff] }
 0x58e   : > { %v4519_v27 = vsel %vm11154_vm15, %v4317_v57, 0.0  ;;  %v4223_v48 = vadd.f32 %v4222_v6, %v4139_v62  ;;  %5685 = vmatpush.bf16.msrb.mxu2 %v7429_v28 }
 0x58f   : > { %v4549_v43 = vpack.c.bf16 %v4519_v27, %v4519_v27  ;;  %5736 = vmatpush.bf16.msra.mxu3 %v7435_v8 }
 0x590   : > { %v4254_v18 = vadd.f32 %v4223_v48, %v12419_v0  ;;  %v11204_v12 = vpop.f32.mrf.mxu2  ;;  %v7425_v48 = vld [vmem:[%s11513_s4 + $0x188] sm:$0xff]  ;;  %v4830_v0 = vrot.slane %v11150_v52, 1 }
 0x591   : > { %v5467_v14 = vunpack.c.l.b16 %v4549_v43  ;;  %v11228_v47 = vpop.f32.mrf.mxu0 }
 0x592   : > { %5794 = vmatmul.bf16.gmra.mxu0 %v10967_v13  ;;  %v4288_v6 = vadd.f32 %v11053_v37, %v4254_v18 }
 0x593   : > { %v11191_v40 = vpack.c.b16 %v5467_v14, %v5466_v30  ;;  %5737 = vmatpush.bf16.msra.mxu3 %v7434_v56  ;;  %v4829_v14 = vrot.slane %v11136_v49, 1 }
 0x594   : > { %v4318_v27 = vmax.f32 %v4288_v6, 0.0 }
 0x595   : > { %v5094_v10 = vpop.f32.mrf.mxu3  ;;  %v4831_v54 = vsel %vm876_vm1, %v4829_v14, %v4830_v0 }
 0x596   : > { %v11193_v4 = vadd.f32 %v5094_v10, %v5045_v15  ;;  %v4520_v18 = vsel %vm4430_vm5, %v4318_v27, 0.0 }
 0x597   : > { %v4550_v10 = vpack.c.bf16 %v4520_v18, %v4520_v18 }
 0x599   : > { %v11236_v33 = vpop.f32.mrf.mxu0  ;;  %v5471_v20 = vunpack.c.l.b16 %v4550_v10 }
 0x59a   : > { %5325 = vmatmul.bf16.vlgmr.msrb.gmra.mxu3 %v12341_v38  ;;  %v7428_v38 = vld [vmem:[%s11513_s4 + $0x1a0] sm:$0xff] }
 0x59b   : > { %5686 = vmatpush.bf16.msrb.mxu2 %v7428_v38  ;;  %v11284_v52 = vpack.c.b16 %v5471_v20, %v5471_v20  ;;  %v7432_v38 = vld [vmem:[%s11513_s4 + $0x1c0] sm:$0xff] }
 0x59d   : > { %5137 = vmatmul.bf16.gmra.mxu2 %v10915_v29  ;;  %v11206_v7 = vpop.f32.mrf.mxu3 }
 0x5a0   : > { %v5050_v61 = vpop.f32.mrf.mxu2 }
 0x5a2   : > { %5799 = vmatmul.bf16.gmra.mxu0 %v11024_v53 }
 0x5aa   : > { %5330 = vmatmul.bf16.gmra.mxu3 %v10619_v59  ;;  %v7427_v59 = vld [vmem:[%s11513_s4 + $0x198] sm:$0xff] }
 0x5ab   : > { %5687 = vmatpush.bf16.msrb.mxu2 %v7427_v59  ;;  %v5486_v59 = vrot.slane %v11191_v40, 1 }
 0x5ad   : > { %v5099_v29 = vpop.f32.mrf.mxu3  ;;  %5142 = vmatmul.bf16.gmra.mxu2 %v10967_v13  ;;  %v11230_v13 = vpop.f32.mrf.mxu2 }
 0x5ae   : > { %v11216_v22 = vadd.f32 %v5099_v29, %v5050_v61  ;;  %v5487_v61 = vrot.slane %v11284_v52, 1 }
 0x5af   : > { %5688 = vmatpush.bf16.msrb.mxu2 %v7426_v44 }
 0x5b0   : > { %v5488_v8 = vsel %vm876_vm1, %v5486_v59, %v5487_v61 }
 0x5b2   : > { %5804 = vmatmul.bf16.gmra.mxu0 %v11076_v58 }
 0x5b3   : > { %5689 = vmatpush.bf16.msrb.mxu2 %v7425_v48 }
 0x5b5   : > { %v11232_v55 = vpop.f32.mrf.mxu3 }
 0x5b8   : > { %v5055_v63 = vpop.f32.mrf.mxu2 }
 0x5ba   : > { %5335 = vmatmul.bf16.gmra.mxu3 %v10689_v26 }
 0x5bd   : > { %5147 = vmatmul.bf16.gmra.mxu2 %v11024_v53  ;;  %v11248_v53 = vpop.f32.mrf.mxu0 }
 0x5c0   : > { %v11251_v62 = vpop.f32.mrf.mxu2 }
 0x5c2   : > { %5809 = vmatmul.bf16.gmra.mxu0 %v11124_v34 }
 0x5c5   : > { %v5104_v9 = vpop.f32.mrf.mxu3  ;;  %v11255_v23 = vpop.f32.mrf.mxu0 }
 0x5c6   : > { %v11238_v3 = vadd.f32 %v5104_v9, %v5055_v63 }
 0x5ca   : > { %5340 = vmatmul.bf16.gmra.mxu3 %v10761_v42 }
 0x5cd   : > { %5152 = vmatmul.bf16.gmra.mxu2 %v11076_v58  ;;  %v11253_v57 = vpop.f32.mrf.mxu3  ;;  %v7433_v58 = vld [vmem:[%s11513_s4 + $0x1c8] sm:$0xff]  ;;  %v11274_v15 = vpop.f32.mrf.mxu0 }
 0x5ce   : > { %5738 = vmatpush.bf16.msra.mxu3 %v7433_v58 }
 0x5d0   : > { %v5060_v43 = vpop.f32.mrf.mxu2 }
 0x5d2   : > { %5814 = vmatmul.bf16.gmra.mxu0 %v11166_v17  ;;  %5739 = vmatpush.bf16.msra.mxu3 %v7432_v38 }
 0x5d5   : > { %v11279_v16 = vpop.f32.mrf.mxu0 }
 0x5d8   : > { %v11277_v28 = vpop.f32.mrf.mxu2 }
 0x5da   : > { %5345 = vmatmul.bf16.gmra.mxu3 %v10831_v25 }
 0x5dd   : > { %v5109_v37 = vpop.f32.mrf.mxu3  ;;  %5157 = vmatmul.bf16.gmra.mxu2 %v11124_v34  ;;  %v7424_v34 = vld [vmem:[%s11513_s4 + $0x180] sm:$0xff]  ;;  %v11296_v63 = vpop.f32.mrf.mxu0 }
 0x5de   : > { %v11271_v30 = vadd.f32 %v5109_v37, %v5060_v43  ;;  %5690 = vmatpush.bf16.msrb.mxu2 %v7424_v34 }
 0x5e2   : > { %5819 = vmatmul.bf16.gmra.mxu0 %v4831_v54 }
 0x5e5   : > { %v11290_v39 = vpop.f32.mrf.mxu3 }
 0x5e8   : > { %v5065_v29 = vpop.f32.mrf.mxu2 }
 0x5ea   : > { %5350 = vmatmul.bf16.gmra.mxu3 %v10896_v32 }
 0x5ed   : > { %5162 = vmatmul.bf16.gmra.mxu2 %v11166_v17 }
 0x5f0   : > { %v5067_v56 = vpop.f32.mrf.mxu2 }
 0x5f2   : > { %5824 = vmatmul.bf16.gmra.mxu0 %v5488_v8 }
 0x5f5   : > { %v5114_v9 = vpop.f32.mrf.mxu3 }
 0x5f6   : > { %v11298_v44 = vadd.f32 %v5114_v9, %v5065_v29 }
 0x5fa   : > { %5355 = vmatmul.bf16.gmra.mxu3 %v10978_v35 }
 0x5fd   : > { %v5116_v6 = vpop.f32.mrf.mxu3  ;;  %5167 = vmatmul.bf16.gmra.mxu2 %v4831_v54 }
 0x5fe   : > { %v11301_v27 = vadd.f32 %v5116_v6, %v5067_v56  ;;  %v11328_v6 = vpop.f32.mrf.mxu0 }
 0x600   : > { %v5070_v17 = vpop.f32.mrf.mxu2 }
 0x608   : > { %v5072_v48 = vpop.f32.mrf.mxu2 }
 0x60a   : > { %5360 = vmatmul.bf16.gmra.mxu3 %v11056_v41 }
 0x60d   : > { %v5119_v58 = vpop.f32.mrf.mxu3  ;;  %5691 = vmatmul.bf16.vlgmr.msrb.gmra.mxu2 %v10689_v26  ;;  %v5087_v26 = vadd.f32 %v11117_v36, %v11115_v46 }
 0x60e   : > { %v11305_v43 = vadd.f32 %v5119_v58, %v5070_v17  ;;  %v11334_v58 = vpop.f32.mrf.mxu0 }
 0x610   : > { %v5133_v37 = vpop.f32.mrf.mxu2 }
 0x611   : > { %v5134_v0 = vadd.f32 %v5133_v37, %v11073_v31 }
 0x615   : > { %v5121_v18 = vpop.f32.mrf.mxu3 }
 0x616   : > { %v11308_v14 = vadd.f32 %v5121_v18, %v5072_v48 }
 0x618   : > { %v5135_v10 = vpop.f32.mrf.mxu2 }
 0x619   : > { %v5136_v61 = vadd.f32 %v5135_v10, %v5087_v26  ;;  %v11341_v10 = vpop.f32.mrf.mxu0 }
 0x61a   : > { %5740 = vmatmul.bf16.vlgmr.msra.gmra.mxu3 %v10739_v24 }
 0x61d   : > { %v5326_v54 = vpop.f32.mrf.mxu3  ;;  %5696 = vmatmul.bf16.gmra.mxu2 %v10761_v42 }
 0x61e   : > { %v11312_v20 = vadd.f32 %v5326_v54, %v5134_v0 }
 0x620   : > { %v5138_v34 = vpop.f32.mrf.mxu2 }
 0x621   : > { %v5139_v38 = vadd.f32 %v5138_v34, %v11144_v5  ;;  %v5092_v5 = vadd.f32 %v11184_v11, %v11182_v45  ;;  %v5097_v45 = vadd.f32 %v11206_v7, %v11204_v12  ;;  %v5102_v12 = vadd.f32 %v11232_v55, %v11230_v13  ;;  %v11350_v7 = vpop.f32.mrf.mxu0 }
 0x625   : > { %v5328_v29 = vpop.f32.mrf.mxu3 }
 0x626   : > { %v11317_v31 = vadd.f32 %v5328_v29, %v5136_v61 }
 0x628   : > { %v5140_v59 = vpop.f32.mrf.mxu2 }
 0x629   : > { %v5141_v56 = vadd.f32 %v5140_v59, %v5092_v5 }
 0x62a   : > { %5745 = vmatmul.bf16.gmra.mxu3 %v10803_v19 }
 0x62d   : > { %v5331_v8 = vpop.f32.mrf.mxu3  ;;  %5701 = vmatmul.bf16.gmra.mxu2 %v10831_v25 }
 0x62e   : > { %v11321_v24 = vadd.f32 %v5331_v8, %v5139_v38 }
 0x630   : > { %v5143_v42 = vpop.f32.mrf.mxu2 }
 0x631   : > { %v5144_v9 = vadd.f32 %v5143_v42, %v11193_v4 }
 0x635   : > { %v5333_v46 = vpop.f32.mrf.mxu3 }
 0x636   : > { %v11326_v36 = vadd.f32 %v5333_v46, %v5141_v56 }
 0x638   : > { %v5145_v17 = vpop.f32.mrf.mxu2 }
 0x639   : > { %v5146_v11 = vadd.f32 %v5145_v17, %v5097_v45  ;;  %v5424_v45 = vpop.f32.mrf.mxu1 }
 0x63a   : > { %5750 = vmatmul.bf16.gmra.mxu3 %v10877_v51 }
 0x63d   : > { %v5336_v19 = vpop.f32.mrf.mxu3  ;;  %5706 = vmatmul.bf16.gmra.mxu2 %v10896_v32 }
 0x63e   : > { %v11332_v25 = vadd.f32 %v5336_v19, %v5144_v9 }
 0x640   : > { %v5148_v48 = vpop.f32.mrf.mxu2 }
 0x641   : > { %v5149_v4 = vadd.f32 %v5148_v48, %v11216_v22 }
 0x645   : > { %v5338_v37 = vpop.f32.mrf.mxu3 }
 0x646   : > { %v11339_v0 = vadd.f32 %v5338_v37, %v5146_v11 }
 0x648   : > { %v5150_v18 = vpop.f32.mrf.mxu2 }
 0x649   : > { %v5151_v34 = vadd.f32 %v5150_v18, %v5102_v12  ;;  %v5481_v18 = vshll.u32 %v11284_v52, 16 }
 0x64a   : > { %5755 = vmatmul.bf16.gmra.mxu3 %v10940_v50  ;;  %v5107_v50 = vadd.f32 %v11253_v57, %v11251_v62  ;;  %v5112_v62 = vadd.f32 %v11290_v39, %v11277_v28 }
 0x64d   : > { %v5341_v51 = vpop.f32.mrf.mxu3  ;;  %5711 = vmatmul.bf16.gmra.mxu2 %v10978_v35  ;;  %v11357_v35 = vpop.f32.mrf.mxu0 }
 0x64e   : > { %v11345_v32 = vadd.f32 %v5341_v51, %v5149_v4 }
 0x650   : > { %v5153_v54 = vpop.f32.mrf.mxu2 }
 0x651   : > { %v5154_v22 = vadd.f32 %v5153_v54, %v11238_v3 }
 0x655   : > { %v5343_v38 = vpop.f32.mrf.mxu3  ;;  %v11363_v8 = vpop.f32.mrf.mxu0 }
 0x656   : > { %v11352_v26 = vadd.f32 %v5343_v38, %v5151_v34 }
 0x658   : > { %v5155_v61 = vpop.f32.mrf.mxu2 }
 0x659   : > { %v5156_v29 = vadd.f32 %v5155_v61, %v5107_v50  ;;  %v5426_v61 = vpop.f32.mrf.mxu1 }
 0x65a   : > { %5760 = vmatmul.bf16.gmra.mxu3 %v11029_v2 }
 0x65d   : > { %v5346_v59 = vpop.f32.mrf.mxu3  ;;  %5716 = vmatmul.bf16.gmra.mxu2 %v11056_v41  ;;  %v11370_v5 = vpop.f32.mrf.mxu0 }
 0x65e   : > { %v11360_v3 = vadd.f32 %v5346_v59, %v5154_v22  ;;  %v5483_v22 = vrot.slane %v5481_v18, 1 }
 0x660   : > { %v5158_v13 = vpop.f32.mrf.mxu2 }
 0x661   : > { %v5159_v55 = vadd.f32 %v5158_v13, %v11271_v30  ;;  %v5429_v13 = vpop.f32.mrf.mxu1 }
 0x665   : > { %v5348_v42 = vpop.f32.mrf.mxu3  ;;  %v11378_v48 = vpop.f32.mrf.mxu0 }
 0x666   : > { %v11365_v9 = vadd.f32 %v5348_v42, %v5156_v29 }
 0x668   : > { %v5160_v57 = vpop.f32.mrf.mxu2 }
 0x669   : > { %v5161_v2 = vadd.f32 %v5160_v57, %v5112_v62 }
 0x66a   : > { %5765 = vmatmul.bf16.gmra.mxu3 %v11103_v60 }
 0x66d   : > { %v5351_v41 = vpop.f32.mrf.mxu3  ;;  %5721 = vmatmul.bf16.gmra.mxu2 %v11136_v49  ;;  %v5476_v49 = vshll.u32 %v11191_v40, 16 }
 0x66e   : > { %v11373_v56 = vadd.f32 %v5351_v41, %v5159_v55 }
 0x66f   : > { %v5478_v51 = vrot.slane %v5476_v49, 1 }
 0x670   : > { %v5163_v30 = vpop.f32.mrf.mxu2 }
 0x671   : > { %v5164_v46 = vadd.f32 %v5163_v30, %v11298_v44  ;;  %v5790_v44 = vpop.f32.mrf.mxu0  ;;  %v5376_v30 = vadd.f32 %v11218_v1, %v11312_v20 }
 0x675   : > { %v5353_v17 = vpop.f32.mrf.mxu3 }
 0x676   : > { %v11376_v19 = vadd.f32 %v5353_v17, %v5161_v2  ;;  %v5431_v2 = vpop.f32.mrf.mxu1 }
 0x678   : > { %v5165_v28 = vpop.f32.mrf.mxu2 }
 0x679   : > { %v5166_v39 = vadd.f32 %v5165_v28, %v11301_v27  ;;  %v5474_v27 = vshrl.u32 %v11191_v40, 16  ;;  %v5792_v29 = vpop.f32.mrf.mxu0  ;;  %v5425_v28 = vadd.f32 %v5424_v45, %v5376_v30 }
 0x67a   : > { %5770 = vmatmul.bf16.gmra.mxu3 %v11171_v21 }
 0x67b   : > { %v5479_v12 = vor.u32 %v5478_v51, %v5474_v27 }
 0x67d   : > { %v5356_v60 = vpop.f32.mrf.mxu3  ;;  %5726 = vmatmul.bf16.gmra.mxu2 %v11191_v40  ;;  %v5484_v50 = vsel %vm575_vm0, %v5479_v12, %v5483_v22 }
 0x67e   : > { %v11383_v4 = vadd.f32 %v5356_v60, %v5164_v46  ;;  %v5434_v18 = vpop.f32.mrf.mxu1 }
 0x680   : > { %v5168_v11 = vpop.f32.mrf.mxu2 }
 0x681   : > { %v5169_v37 = vadd.f32 %v5168_v11, %v11305_v43  ;;  %v5795_v55 = vpop.f32.mrf.mxu0  ;;  %v11404_v11 = vld [vmem:[%s11514_s5] ss:$0 sm:$0xff] }
 0x685   : > { %v5358_v54 = vpop.f32.mrf.mxu3 }
 0x686   : > { %v11389_v21 = vadd.f32 %v5358_v54, %v5166_v39  ;;  %v5378_v39 = vadd.f32 %v11228_v47, %v11317_v31 }
 0x688   : > { %v5170_v34 = vpop.f32.mrf.mxu2  ;;  %v5427_v51 = vadd.f32 %v5426_v61, %v5378_v39  ;;  %v5436_v61 = vpop.f32.mrf.mxu1 }
 0x689   : > { %v5171_v38 = vadd.f32 %v5170_v34, %v11308_v14  ;;  %v5797_v14 = vpop.f32.mrf.mxu0  ;;  %v5381_v34 = vadd.f32 %v11236_v33, %v11321_v24 }
 0x68a   : > { %5775 = vmatmul.bf16.gmra.mxu3 %v5484_v50 }
 0x68d   : > { %v5361_v59 = vpop.f32.mrf.mxu3 }
 0x68e   : > { %v11393_v43 = vadd.f32 %v5361_v59, %v5169_v37 }
 0x690   : > { %v5692_v52 = vpop.f32.mrf.mxu2 }
 0x691   : > { %v5800_v1 = vpop.f32.mrf.mxu0 }
 0x695   : > { %v5363_v42 = vpop.f32.mrf.mxu3 }
 0x696   : > { %v11395_v40 = vadd.f32 %v5363_v42, %v5171_v38  ;;  %v5383_v42 = vadd.f32 %v11248_v53, %v11326_v36  ;;  %v5386_v53 = vadd.f32 %v11255_v23, %v11332_v25 }
 0x698   : > { %v5694_v62 = vpop.f32.mrf.mxu2  ;;  %v5432_v30 = vadd.f32 %v5431_v2, %v5383_v42 }
 0x699   : > { %v5802_v59 = vpop.f32.mrf.mxu0 }
 0x69d   : > { %v5741_v57 = vpop.f32.mrf.mxu3 }
 0x69e   : > { %v5742_v41 = vadd.f32 %v5741_v57, %v5692_v52  ;;  %v5430_v52 = vadd.f32 %v5429_v13, %v5381_v34 }
 0x6a0   : > { %v5697_v46 = vpop.f32.mrf.mxu2  ;;  %v5791_v17 = vadd.f32 %v5790_v44, %v5742_v41 }
 0x6a2   : > { %v5830_v49 = vadd.f32 %v5791_v17, %v5425_v28  ;;  %v5439_v28 = vpop.f32.mrf.mxu1 }
 0x6a4   : > { %v5850_v20 = vadd.f32 %v11404_v11, %v5830_v49 }
 0x6a5   : > { %v5743_v60 = vpop.f32.mrf.mxu3 }
 0x6a6   : > { %v5744_v37 = vadd.f32 %v5743_v60, %v5694_v62  ;;  %v5866_v44 = vmax.f32 %v5850_v20, 0.0  ;;  %v5805_v60 = vpop.f32.mrf.mxu0 }
 0x6a8   : > { %v5793_v54 = vadd.f32 %v5792_v29, %v5744_v37  ;;  %v5699_v27 = vpop.f32.mrf.mxu2 }
 0x6aa   : > { %v5831_v45 = vadd.f32 %v5793_v54, %v5427_v51  ;;  %v5388_v54 = vadd.f32 %v11274_v15, %v11339_v0  ;;  %v5441_v20 = vpop.f32.mrf.mxu1  ;;  %v5391_v15 = vadd.f32 %v11279_v16, %v11345_v32 }
 0x6ac   : > { %v5851_v47 = vadd.f32 %v11404_v11, %v5831_v45 }
 0x6ad   : > { %v5746_v31 = vpop.f32.mrf.mxu3 }
 0x6ae   : > { %v5867_v22 = vmax.f32 %v5851_v47, 0.0  ;;  %v5747_v12 = vadd.f32 %v5746_v31, %v5697_v46  ;;  %v5807_v31 = vpop.f32.mrf.mxu0 }
 0x6b0   : > { %v7452_v38 = vpack.c.bf16 %v5867_v22, %v5866_v44  ;;  %v5702_v50 = vpop.f32.mrf.mxu2  ;;  %v5796_v29 = vadd.f32 %v5795_v55, %v5747_v12  ;;  %v5437_v44 = vadd.f32 %v5436_v61, %v5388_v54 }
 0x6b2   : > { %7453 = vst [vmem:[%s11413_s27] sm:$0xff] %v7452_v38   ;;  %v5832_v57 = vadd.f32 %v5796_v29, %v5430_v52  ;;  %v5444_v29 = vpop.f32.mrf.mxu1 }
 0x6b4   : > { %v5852_v24 = vadd.f32 %v11404_v11, %v5832_v57 }
 0x6b5   : > { %v5748_v62 = vpop.f32.mrf.mxu3 }
 0x6b6   : > { %v5749_v41 = vadd.f32 %v5748_v62, %v5699_v27  ;;  %v5868_v49 = vmax.f32 %v5852_v24, 0.0  ;;  %v5810_v42 = vpop.f32.mrf.mxu0  ;;  %v5393_v62 = vadd.f32 %v11296_v63, %v11352_v26  ;;  %v5396_v63 = vadd.f32 %v11328_v6, %v11360_v3 }
 0x6b8   : > { %v5798_v46 = vadd.f32 %v5797_v14, %v5749_v41  ;;  %v5704_v33 = vpop.f32.mrf.mxu2  ;;  %v5435_v14 = vadd.f32 %v5434_v18, %v5386_v53 }
 0x6ba   : > { %v5833_v17 = vadd.f32 %v5798_v46, %v5432_v30  ;;  %v5442_v46 = vadd.f32 %v5441_v20, %v5393_v62 }
 0x6bc   : > { %v5853_v39 = vadd.f32 %v11404_v11, %v5833_v17  ;;  %v5446_v17 = vpop.f32.mrf.mxu1 }
 0x6bd   : > { %v5751_v55 = vpop.f32.mrf.mxu3 }
 0x6be   : > { %v5869_v13 = vmax.f32 %v5853_v39, 0.0  ;;  %v5752_v37 = vadd.f32 %v5751_v55, %v5702_v50  ;;  %v5812_v32 = vpop.f32.mrf.mxu0 }
 0x6c0   : > { %v7457_v36 = vpack.c.bf16 %v5869_v13, %v5868_v49  ;;  %v5707_v51 = vpop.f32.mrf.mxu2  ;;  %v5801_v2 = vadd.f32 %v5800_v1, %v5752_v37 }
 0x6c2   : > { %7491 = vst [vmem:[%s11413_s27 + $0x8] sm:$0xff] %v7457_v36   ;;  %v5834_v45 = vadd.f32 %v5801_v2, %v5435_v14  ;;  %v5398_v2 = vadd.f32 %v11334_v58, %v11365_v9  ;;  %v5401_v58 = vadd.f32 %v11341_v10, %v11373_v56 }
 0x6c4   : > { %v5854_v34 = vadd.f32 %v11404_v11, %v5834_v45  ;;  %v5449_v36 = vpop.f32.mrf.mxu1  ;;  %v5447_v45 = vadd.f32 %v5446_v17, %v5398_v2 }
 0x6c5   : > { %v5753_v27 = vpop.f32.mrf.mxu3 }
 0x6c6   : > { %v5754_v47 = vadd.f32 %v5753_v27, %v5704_v33  ;;  %v5870_v1 = vmax.f32 %v5854_v34, 0.0  ;;  %v5815_v14 = vpop.f32.mrf.mxu0 }
 0x6c8   : > { %v5803_v22 = vadd.f32 %v5802_v59, %v5754_v47  ;;  %v5709_v12 = vpop.f32.mrf.mxu2  ;;  %v5440_v59 = vadd.f32 %v5439_v28, %v5391_v15 }
 0x6ca   : > { %v5835_v23 = vadd.f32 %v5803_v22, %v5437_v44 }
 0x6cc   : > { %v5855_v25 = vadd.f32 %v11404_v11, %v5835_v23 }
 0x6cd   : > { %v5756_v38 = vpop.f32.mrf.mxu3 }
 0x6ce   : > { %v5871_v18 = vmax.f32 %v5855_v25, 0.0  ;;  %v5757_v50 = vadd.f32 %v5756_v38, %v5707_v51  ;;  %v5445_v51 = vadd.f32 %v5444_v29, %v5396_v63  ;;  %v5817_v38 = vpop.f32.mrf.mxu0 }
 0x6d0   : > { %v7462_v0 = vpack.c.bf16 %v5871_v18, %v5870_v1  ;;  %v5712_v52 = vpop.f32.mrf.mxu2  ;;  %v5806_v61 = vadd.f32 %v5805_v60, %v5757_v50  ;;  %v5450_v18 = vadd.f32 %v5449_v36, %v5401_v58  ;;  %v5403_v50 = vadd.f32 %v11350_v7, %v11376_v19 }
 0x6d1   : > { %v5406_v7 = vadd.f32 %v11357_v35, %v11383_v4 }
 0x6d2   : > { %7492 = vst [vmem:[%s11413_s27 + $0x10] sm:$0xff] %v7462_v0   ;;  %v5836_v41 = vadd.f32 %v5806_v61, %v5440_v59 }
 0x6d4   : > { %v5856_v39 = vadd.f32 %v11404_v11, %v5836_v41 }
 0x6d5   : > { %v5758_v57 = vpop.f32.mrf.mxu3 }
 0x6d6   : > { %v5759_v30 = vadd.f32 %v5758_v57, %v5709_v12  ;;  %v5872_v60 = vmax.f32 %v5856_v39, 0.0  ;;  %v5451_v12 = vpop.f32.mrf.mxu1  ;;  %v5820_v62 = vpop.f32.mrf.mxu0 }
 0x6d7   : > { %v5452_v61 = vadd.f32 %v5451_v12, %v5403_v50 }
 0x6d8   : > { %v5808_v33 = vadd.f32 %v5807_v31, %v5759_v30  ;;  %v5714_v24 = vpop.f32.mrf.mxu2 }
 0x6da   : > { %v5837_v16 = vadd.f32 %v5808_v33, %v5442_v46 }
 0x6dc   : > { %v5857_v55 = vadd.f32 %v11404_v11, %v5837_v16 }
 0x6dd   : > { %v5761_v49 = vpop.f32.mrf.mxu3 }
 0x6de   : > { %v5873_v28 = vmax.f32 %v5857_v55, 0.0  ;;  %v5762_v13 = vadd.f32 %v5761_v49, %v5712_v52  ;;  %v5822_v16 = vpop.f32.mrf.mxu0  ;;  %v5408_v55 = vadd.f32 %v11363_v8, %v11389_v21  ;;  %v5411_v21 = vadd.f32 %v11370_v5, %v11393_v43 }
 0x6e0   : > { %v7467_v26 = vpack.c.bf16 %v5873_v28, %v5872_v60  ;;  %v5811_v37 = vadd.f32 %v5810_v42, %v5762_v13  ;;  %v5717_v53 = vpop.f32.mrf.mxu2  ;;  %v5454_v42 = vpop.f32.mrf.mxu1 }
 0x6e2   : > { %7493 = vst [vmem:[%s11413_s27 + $0x18] sm:$0xff] %v7467_v26   ;;  %v5838_v27 = vadd.f32 %v5811_v37, %v5445_v51 }
 0x6e4   : > { %v5858_v31 = vadd.f32 %v11404_v11, %v5838_v27 }
 0x6e5   : > { %v5763_v54 = vpop.f32.mrf.mxu3 }
 0x6e6   : > { %v5764_v20 = vadd.f32 %v5763_v54, %v5714_v24  ;;  %v5874_v34 = vmax.f32 %v5858_v31, 0.0  ;;  %v5825_v36 = vpop.f32.mrf.mxu0 }
 0x6e8   : > { %v5813_v47 = vadd.f32 %v5812_v32, %v5764_v20  ;;  %v5719_v3 = vpop.f32.mrf.mxu2  ;;  %v5456_v17 = vpop.f32.mrf.mxu1  ;;  %v5455_v32 = vadd.f32 %v5454_v42, %v5406_v7 }
 0x6e9   : > { %v5457_v13 = vadd.f32 %v5456_v17, %v5408_v55 }
 0x6ea   : > { %v5839_v44 = vadd.f32 %v5813_v47, %v5447_v45  ;;  %v5413_v45 = vadd.f32 %v11378_v48, %v11395_v40 }
 0x6ec   : > { %v5859_v6 = vadd.f32 %v11404_v11, %v5839_v44 }
 0x6ed   : > { %v5766_v22 = vpop.f32.mrf.mxu3 }
 0x6ee   : > { %v5875_v23 = vmax.f32 %v5859_v6, 0.0  ;;  %v5767_v25 = vadd.f32 %v5766_v22, %v5717_v53  ;;  %v5827_v5 = vpop.f32.mrf.mxu0 }
 0x6f0   : > { %v7472_v9 = vpack.c.bf16 %v5875_v23, %v5874_v34  ;;  %v5816_v1 = vadd.f32 %v5815_v14, %v5767_v25  ;;  %v5722_v52 = vpop.f32.mrf.mxu2  ;;  %v5459_v37 = vpop.f32.mrf.mxu1 }
 0x6f1   : > { %v5460_v20 = vadd.f32 %v5459_v37, %v5411_v21 }
 0x6f2   : > { %7494 = vst [vmem:[%s11413_s27 + $0x20] sm:$0xff] %v7472_v9   ;;  %v5840_v15 = vadd.f32 %v5816_v1, %v5450_v18 }
 0x6f4   : > { %v5860_v57 = vadd.f32 %v11404_v11, %v5840_v15 }
 0x6f5   : > { %v5768_v29 = vpop.f32.mrf.mxu3 }
 0x6f6   : > { %v5769_v0 = vadd.f32 %v5768_v29, %v5719_v3  ;;  %v5876_v30 = vmax.f32 %v5860_v57, 0.0 }
 0x6f8   : > { %v5818_v59 = vadd.f32 %v5817_v38, %v5769_v0  ;;  %v5724_v24 = vpop.f32.mrf.mxu2  ;;  %v5461_v3 = vpop.f32.mrf.mxu1 }
 0x6f9   : > { %v5462_v43 = vadd.f32 %v5461_v3, %v5413_v45 }
 0x6fa   : > { %v5841_v41 = vadd.f32 %v5818_v59, %v5452_v61 }
 0x6fc   : > { %v5861_v10 = vadd.f32 %v11404_v11, %v5841_v41 }
 0x6fd   : > { %v5771_v56 = vpop.f32.mrf.mxu3 }
 0x6fe   : > { %v5877_v46 = vmax.f32 %v5861_v10, 0.0  ;;  %v5772_v33 = vadd.f32 %v5771_v56, %v5722_v52 }
 0x700   : > { %v7477_v19 = vpack.c.bf16 %v5877_v46, %v5876_v30  ;;  %v5821_v39 = vadd.f32 %v5820_v62, %v5772_v33  ;;  %v5727_v26 = vpop.f32.mrf.mxu2 }
 0x702   : > { %7495 = vst [vmem:[%s11413_s27 + $0x28] sm:$0xff] %v7477_v19   ;;  %v5842_v60 = vadd.f32 %v5821_v39, %v5455_v32 }
 0x704   : > { %v5862_v35 = vadd.f32 %v11404_v11, %v5842_v60 }
 0x705   : > { %v5773_v49 = vpop.f32.mrf.mxu3 }
 0x706   : > { %v5774_v28 = vadd.f32 %v5773_v49, %v5724_v24  ;;  %v5878_v2 = vmax.f32 %v5862_v35, 0.0 }
 0x708   : > { %v5823_v63 = vadd.f32 %v5822_v16, %v5774_v28  ;;  %v5729_v47 = vpop.f32.mrf.mxu2 }
 0x70a   : > { %v5843_v4 = vadd.f32 %v5823_v63, %v5457_v13 }
 0x70c   : > { %v5863_v53 = vadd.f32 %v11404_v11, %v5843_v4 }
 0x70d   : > { %v5776_v51 = vpop.f32.mrf.mxu3 }
 0x70e   : > { %v5879_v14 = vmax.f32 %v5863_v53, 0.0  ;;  %v5777_v8 = vadd.f32 %v5776_v51, %v5727_v26 }
 0x710   : > { %v7482_v54 = vpack.c.bf16 %v5879_v14, %v5878_v2  ;;  %v5826_v27 = vadd.f32 %v5825_v36, %v5777_v8 }
 0x712   : > { %7496 = vst [vmem:[%s11413_s27 + $0x30] sm:$0xff] %v7482_v54   ;;  %v5844_v44 = vadd.f32 %v5826_v27, %v5460_v20 }
 0x714   : > { %v5864_v12 = vadd.f32 %v11404_v11, %v5844_v44 }
 0x715   : > { %v5778_v31 = vpop.f32.mrf.mxu3 }
 0x716   : > { %v5779_v6 = vadd.f32 %v5778_v31, %v5729_v47  ;;  %v5880_v40 = vmax.f32 %v5864_v12, 0.0 }
 0x718   : > { %v5828_v22 = vadd.f32 %v5827_v5, %v5779_v6 }
 0x71a   : > { %v5845_v34 = vadd.f32 %v5828_v22, %v5462_v43 }
 0x71c   : > { %v5865_v48 = vadd.f32 %v11404_v11, %v5845_v34 }
 0x71e   : > { %v5881_v23 = vmax.f32 %v5865_v48, 0.0 }
 0x720   : > { %v7487_v25 = vpack.c.bf16 %v5881_v23, %v5880_v40 }
 0x722   : > { %7497 = vst [vmem:[%s11413_s27 + $0x38] sm:$0xff] %v7487_v25  }
 0x723   : > { %7619 = shalt.err (!%p7616_p9)
}
 0x724   : > { %s7688_s18 = smov 64   ;;  %s7689_s27 = smov 4  }
 0x725   : > { %7515 = dma.vmem_to_hbm [thread:$0]  (%p7776_p3), %s5931_s20, 1024, %s5933_s9, %s5915_s12, %s7688_s18, %s7688_s18, %s7689_s27  }
 0x726 PF: > { %p7521_p10 = scmp.ge.s32.totalorder %s7686_s28, 2  ;;  %s5947_s13 = sand.u32 1, %s7658_s21  }
 0x727   : > { %s5948_s15 = scalar_lea.sflag [#allocation3], %s5947_s13 }
 0x728   : > { %p7518_p11 = pnand %p7521_p10, %p7785_p8 }
 0x72a   : > { %p7519_p12 = pneg %p7518_p11 }
 0x72c   : > { %7653 = dma.done.wait (%p7519_p12), %s5948_s15, 1024  }
 0x72d   : > { %7655 = vsyncadd (%p7519_p12), %s5948_s15, 4294966272  ;;  %s19_s28 = sadd.s32 1, %s7686_s28   ;;  %s12420_s19 = sld [smem:[#allocation9_spill]] }
 0x72e   : > { %p16_p13 = scmp.ge.s32.totalorder %s19_s28, 6   ;;  %s12421_s24 = sld [smem:[#allocation5_spill]] }
 0x72f   : > { %s12422_s25 = sld [smem:[#allocation6_spill]]  ;;  %s12425_s21 = smov %s7662_s22 }
 0x730   : > { %s12423_s26 = sld [smem:[#allocation7_spill]]  ;;  %s12426_s22 = smov %s7666_s23 }
 0x731   : > { %s12424_s27 = sld [smem:[#allocation8_spill]]  ;;  %18 = sbr.rel (!%p16_p13) target bundleno = 5 (0x5), region = 86 }
 0x733   : > { %s12427_s23 = smov %s12420_s19 }
 0x736   :  { %5954 = vsyncpa [#allocation3], 1 }
 0x737   :  { %5956 = vsyncpa [#allocation3 + $0x1], 1 }

</bundles_post_ra>
